<compile_context>
chip_gen: v5e
topology: v5e:2x2
jax: 0.10.0
libtpu: 0.0.40
codegen_flags: <defaults>
</compile_context>

<pallas_src>
import numpy as np
import jax
import jax.numpy as jnp
from jax.experimental import pallas as pl
from jax.experimental.pallas import tpu as pltpu


# ----------------------------- model dimensions ------------------------------

NZ  = 16   # latent (noise) channels
NGF = 8    # generator feature width
NDF = 8    # discriminator feature width
NC  = 3    # image channels
IMG = 16   # generated image height / width

_BN_EPS = 1e-5
# Set to jnp.bfloat16 on v6e/v7x for ~2x MXU rate and half the weight-slab HBM
# traffic (accumulation stays f32 via preferred_element_type).  Default f32 to
# match PyTorch numerics; v5e keeps all elementwise math in f32 either way.
_MXU_DTYPE = jnp.float32


# --------------------- offline conv -> matmul lowering ------------------------
# (runs once per weight set, outside the jitted forward pass)

def _conv_gather(kh, kw, in_hw, out_hw, stride, pad, transposed):
    """0/1 tensor G[kh, kw, IH*IW, OH*OW] encoding the conv tap gather."""
    ih_n, iw_n = in_hw
    oh_n, ow_n = out_hw
    g = np.zeros((kh, kw, ih_n * iw_n, oh_n * ow_n), np.float32)
    for ki in range(kh):
        for kj in range(kw):
            if transposed:
                for ih in range(ih_n):
                    oh = ih * stride + ki - pad
                    if not 0 <= oh < oh_n:
                        continue
                    for iw in range(iw_n):
                        ow = iw * stride + kj - pad
                        if 0 <= ow < ow_n:
                            g[ki, kj, ih * iw_n + iw, oh * ow_n + ow] = 1.0
            else:
                for oh in range(oh_n):
                    ih = oh * stride + ki - pad
                    if not 0 <= ih < ih_n:
                        continue
                    for ow in range(ow_n):
                        iw = ow * stride + kj - pad
                        if 0 <= iw < iw_n:
                            g[ki, kj, ih * iw_n + iw, oh * ow_n + ow] = 1.0
    return g


def _lower_conv(w, b, in_hw, stride, pad, transposed):
    """Fold conv weights + im2col pattern into one dense matmul operand.

    Returns (M [IC*IH*IW, OC*OH*OW], bias_row [1, OC*OH*OW], (OH, OW)).
    """
    if transposed:           # PyTorch ConvTranspose2d weight layout: [IC, OC, KH, KW]
        ic, oc, kh, kw = w.shape
        oh = (in_hw[0] - 1) * stride - 2 * pad + kh
        ow = (in_hw[1] - 1) * stride - 2 * pad + kw
        eq = "iokl,klse->isoe"
    else:                    # PyTorch Conv2d weight layout: [OC, IC, KH, KW]
        oc, ic, kh, kw = w.shape
        oh = (in_hw[0] + 2 * pad - kh) // stride + 1
        ow = (in_hw[1] + 2 * pad - kw) // stride + 1
        eq = "oikl,klse->isoe"
    g = jnp.asarray(_conv_gather(kh, kw, in_hw, (oh, ow), stride, pad, transposed))
    m = jnp.einsum(eq, w, g).reshape(ic * in_hw[0] * in_hw[1], oc * oh * ow)
    bias_row = jnp.repeat(b, oh * ow).reshape(1, oc * oh * ow)
    return m.astype(_MXU_DTYPE), bias_row.astype(jnp.float32), (oh, ow)


def _bn_segments(c, hw):
    """0/1 segment-sum matrix S[C*HW, C] (and its transpose) for per-channel
    statistics over the lane-major [B, C*HW] activation layout."""
    s = np.kron(np.eye(c, dtype=np.float32), np.ones((hw, 1), np.float32))
    return jnp.asarray(s), jnp.asarray(s.T)


# ------------------------------- parameters -----------------------------------

def init_params(key):
    ks = jax.random.split(key, 6)
    n = lambda k, s: jax.random.normal(k, s, jnp.float32) * 0.02
    return {
        # generator (ConvTranspose2d weights: [IC, OC, KH, KW])
        "g1_w": n(ks[0], (NZ, NGF * 2, 4, 4)), "g1_b": jnp.zeros((NGF * 2,)),
        "g1_gamma": jnp.ones((NGF * 2,)), "g1_beta": jnp.zeros((NGF * 2,)),
        "g2_w": n(ks[1], (NGF * 2, NGF, 4, 4)), "g2_b": jnp.zeros((NGF,)),
        "g2_gamma": jnp.ones((NGF,)), "g2_beta": jnp.zeros((NGF,)),
        "g3_w": n(ks[2], (NGF, NC, 4, 4)), "g3_b": jnp.zeros((NC,)),
        # discriminator (Conv2d weights: [OC, IC, KH, KW])
        "d1_w": n(ks[3], (NDF, NC, 4, 4)), "d1_b": jnp.zeros((NDF,)),
        "d2_w": n(ks[4], (NDF * 2, NDF, 4, 4)), "d2_b": jnp.zeros((NDF * 2,)),
        "d2_gamma": jnp.ones((NDF * 2,)), "d2_beta": jnp.zeros((NDF * 2,)),
        "d3_w": n(ks[5], (1, NDF * 2, 4, 4)), "d3_b": jnp.zeros((1,)),
    }


def lower_params(p):
    """Pre-pack all weights into the matmul operands the fused kernel consumes."""
    row = lambda v: v.reshape(1, -1).astype(jnp.float32)

    g1_m, g1_bias, hw1 = _lower_conv(p["g1_w"], p["g1_b"], (1, 1), 1, 0, True)   # 4x4
    g1_s, g1_t = _bn_segments(NGF * 2, hw1[0] * hw1[1])
    g2_m, g2_bias, hw2 = _lower_conv(p["g2_w"], p["g2_b"], hw1, 2, 1, True)      # 8x8
    g2_s, g2_t = _bn_segments(NGF, hw2[0] * hw2[1])
    g3_m, g3_bias, hw3 = _lower_conv(p["g3_w"], p["g3_b"], hw2, 2, 1, True)      # 16x16
    d1_m, d1_bias, hw4 = _lower_conv(p["d1_w"], p["d1_b"], hw3, 2, 1, False)     # 8x8
    d2_m, d2_bias, hw5 = _lower_conv(p["d2_w"], p["d2_b"], hw4, 2, 1, False)     # 4x4
    d2_s, d2_t = _bn_segments(NDF * 2, hw5[0] * hw5[1])
    d3_m, d3_bias, hw6 = _lower_conv(p["d3_w"], p["d3_b"], hw5, 1, 0, False)     # 1x1
    assert hw3 == (IMG, IMG) and hw6 == (1, 1)

    return (
        g1_m, g1_bias, g1_s, g1_t, row(p["g1_gamma"]), row(p["g1_beta"]),
        g2_m, g2_bias, g2_s, g2_t, row(p["g2_gamma"]), row(p["g2_beta"]),
        g3_m, g3_bias,
        d1_m, d1_bias,
        d2_m, d2_bias, d2_s, d2_t, row(p["d2_gamma"]), row(p["d2_beta"]),
        d3_m, d3_bias,
    )


# --------------------------- fused forward kernel -----------------------------

def _dcgan_kernel(
    x_ref,
    g1_m, g1_b, g1_s, g1_t, g1_ga, g1_be,
    g2_m, g2_b, g2_s, g2_t, g2_ga, g2_be,
    g3_m, g3_b,
    d1_m, d1_b,
    d2_m, d2_b, d2_s, d2_t, d2_ga, d2_be,
    d3_m, d3_b,
    gen_ref, disc_ref,
):
    f32 = jnp.float32

    def conv(x, m_ref, b_ref):
        # x: [B, IC*IH*IW] (lane-dense); M: [IC*IH*IW, OC*OH*OW]; one MXU pass.
        y = jnp.dot(x.astype(_MXU_DTYPE), m_ref[...], preferred_element_type=f32)
        return y + b_ref[...]

    def batchnorm(y, s_ref, t_ref, ga_ref, be_ref):
        # y: [B, C*HW]; training-mode batch stats via 0/1 segment matmuls so
        # reduction and broadcast stay lane-dense and on the MXU.
        seg, seg_t = s_ref[...], t_ref[...]
        count = y.shape[0] * (seg.shape[0] // seg.shape[1])        # B * H * W
        inv_n = 1.0 / count
        mean = jnp.sum(jnp.dot(y, seg, preferred_element_type=f32),
                       axis=0, keepdims=True) * inv_n              # [1, C]
        centered = y - jnp.dot(mean, seg_t, preferred_element_type=f32)
        var = jnp.sum(jnp.dot(centered * centered, seg,
                              preferred_element_type=f32),
                      axis=0, keepdims=True) * inv_n               # [1, C] biased var
        scale = ga_ref[...] * jax.lax.rsqrt(var + _BN_EPS)         # [1, C]
        scale_row = jnp.dot(scale, seg_t, preferred_element_type=f32)
        beta_row = jnp.dot(be_ref[...], seg_t, preferred_element_type=f32)
        return centered * scale_row + beta_row

    relu = lambda v: jnp.maximum(v, 0.0)
    lrelu = lambda v: jnp.where(v >= 0.0, v, 0.2 * v)

    x = x_ref[...]                                                       # [B, NZ]

    # ----- generator -----
    y = relu(batchnorm(conv(x, g1_m, g1_b), g1_s, g1_t, g1_ga, g1_be))   # [B, 16*4*4]
    y = relu(batchnorm(conv(y, g2_m, g2_b), g2_s, g2_t, g2_ga, g2_be))   # [B, 8*8*8]
    gen = jnp.tanh(conv(y, g3_m, g3_b))                                  # [B, 3*16*16]
    gen_ref[...] = gen

    # ----- discriminator (consumes the VMEM-resident generator output) -----
    y = lrelu(conv(gen, d1_m, d1_b))                                     # [B, 8*8*8]
    y = lrelu(batchnorm(conv(y, d2_m, d2_b), d2_s, d2_t, d2_ga, d2_be))  # [B, 16*4*4]
    logits = conv(y, d3_m, d3_b)                                         # [B, 1]
    disc_ref[...] = pl.reciprocal(1.0 + jnp.exp(-logits), approx=True)   # sigmoid


@jax.jit
def dcgan_forward(lowered, noise):
    b = noise.shape[0]
    x = noise.reshape(b, NZ)                      # [B, NZ, 1, 1] -> [B, NZ] (free)
    inputs = (x,) + tuple(lowered)

    out_shapes = (jax.ShapeDtypeStruct((b, NC * IMG * IMG), jnp.float32),
                  jax.ShapeDtypeStruct((b, 1), jnp.float32))

    in_bytes = sum(int(np.prod(a.shape)) * a.dtype.itemsize for a in inputs)
    out_bytes = sum(int(np.prod(s.shape)) * 4 for s in out_shapes)
    mat_flops = 2 * b * sum(a.shape[0] * a.shape[1]
                            for a in lowered if a.ndim == 2 and a.shape[0] > 1)
    cost = pl.CostEstimate(flops=int(mat_flops),
                           transcendentals=int(b * (NC * IMG * IMG + 64)),
                           bytes_accessed=int(in_bytes + out_bytes))

    gen_flat, disc_flat = pl.pallas_call(
        _dcgan_kernel,
        out_shape=out_shapes,
        in_specs=[pl.BlockSpec(memory_space=pltpu.MemorySpace.VMEM)] * len(inputs),
        out_specs=(pl.BlockSpec(memory_space=pltpu.MemorySpace.VMEM),
                   pl.BlockSpec(memory_space=pltpu.MemorySpace.VMEM)),
        compiler_params=pltpu.CompilerParams(vmem_limit_bytes=32 * 1024 * 1024),
        cost_estimate=cost,
    )(*inputs)

    gen_imgs = gen_flat.reshape(b, NC, IMG, IMG)   # NCHW; row-major reshape is free
    disc_imgs = disc_flat.reshape(b, 1, 1, 1)
    # NOTE: PyTorch DCGan.forward has no return statement (returns None); we
    # return both intermediates so the computation is observable.
    return gen_imgs, disc_imgs


# ----------------------------------- main --------------------------------------

if __name__ == "__main__":
    key = jax.random.PRNGKey(0)
    pkey, nkey = jax.random.split(key)
    params = init_params(pkey)
    lowered = lower_params(params)      # one-time offline weight repack

    B = 2
    noise = jax.random.normal(nkey, (B, NZ, 1, 1), jnp.float32)

    gen_imgs, disc_imgs = dcgan_forward(lowered, noise)
    jax.block_until_ready((gen_imgs, disc_imgs))

    assert gen_imgs.shape == (B, NC, IMG, IMG)
    assert disc_imgs.shape == (B, 1, 1, 1)
    assert bool(jnp.all(jnp.isfinite(gen_imgs)))
    assert bool(jnp.all(jnp.isfinite(disc_imgs)))
    assert bool(jnp.all((disc_imgs > 0.0) & (disc_imgs < 1.0)))
    print("KERNEL_OK")
</pallas_src>

<mosaic_0001>
module attributes {stable_mosaic.version = 11 : i64} {
  func.func @_dcgan_kernel(%arg0: memref<2x16xf32, #tpu.memory_space<vmem>>, %arg1: memref<16x256xf32, #tpu.memory_space<vmem>>, %arg2: memref<1x256xf32, #tpu.memory_space<vmem>>, %arg3: memref<256x16xf32, #tpu.memory_space<vmem>>, %arg4: memref<16x256xf32, #tpu.memory_space<vmem>>, %arg5: memref<1x16xf32, #tpu.memory_space<vmem>>, %arg6: memref<1x16xf32, #tpu.memory_space<vmem>>, %arg7: memref<256x512xf32, #tpu.memory_space<vmem>>, %arg8: memref<1x512xf32, #tpu.memory_space<vmem>>, %arg9: memref<512x8xf32, #tpu.memory_space<vmem>>, %arg10: memref<8x512xf32, #tpu.memory_space<vmem>>, %arg11: memref<1x8xf32, #tpu.memory_space<vmem>>, %arg12: memref<1x8xf32, #tpu.memory_space<vmem>>, %arg13: memref<512x768xf32, #tpu.memory_space<vmem>>, %arg14: memref<1x768xf32, #tpu.memory_space<vmem>>, %arg15: memref<768x512xf32, #tpu.memory_space<vmem>>, %arg16: memref<1x512xf32, #tpu.memory_space<vmem>>, %arg17: memref<512x256xf32, #tpu.memory_space<vmem>>, %arg18: memref<1x256xf32, #tpu.memory_space<vmem>>, %arg19: memref<256x16xf32, #tpu.memory_space<vmem>>, %arg20: memref<16x256xf32, #tpu.memory_space<vmem>>, %arg21: memref<1x16xf32, #tpu.memory_space<vmem>>, %arg22: memref<1x16xf32, #tpu.memory_space<vmem>>, %arg23: memref<256x1xf32, #tpu.memory_space<vmem>>, %arg24: memref<1x1xf32, #tpu.memory_space<vmem>>, %arg25: memref<2x768xf32, #tpu.memory_space<vmem>>, %arg26: memref<2x1xf32, #tpu.memory_space<vmem>>) attributes {dimension_semantics = [], scalar_prefetch = 0 : i64, scratch_operands = 0 : i64, tpu.core_type = #tpu.core_type<tc>} {
    %c0 = arith.constant 0 : index
    %c0_0 = arith.constant 0 : index
    %0 = vector.load %arg0[%c0, %c0_0] : memref<2x16xf32, #tpu.memory_space<vmem>>, vector<2x16xf32>
    %c0_1 = arith.constant 0 : index
    %c0_2 = arith.constant 0 : index
    %1 = vector.load %arg1[%c0_1, %c0_2] : memref<16x256xf32, #tpu.memory_space<vmem>>, vector<16x256xf32>
    %cst = arith.constant dense<0.000000e+00> : vector<2x256xf32>
    %2 = tpu.matmul %0, %1, %cst {dimension_numbers = #tpu.dot_dimension_numbers<[1], [0], [0], [1], [0, 0, 1, 1], [], []>} : vector<2x16xf32>, vector<16x256xf32>, vector<2x256xf32> -> vector<2x256xf32>
    %c0_3 = arith.constant 0 : index
    %c0_4 = arith.constant 0 : index
    %3 = vector.load %arg2[%c0_3, %c0_4] : memref<1x256xf32, #tpu.memory_space<vmem>>, vector<1x256xf32>
    %4 = vector.broadcast %3 : vector<1x256xf32> to vector<2x256xf32>
    %5 = arith.addf %2, %4 : vector<2x256xf32>
    %c0_5 = arith.constant 0 : index
    %c0_6 = arith.constant 0 : index
    %6 = vector.load %arg3[%c0_5, %c0_6] : memref<256x16xf32, #tpu.memory_space<vmem>>, vector<256x16xf32>
    %c0_7 = arith.constant 0 : index
    %c0_8 = arith.constant 0 : index
    %7 = vector.load %arg4[%c0_7, %c0_8] : memref<16x256xf32, #tpu.memory_space<vmem>>, vector<16x256xf32>
    %cst_9 = arith.constant dense<0.000000e+00> : vector<2x16xf32>
    %8 = tpu.matmul %5, %6, %cst_9 {dimension_numbers = #tpu.dot_dimension_numbers<[1], [0], [0], [1], [0, 0, 1, 1], [], []>} : vector<2x256xf32>, vector<256x16xf32>, vector<2x16xf32> -> vector<2x16xf32>
    %cst_10 = arith.constant dense<0.000000e+00> : vector<16xf32>
    %9 = vector.multi_reduction <add>, %8, %cst_10 [0] : vector<2x16xf32> to vector<16xf32>
    %10 = vector.shape_cast %9 : vector<16xf32> to vector<1x16xf32>
    %cst_11 = arith.constant 3.125000e-02 : f32
    %11 = vector.broadcast %cst_11 : f32 to vector<1x16xf32>
    %12 = arith.mulf %10, %11 : vector<1x16xf32>
    %cst_12 = arith.constant dense<0.000000e+00> : vector<1x256xf32>
    %13 = tpu.matmul %12, %7, %cst_12 {dimension_numbers = #tpu.dot_dimension_numbers<[1], [0], [0], [1], [0, 0, 1, 1], [], []>} : vector<1x16xf32>, vector<16x256xf32>, vector<1x256xf32> -> vector<1x256xf32>
    %14 = vector.broadcast %13 : vector<1x256xf32> to vector<2x256xf32>
    %15 = arith.subf %5, %14 : vector<2x256xf32>
    %16 = arith.mulf %15, %15 : vector<2x256xf32>
    %cst_13 = arith.constant dense<0.000000e+00> : vector<2x16xf32>
    %17 = tpu.matmul %16, %6, %cst_13 {dimension_numbers = #tpu.dot_dimension_numbers<[1], [0], [0], [1], [0, 0, 1, 1], [], []>} : vector<2x256xf32>, vector<256x16xf32>, vector<2x16xf32> -> vector<2x16xf32>
    %cst_14 = arith.constant dense<0.000000e+00> : vector<16xf32>
    %18 = vector.multi_reduction <add>, %17, %cst_14 [0] : vector<2x16xf32> to vector<16xf32>
    %19 = vector.shape_cast %18 : vector<16xf32> to vector<1x16xf32>
    %cst_15 = arith.constant 3.125000e-02 : f32
    %20 = vector.broadcast %cst_15 : f32 to vector<1x16xf32>
    %21 = arith.mulf %19, %20 : vector<1x16xf32>
    %c0_16 = arith.constant 0 : index
    %c0_17 = arith.constant 0 : index
    %22 = vector.load %arg5[%c0_16, %c0_17] : memref<1x16xf32, #tpu.memory_space<vmem>>, vector<1x16xf32>
    %cst_18 = arith.constant 9.99999974E-6 : f32
    %23 = vector.broadcast %cst_18 : f32 to vector<1x16xf32>
    %24 = arith.addf %21, %23 : vector<1x16xf32>
    %25 = math.rsqrt %24 : vector<1x16xf32>
    %26 = arith.mulf %22, %25 : vector<1x16xf32>
    %cst_19 = arith.constant dense<0.000000e+00> : vector<1x256xf32>
    %27 = tpu.matmul %26, %7, %cst_19 {dimension_numbers = #tpu.dot_dimension_numbers<[1], [0], [0], [1], [0, 0, 1, 1], [], []>} : vector<1x16xf32>, vector<16x256xf32>, vector<1x256xf32> -> vector<1x256xf32>
    %c0_20 = arith.constant 0 : index
    %c0_21 = arith.constant 0 : index
    %28 = vector.load %arg6[%c0_20, %c0_21] : memref<1x16xf32, #tpu.memory_space<vmem>>, vector<1x16xf32>
    %cst_22 = arith.constant dense<0.000000e+00> : vector<1x256xf32>
    %29 = tpu.matmul %28, %7, %cst_22 {dimension_numbers = #tpu.dot_dimension_numbers<[1], [0], [0], [1], [0, 0, 1, 1], [], []>} : vector<1x16xf32>, vector<16x256xf32>, vector<1x256xf32> -> vector<1x256xf32>
    %30 = vector.broadcast %27 : vector<1x256xf32> to vector<2x256xf32>
    %31 = arith.mulf %15, %30 : vector<2x256xf32>
    %32 = vector.broadcast %29 : vector<1x256xf32> to vector<2x256xf32>
    %33 = arith.addf %31, %32 : vector<2x256xf32>
    %cst_23 = arith.constant 0.000000e+00 : f32
    %34 = vector.broadcast %cst_23 : f32 to vector<2x256xf32>
    %35 = arith.maximumf %33, %34 : vector<2x256xf32>
    %c0_24 = arith.constant 0 : index
    %c0_25 = arith.constant 0 : index
    %36 = vector.load %arg7[%c0_24, %c0_25] : memref<256x512xf32, #tpu.memory_space<vmem>>, vector<256x512xf32>
    %cst_26 = arith.constant dense<0.000000e+00> : vector<2x512xf32>
    %37 = tpu.matmul %35, %36, %cst_26 {dimension_numbers = #tpu.dot_dimension_numbers<[1], [0], [0], [1], [0, 0, 1, 1], [], []>} : vector<2x256xf32>, vector<256x512xf32>, vector<2x512xf32> -> vector<2x512xf32>
    %c0_27 = arith.constant 0 : index
    %c0_28 = arith.constant 0 : index
    %38 = vector.load %arg8[%c0_27, %c0_28] : memref<1x512xf32, #tpu.memory_space<vmem>>, vector<1x512xf32>
    %39 = vector.broadcast %38 : vector<1x512xf32> to vector<2x512xf32>
    %40 = arith.addf %37, %39 : vector<2x512xf32>
    %c0_29 = arith.constant 0 : index
    %c0_30 = arith.constant 0 : index
    %41 = vector.load %arg9[%c0_29, %c0_30] : memref<512x8xf32, #tpu.memory_space<vmem>>, vector<512x8xf32>
    %c0_31 = arith.constant 0 : index
    %c0_32 = arith.constant 0 : index
    %42 = vector.load %arg10[%c0_31, %c0_32] : memref<8x512xf32, #tpu.memory_space<vmem>>, vector<8x512xf32>
    %cst_33 = arith.constant dense<0.000000e+00> : vector<2x8xf32>
    %43 = tpu.matmul %40, %41, %cst_33 {dimension_numbers = #tpu.dot_dimension_numbers<[1], [0], [0], [1], [0, 0, 1, 1], [], []>} : vector<2x512xf32>, vector<512x8xf32>, vector<2x8xf32> -> vector<2x8xf32>
    %cst_34 = arith.constant dense<0.000000e+00> : vector<8xf32>
    %44 = vector.multi_reduction <add>, %43, %cst_34 [0] : vector<2x8xf32> to vector<8xf32>
    %45 = vector.shape_cast %44 : vector<8xf32> to vector<1x8xf32>
    %cst_35 = arith.constant 7.812500e-03 : f32
    %46 = vector.broadcast %cst_35 : f32 to vector<1x8xf32>
    %47 = arith.mulf %45, %46 : vector<1x8xf32>
    %cst_36 = arith.constant dense<0.000000e+00> : vector<1x512xf32>
    %48 = tpu.matmul %47, %42, %cst_36 {dimension_numbers = #tpu.dot_dimension_numbers<[1], [0], [0], [1], [0, 0, 1, 1], [], []>} : vector<1x8xf32>, vector<8x512xf32>, vector<1x512xf32> -> vector<1x512xf32>
    %49 = vector.broadcast %48 : vector<1x512xf32> to vector<2x512xf32>
    %50 = arith.subf %40, %49 : vector<2x512xf32>
    %51 = arith.mulf %50, %50 : vector<2x512xf32>
    %cst_37 = arith.constant dense<0.000000e+00> : vector<2x8xf32>
    %52 = tpu.matmul %51, %41, %cst_37 {dimension_numbers = #tpu.dot_dimension_numbers<[1], [0], [0], [1], [0, 0, 1, 1], [], []>} : vector<2x512xf32>, vector<512x8xf32>, vector<2x8xf32> -> vector<2x8xf32>
    %cst_38 = arith.constant dense<0.000000e+00> : vector<8xf32>
    %53 = vector.multi_reduction <add>, %52, %cst_38 [0] : vector<2x8xf32> to vector<8xf32>
    %54 = vector.shape_cast %53 : vector<8xf32> to vector<1x8xf32>
    %cst_39 = arith.constant 7.812500e-03 : f32
    %55 = vector.broadcast %cst_39 : f32 to vector<1x8xf32>
    %56 = arith.mulf %54, %55 : vector<1x8xf32>
    %c0_40 = arith.constant 0 : index
    %c0_41 = arith.constant 0 : index
    %57 = vector.load %arg11[%c0_40, %c0_41] : memref<1x8xf32, #tpu.memory_space<vmem>>, vector<1x8xf32>
    %cst_42 = arith.constant 9.99999974E-6 : f32
    %58 = vector.broadcast %cst_42 : f32 to vector<1x8xf32>
    %59 = arith.addf %56, %58 : vector<1x8xf32>
    %60 = math.rsqrt %59 : vector<1x8xf32>
    %61 = arith.mulf %57, %60 : vector<1x8xf32>
    %cst_43 = arith.constant dense<0.000000e+00> : vector<1x512xf32>
    %62 = tpu.matmul %61, %42, %cst_43 {dimension_numbers = #tpu.dot_dimension_numbers<[1], [0], [0], [1], [0, 0, 1, 1], [], []>} : vector<1x8xf32>, vector<8x512xf32>, vector<1x512xf32> -> vector<1x512xf32>
    %c0_44 = arith.constant 0 : index
    %c0_45 = arith.constant 0 : index
    %63 = vector.load %arg12[%c0_44, %c0_45] : memref<1x8xf32, #tpu.memory_space<vmem>>, vector<1x8xf32>
    %cst_46 = arith.constant dense<0.000000e+00> : vector<1x512xf32>
    %64 = tpu.matmul %63, %42, %cst_46 {dimension_numbers = #tpu.dot_dimension_numbers<[1], [0], [0], [1], [0, 0, 1, 1], [], []>} : vector<1x8xf32>, vector<8x512xf32>, vector<1x512xf32> -> vector<1x512xf32>
    %65 = vector.broadcast %62 : vector<1x512xf32> to vector<2x512xf32>
    %66 = arith.mulf %50, %65 : vector<2x512xf32>
    %67 = vector.broadcast %64 : vector<1x512xf32> to vector<2x512xf32>
    %68 = arith.addf %66, %67 : vector<2x512xf32>
    %cst_47 = arith.constant 0.000000e+00 : f32
    %69 = vector.broadcast %cst_47 : f32 to vector<2x512xf32>
    %70 = arith.maximumf %68, %69 : vector<2x512xf32>
    %c0_48 = arith.constant 0 : index
    %c0_49 = arith.constant 0 : index
    %71 = vector.load %arg13[%c0_48, %c0_49] : memref<512x768xf32, #tpu.memory_space<vmem>>, vector<512x768xf32>
    %cst_50 = arith.constant dense<0.000000e+00> : vector<2x768xf32>
    %72 = tpu.matmul %70, %71, %cst_50 {dimension_numbers = #tpu.dot_dimension_numbers<[1], [0], [0], [1], [0, 0, 1, 1], [], []>} : vector<2x512xf32>, vector<512x768xf32>, vector<2x768xf32> -> vector<2x768xf32>
    %c0_51 = arith.constant 0 : index
    %c0_52 = arith.constant 0 : index
    %73 = vector.load %arg14[%c0_51, %c0_52] : memref<1x768xf32, #tpu.memory_space<vmem>>, vector<1x768xf32>
    %74 = vector.broadcast %73 : vector<1x768xf32> to vector<2x768xf32>
    %75 = arith.addf %72, %74 : vector<2x768xf32>
    %76 = math.tanh %75 : vector<2x768xf32>
    %c0_53 = arith.constant 0 : index
    %c0_54 = arith.constant 0 : index
    %77 = vector.load %arg25[%c0_53, %c0_54] : memref<2x768xf32, #tpu.memory_space<vmem>>, vector<2x768xf32>
    tpu.vector_store %arg25[%c0_53, %c0_54], %76 {strides = array<i32>} : memref<2x768xf32, #tpu.memory_space<vmem>>, vector<2x768xf32>,
    %c0_55 = arith.constant 0 : index
    %c0_56 = arith.constant 0 : index
    %78 = vector.load %arg15[%c0_55, %c0_56] : memref<768x512xf32, #tpu.memory_space<vmem>>, vector<768x512xf32>
    %cst_57 = arith.constant dense<0.000000e+00> : vector<2x512xf32>
    %79 = tpu.matmul %76, %78, %cst_57 {dimension_numbers = #tpu.dot_dimension_numbers<[1], [0], [0], [1], [0, 0, 1, 1], [], []>} : vector<2x768xf32>, vector<768x512xf32>, vector<2x512xf32> -> vector<2x512xf32>
    %c0_58 = arith.constant 0 : index
    %c0_59 = arith.constant 0 : index
    %80 = vector.load %arg16[%c0_58, %c0_59] : memref<1x512xf32, #tpu.memory_space<vmem>>, vector<1x512xf32>
    %81 = vector.broadcast %80 : vector<1x512xf32> to vector<2x512xf32>
    %82 = arith.addf %79, %81 : vector<2x512xf32>
    %cst_60 = arith.constant 0.000000e+00 : f32
    %83 = vector.broadcast %cst_60 : f32 to vector<2x512xf32>
    %84 = arith.cmpf oge, %82, %83 : vector<2x512xf32>
    %cst_61 = arith.constant 2.000000e-01 : f32
    %85 = vector.broadcast %cst_61 : f32 to vector<2x512xf32>
    %86 = arith.mulf %85, %82 : vector<2x512xf32>
    %87 = arith.select %84, %82, %86 : vector<2x512xi1>, vector<2x512xf32>
    %c0_62 = arith.constant 0 : index
    %c0_63 = arith.constant 0 : index
    %88 = vector.load %arg17[%c0_62, %c0_63] : memref<512x256xf32, #tpu.memory_space<vmem>>, vector<512x256xf32>
    %cst_64 = arith.constant dense<0.000000e+00> : vector<2x256xf32>
    %89 = tpu.matmul %87, %88, %cst_64 {dimension_numbers = #tpu.dot_dimension_numbers<[1], [0], [0], [1], [0, 0, 1, 1], [], []>} : vector<2x512xf32>, vector<512x256xf32>, vector<2x256xf32> -> vector<2x256xf32>
    %c0_65 = arith.constant 0 : index
    %c0_66 = arith.constant 0 : index
    %90 = vector.load %arg18[%c0_65, %c0_66] : memref<1x256xf32, #tpu.memory_space<vmem>>, vector<1x256xf32>
    %91 = vector.broadcast %90 : vector<1x256xf32> to vector<2x256xf32>
    %92 = arith.addf %89, %91 : vector<2x256xf32>
    %c0_67 = arith.constant 0 : index
    %c0_68 = arith.constant 0 : index
    %93 = vector.load %arg19[%c0_67, %c0_68] : memref<256x16xf32, #tpu.memory_space<vmem>>, vector<256x16xf32>
    %c0_69 = arith.constant 0 : index
    %c0_70 = arith.constant 0 : index
    %94 = vector.load %arg20[%c0_69, %c0_70] : memref<16x256xf32, #tpu.memory_space<vmem>>, vector<16x256xf32>
    %cst_71 = arith.constant dense<0.000000e+00> : vector<2x16xf32>
    %95 = tpu.matmul %92, %93, %cst_71 {dimension_numbers = #tpu.dot_dimension_numbers<[1], [0], [0], [1], [0, 0, 1, 1], [], []>} : vector<2x256xf32>, vector<256x16xf32>, vector<2x16xf32> -> vector<2x16xf32>
    %cst_72 = arith.constant dense<0.000000e+00> : vector<16xf32>
    %96 = vector.multi_reduction <add>, %95, %cst_72 [0] : vector<2x16xf32> to vector<16xf32>
    %97 = vector.shape_cast %96 : vector<16xf32> to vector<1x16xf32>
    %cst_73 = arith.constant 3.125000e-02 : f32
    %98 = vector.broadcast %cst_73 : f32 to vector<1x16xf32>
    %99 = arith.mulf %97, %98 : vector<1x16xf32>
    %cst_74 = arith.constant dense<0.000000e+00> : vector<1x256xf32>
    %100 = tpu.matmul %99, %94, %cst_74 {dimension_numbers = #tpu.dot_dimension_numbers<[1], [0], [0], [1], [0, 0, 1, 1], [], []>} : vector<1x16xf32>, vector<16x256xf32>, vector<1x256xf32> -> vector<1x256xf32>
    %101 = vector.broadcast %100 : vector<1x256xf32> to vector<2x256xf32>
    %102 = arith.subf %92, %101 : vector<2x256xf32>
    %103 = arith.mulf %102, %102 : vector<2x256xf32>
    %cst_75 = arith.constant dense<0.000000e+00> : vector<2x16xf32>
    %104 = tpu.matmul %103, %93, %cst_75 {dimension_numbers = #tpu.dot_dimension_numbers<[1], [0], [0], [1], [0, 0, 1, 1], [], []>} : vector<2x256xf32>, vector<256x16xf32>, vector<2x16xf32> -> vector<2x16xf32>
    %cst_76 = arith.constant dense<0.000000e+00> : vector<16xf32>
    %105 = vector.multi_reduction <add>, %104, %cst_76 [0] : vector<2x16xf32> to vector<16xf32>
    %106 = vector.shape_cast %105 : vector<16xf32> to vector<1x16xf32>
    %cst_77 = arith.constant 3.125000e-02 : f32
    %107 = vector.broadcast %cst_77 : f32 to vector<1x16xf32>
    %108 = arith.mulf %106, %107 : vector<1x16xf32>
    %c0_78 = arith.constant 0 : index
    %c0_79 = arith.constant 0 : index
    %109 = vector.load %arg21[%c0_78, %c0_79] : memref<1x16xf32, #tpu.memory_space<vmem>>, vector<1x16xf32>
    %cst_80 = arith.constant 9.99999974E-6 : f32
    %110 = vector.broadcast %cst_80 : f32 to vector<1x16xf32>
    %111 = arith.addf %108, %110 : vector<1x16xf32>
    %112 = math.rsqrt %111 : vector<1x16xf32>
    %113 = arith.mulf %109, %112 : vector<1x16xf32>
    %cst_81 = arith.constant dense<0.000000e+00> : vector<1x256xf32>
    %114 = tpu.matmul %113, %94, %cst_81 {dimension_numbers = #tpu.dot_dimension_numbers<[1], [0], [0], [1], [0, 0, 1, 1], [], []>} : vector<1x16xf32>, vector<16x256xf32>, vector<1x256xf32> -> vector<1x256xf32>
    %c0_82 = arith.constant 0 : index
    %c0_83 = arith.constant 0 : index
    %115 = vector.load %arg22[%c0_82, %c0_83] : memref<1x16xf32, #tpu.memory_space<vmem>>, vector<1x16xf32>
    %cst_84 = arith.constant dense<0.000000e+00> : vector<1x256xf32>
    %116 = tpu.matmul %115, %94, %cst_84 {dimension_numbers = #tpu.dot_dimension_numbers<[1], [0], [0], [1], [0, 0, 1, 1], [], []>} : vector<1x16xf32>, vector<16x256xf32>, vector<1x256xf32> -> vector<1x256xf32>
    %117 = vector.broadcast %114 : vector<1x256xf32> to vector<2x256xf32>
    %118 = arith.mulf %102, %117 : vector<2x256xf32>
    %119 = vector.broadcast %116 : vector<1x256xf32> to vector<2x256xf32>
    %120 = arith.addf %118, %119 : vector<2x256xf32>
    %cst_85 = arith.constant 0.000000e+00 : f32
    %121 = vector.broadcast %cst_85 : f32 to vector<2x256xf32>
    %122 = arith.cmpf oge, %120, %121 : vector<2x256xf32>
    %cst_86 = arith.constant 2.000000e-01 : f32
    %123 = vector.broadcast %cst_86 : f32 to vector<2x256xf32>
    %124 = arith.mulf %123, %120 : vector<2x256xf32>
    %125 = arith.select %122, %120, %124 : vector<2x256xi1>, vector<2x256xf32>
    %c0_87 = arith.constant 0 : index
    %c0_88 = arith.constant 0 : index
    %126 = vector.load %arg23[%c0_87, %c0_88] : memref<256x1xf32, #tpu.memory_space<vmem>>, vector<256x1xf32>
    %cst_89 = arith.constant dense<0.000000e+00> : vector<2x1xf32>
    %127 = tpu.matmul %125, %126, %cst_89 {dimension_numbers = #tpu.dot_dimension_numbers<[1], [0], [0], [1], [0, 0, 1, 1], [], []>} : vector<2x256xf32>, vector<256x1xf32>, vector<2x1xf32> -> vector<2x1xf32>
    %c0_90 = arith.constant 0 : index
    %c0_91 = arith.constant 0 : index
    %128 = vector.load %arg24[%c0_90, %c0_91] : memref<1x1xf32, #tpu.memory_space<vmem>>, vector<1x1xf32>
    %129 = vector.broadcast %128 : vector<1x1xf32> to vector<2x1xf32>
    %130 = arith.addf %127, %129 : vector<2x1xf32>
    %cst_92 = arith.constant 0.000000e+00 : f32
    %131 = vector.broadcast %cst_92 : f32 to vector<2x1xf32>
    %132 = arith.subf %131, %130 : vector<2x1xf32>
    %133 = math.exp %132 : vector<2x1xf32>
    %cst_93 = arith.constant 1.000000e+00 : f32
    %134 = vector.broadcast %cst_93 : f32 to vector<2x1xf32>
    %135 = arith.addf %134, %133 : vector<2x1xf32>
    %136 = tpu.reciprocal %135 {approx = true} : vector<2x1xf32> -> vector<2x1xf32>
    %c0_94 = arith.constant 0 : index
    %c0_95 = arith.constant 0 : index
    %137 = vector.load %arg26[%c0_94, %c0_95] : memref<2x1xf32, #tpu.memory_space<vmem>>, vector<2x1xf32>
    tpu.vector_store %arg26[%c0_94, %c0_95], %136 {strides = array<i32>} : memref<2x1xf32, #tpu.memory_space<vmem>>, vector<2x1xf32>,
    return
  }
}

</mosaic_0001>

<bundles_post_ra>
// kernel: dcgan_forward.1
= control target key start
LH: loop header
LB: loop body
LE: loop exit
PB: predicated region body
PF: predicated region fallthrough
CT: control target
= control target key end

     0   :  { %s6076_s0 = inlined_call_operand.hbm [shape: f32[2,16], index: 0, kind: input, shape index: {}]   ;;  %s6077_s1 = inlined_call_operand.hbm [shape: f32[16,256], index: 1, kind: input, shape index: {}]   ;;  %s6078_s2 = inlined_call_operand.hbm [shape: f32[1,256], index: 2, kind: input, shape index: {}]   ;;  %s6079_s3 = inlined_call_operand.vmem [shape: f32[256,16], index: 3, kind: input, shape index: {}]   ;;  %s6080_s4 = inlined_call_operand.hbm [shape: f32[16,256], index: 4, kind: input, shape index: {}]   ;;  %s6081_s5 = inlined_call_operand.hbm [shape: f32[1,16], index: 5, kind: input, shape index: {}]   ;;  %s6082_s6 = inlined_call_operand.hbm [shape: f32[1,16], index: 6, kind: input, shape index: {}]   ;;  %s6083_s7 = inlined_call_operand.hbm [shape: f32[256,512], index: 7, kind: input, shape index: {}]   ;;  %s6084_s8 = inlined_call_operand.hbm [shape: f32[1,512], index: 8, kind: input, shape index: {}]   ;;  %s6085_s9 = inlined_call_operand.vmem [shape: f32[512,8], index: 9, kind: input, shape index: {}]   ;;  %s6086_s10 = inlined_call_operand.hbm [shape: f32[8,512], index: 10, kind: input, shape index: {}]   ;;  %s6087_s11 = inlined_call_operand.hbm [shape: f32[1,8], index: 11, kind: input, shape index: {}]   ;;  %s6088_s12 = inlined_call_operand.hbm [shape: f32[1,8], index: 12, kind: input, shape index: {}]   ;;  %s6089_s13 = inlined_call_operand.hbm [shape: f32[512,768], index: 13, kind: input, shape index: {}]   ;;  %s6090_s14 = inlined_call_operand.hbm [shape: f32[1,768], index: 14, kind: input, shape index: {}]   ;;  %s6091_s15 = inlined_call_operand.hbm [shape: f32[768,512], index: 15, kind: input, shape index: {}]   ;;  %s6092_s16 = inlined_call_operand.hbm [shape: f32[1,512], index: 16, kind: input, shape index: {}]   ;;  %s6093_s17 = inlined_call_operand.hbm [shape: f32[512,256], index: 17, kind: input, shape index: {}]   ;;  %s6094_s18 = inlined_call_operand.hbm [shape: f32[1,256], index: 18, kind: input, shape index: {}]   ;;  %s6095_s19 = inlined_call_operand.vmem [shape: f32[256,16], index: 19, kind: input, shape index: {}]   ;;  %s6096_s20 = inlined_call_operand.hbm [shape: f32[16,256], index: 20, kind: input, shape index: {}]   ;;  %s6097_s21 = inlined_call_operand.hbm [shape: f32[1,16], index: 21, kind: input, shape index: {}]   ;;  %s6098_s22 = inlined_call_operand.hbm [shape: f32[1,16], index: 22, kind: input, shape index: {}]   ;;  %s6099_s23 = inlined_call_operand.vmem [shape: f32[256,1], index: 23, kind: input, shape index: {}]   ;;  %s6100_s24 = inlined_call_operand.<no memory space> [shape: f32[1,1], index: 24, kind: input, shape index: {}]   ;;  %s6101_s25 = inlined_call_operand.vmem [shape: f32[2,768], index: 25, kind: output, shape index: {0}]   ;;  %s6102_s26 = inlined_call_operand.vmem [shape: f32[2,1], index: 26, kind: output, shape index: {1}]  }
   0x1   :  { %6122 = sst [smem:[#allocation62_spill]] %s6076_s0  ;;  %v32_v0 = vstv %s6100_s24 }
   0x2   :  { %6123 = sst [smem:[#allocation63_spill]] %s6077_s1  ;;  %33 = vst [vmem:[#allocation2] sm:$0x1] %v32_v0 }
   0x3   :  { %6124 = sst [smem:[#allocation64_spill]] %s6078_s2 }
   0x4   :  { %6125 = sst [smem:[#allocation65_spill]] %s6079_s3 }
   0x5   :  { %6126 = sst [smem:[#allocation66_spill]] %s6080_s4 }
   0x6   :  { %6127 = sst [smem:[#allocation67_spill]] %s6081_s5 }
   0x7   :  { %6128 = sst [smem:[#allocation68_spill]] %s6082_s6 }
   0x8   :  { %6129 = sst [smem:[#allocation69_spill]] %s6083_s7 }
   0x9   :  { %6130 = sst [smem:[#allocation70_spill]] %s6084_s8 }
   0xa   :  { %6131 = sst [smem:[#allocation71_spill]] %s6085_s9 }
   0xb   :  { %6132 = sst [smem:[#allocation72_spill]] %s6086_s10 }
   0xc   :  { %6133 = sst [smem:[#allocation73_spill]] %s6102_s26 }
   0xd   :  { %34 = vsyncpa [#allocation4], 0 }
   0xe   :  { %35 = vsyncpa [#allocation6], 0 }
   0xf   :  { %36 = vsyncpa [#allocation9], 0 }
  0x10   :  { %37 = vsyncpa [#allocation12], 0 }
  0x11   :  { %38 = vsyncpa [#allocation15], 0 }
  0x12   :  { %39 = vsyncpa [#allocation18], 0 }
  0x13   :  { %40 = vsyncpa [#allocation21], 0 }
  0x14   :  { %41 = vsyncpa [#allocation24], 0 }
  0x15   :  { %42 = vsyncpa [#allocation27], 0 }
  0x16   :  { %43 = vsyncpa [#allocation30], 0  ;;  %s6134_s8 = sld [smem:[#allocation63_spill]] }
  0x1c   :  { %s60_s4 = sshll.u32 %s6134_s8, 4  ;;  %s61_s4 = int_to_ptr.hbm [resolvable:$true] %s60_s4 }
  0x1d   :  { %44 = vsyncpa [#allocation33], 0  ;;  %s4614_s29 = smov [#allocation5]   ;;  %s6135_s30 = sld [smem:[#allocation66_spill]] }
  0x1e   :  { %s62_s0 = sshll.u32 %s4614_s29, 4  ;;  %s4615_s5 = smov 256   ;;  %s63_s0 = int_to_ptr.vmem [resolvable:$true] %s62_s0 }
  0x1f   :  { %s4616_s10 = smov 16   ;;  %s4617_s6 = smov [#allocation8]  }
  0x20   :  { %68 = dma.hbm_to_vmem [thread:$0]  %s61_s4, 512, %s63_s0, [#allocation6], %s4615_s5, %s4615_s5, %s4616_s10  }
  0x21   :  { %s88_s1 = sshll.u32 %s4617_s6, 4  ;;  %s6136_s7 = sld [smem:[#allocation68_spill]]  ;;  %s89_s1 = int_to_ptr.vmem [resolvable:$true] %s88_s1 }
  0x22   :  { %s6137_s24 = sld [smem:[#allocation70_spill]]  ;;  %s4619_s4 = smov [#allocation14]  }
  0x23   :  { %s86_s2 = sshll.u32 %s6135_s30, 4  ;;  %s4618_s30 = smov [#allocation11]   ;;  %s87_s2 = int_to_ptr.hbm [resolvable:$true] %s86_s2 }
  0x24   :  { %94 = dma.hbm_to_vmem [thread:$0]  %s87_s2, 512, %s89_s1, [#allocation9], %s4615_s5, %s4615_s5, %s4616_s10  }
  0x25   :  { %s113_s26 = sshll.u32 %s4618_s30, 4  ;;  %s137_s0 = sshll.u32 %s4619_s4, 4  ;;  %s114_s26 = int_to_ptr.vmem [resolvable:$true] %s113_s26  ;;  %s138_s0 = int_to_ptr.vmem [resolvable:$true] %s137_s0 }
  0x26   :  { %s159_s3 = sshll.u32 %s6087_s11, 4  ;;  %s180_s1 = sshll.u32 %s6089_s13, 4  ;;  %s160_s3 = int_to_ptr.hbm [resolvable:$true] %s159_s3  ;;  %s181_s1 = int_to_ptr.hbm [resolvable:$true] %s180_s1 }
  0x27   :  { %s111_s28 = sshll.u32 %s6136_s7, 4  ;;  %s4620_s8 = smov [#allocation17]   ;;  %s112_s28 = int_to_ptr.hbm [resolvable:$true] %s111_s28 }
  0x28   :  { %s135_s9 = sshll.u32 %s6137_s24, 4  ;;  %s161_s29 = sshll.u32 %s4620_s8, 4  ;;  %s136_s9 = int_to_ptr.hbm [resolvable:$true] %s135_s9  ;;  %s162_s29 = int_to_ptr.vmem [resolvable:$true] %s161_s29 }
  0x29   :  { %116 = dma.hbm_to_vmem [thread:$0]  %s112_s28, 16, %s114_s26, [#allocation12]  }
  0x2a   :  { %140 = dma.hbm_to_vmem [thread:$0]  %s136_s9, 64, %s138_s0, [#allocation15]  }
  0x2b   :  { %164 = dma.hbm_to_vmem [thread:$0]  %s160_s3, 16, %s162_s29, [#allocation18]  }
  0x2c   :  { %s4621_s24 = smov [#allocation20]   ;;  %s4622_s28 = smov 768  }
  0x2d   :  { %s182_s26 = sshll.u32 %s4621_s24, 4  ;;  %s4623_s30 = smov 48   ;;  %s183_s26 = int_to_ptr.vmem [resolvable:$true] %s182_s26 }
  0x2e   :  { %188 = dma.hbm_to_vmem [thread:$0]  %s181_s1, 49152, %s183_s26, [#allocation21], %s4622_s28, %s4622_s28, %s4623_s30  }
  0x2f   :  { %s204_s6 = sshll.u32 %s6091_s15, 4  ;;  %s4624_s9 = smov [#allocation23]   ;;  %s205_s6 = int_to_ptr.hbm [resolvable:$true] %s204_s6 }
  0x30   :  { %s206_s0 = sshll.u32 %s4624_s9, 4  ;;  %s228_s7 = sshll.u32 %s6093_s17, 4  ;;  %s207_s0 = int_to_ptr.vmem [resolvable:$true] %s206_s0  ;;  %s229_s7 = int_to_ptr.hbm [resolvable:$true] %s228_s7 }
  0x31   :  { %s4625_s2 = smov 512   ;;  %s4626_s3 = smov 32  }
  0x32   :  { %212 = dma.hbm_to_vmem [thread:$0]  %s205_s6, 49152, %s207_s0, [#allocation24], %s4625_s2, %s4625_s2, %s4626_s3  }
  0x33   :  { %s4627_s1 = smov [#allocation26]   ;;  %s254_s15 = sshll.u32 %s6096_s20, 4  ;;  %s255_s15 = int_to_ptr.hbm [resolvable:$true] %s254_s15 }
  0x34   :  { %s230_s8 = sshll.u32 %s4627_s1, 4  ;;  %s6138_s28 = sld [smem:[#allocation62_spill]]  ;;  %s231_s8 = int_to_ptr.vmem [resolvable:$true] %s230_s8 }
  0x35   :  { %236 = dma.hbm_to_vmem [thread:$0]  %s229_s7, 16384, %s231_s8, [#allocation27], %s4615_s5, %s4615_s5, %s4616_s10  }
  0x36   :  { %s4628_s4 = smov [#allocation29]   ;;  %s4629_s6 = smov [#allocation3]  }
  0x37   :  { %s256_s11 = sshll.u32 %s4628_s4, 4  ;;  %s52_s20 = sshll.u32 %s4629_s6, 4  ;;  %s257_s11 = int_to_ptr.vmem [resolvable:$true] %s256_s11  ;;  %s53_s20 = int_to_ptr.vmem [resolvable:$true] %s52_s20 }
  0x38   :  { %262 = dma.hbm_to_vmem [thread:$0]  %s255_s15, 512, %s257_s11, [#allocation30], %s4615_s5, %s4615_s5, %s4616_s10  }
  0x39   :  { %s6139_s13 = sld [smem:[#allocation64_spill]]  ;;  %s4630_s24 = smov [#allocation7]  }
  0x3a   :  { %s50_s30 = sshll.u32 %s6138_s28, 4  ;;  %s6140_s8 = sld [smem:[#allocation67_spill]]  ;;  %s51_s30 = int_to_ptr.hbm [resolvable:$true] %s50_s30 }
  0x3b   :  { %55 = dma.hbm_to_vmem [thread:$0]  %s51_s30, 32, %s53_s20, [#allocation4]  }
  0x3c   :  { %s76_s17 = sshll.u32 %s4630_s24, 4  ;;  %s4631_s26 = smov [#allocation10]   ;;  %s77_s17 = int_to_ptr.vmem [resolvable:$true] %s76_s17 }
  0x3d   :  { %s102_s5 = sshll.u32 %s4631_s26, 4  ;;  %s6141_s28 = sld [smem:[#allocation69_spill]]  ;;  %s103_s5 = int_to_ptr.vmem [resolvable:$true] %s102_s5 }
  0x3e   :  { %s6142_s6 = sld [smem:[#allocation72_spill]]  ;;  %s4632_s9 = smov [#allocation13]  }
  0x3f   :  { %s74_s27 = sshll.u32 %s6139_s13, 4  ;;  %s123_s0 = sshll.u32 %s4632_s9, 4  ;;  %s75_s27 = int_to_ptr.hbm [resolvable:$true] %s74_s27  ;;  %s124_s0 = int_to_ptr.vmem [resolvable:$true] %s123_s0 }
  0x40   :  { %s100_s29 = sshll.u32 %s6140_s8, 4  ;;  %s4633_s13 = smov [#allocation16]   ;;  %s101_s29 = int_to_ptr.hbm [resolvable:$true] %s100_s29 }
  0x41   :  { %79 = dma.hbm_to_vmem [thread:$0]  %s75_s27, 32, %s77_s17, [#allocation6]  }
  0x42   :  { %105 = dma.hbm_to_vmem [thread:$0]  %s101_s29, 16, %s103_s5, [#allocation9]  }
  0x43   :  { %s121_s4 = sshll.u32 %s6141_s28, 4  ;;  %s150_s27 = sshll.u32 %s4633_s13, 4  ;;  %s122_s4 = int_to_ptr.hbm [resolvable:$true] %s121_s4  ;;  %s151_s27 = int_to_ptr.vmem [resolvable:$true] %s150_s27 }
  0x44   :  { %s148_s20 = sshll.u32 %s6142_s6, 4  ;;  %s170_s8 = sshll.u32 %s6088_s12, 4  ;;  %s149_s20 = int_to_ptr.hbm [resolvable:$true] %s148_s20  ;;  %s171_s8 = int_to_ptr.hbm [resolvable:$true] %s170_s8 }
  0x45   :  { %129 = dma.hbm_to_vmem [thread:$0]  %s122_s4, 16384, %s124_s0, [#allocation12], %s4625_s2, %s4625_s2, %s4626_s3  }
  0x46   :  { %153 = dma.hbm_to_vmem [thread:$0]  %s149_s20, 512, %s151_s27, [#allocation15]  }
  0x47   :  { %s194_s17 = sshll.u32 %s6090_s14, 4  ;;  %s4634_s26 = smov [#allocation19]   ;;  %s195_s17 = int_to_ptr.hbm [resolvable:$true] %s194_s17 }
  0x48   :  { %s172_s5 = sshll.u32 %s4634_s26, 4  ;;  %s4635_s10 = smov [#allocation22]   ;;  %s173_s5 = int_to_ptr.vmem [resolvable:$true] %s172_s5 }
  0x49   :  { %175 = dma.hbm_to_vmem [thread:$0]  %s171_s8, 16, %s173_s5, [#allocation18]  }
  0x4a   :  { %s196_s2 = sshll.u32 %s4635_s10, 4  ;;  %s218_s28 = sshll.u32 %s6092_s16, 4  ;;  %s197_s2 = int_to_ptr.vmem [resolvable:$true] %s196_s2  ;;  %s219_s28 = int_to_ptr.hbm [resolvable:$true] %s218_s28 }
  0x4b   :  { %199 = dma.hbm_to_vmem [thread:$0]  %s195_s17, 96, %s197_s2, [#allocation21]  }
  0x4c   :  { %s242_s11 = sshll.u32 %s6094_s18, 4  ;;  %s4636_s30 = smov [#allocation25]   ;;  %s243_s11 = int_to_ptr.hbm [resolvable:$true] %s242_s11 }
  0x4d   :  { %s220_s14 = sshll.u32 %s4636_s30, 4  ;;  %s4637_s6 = smov [#allocation28]   ;;  %s221_s14 = int_to_ptr.vmem [resolvable:$true] %s220_s14 }
  0x4e   :  { %223 = dma.hbm_to_vmem [thread:$0]  %s219_s28, 64, %s221_s14, [#allocation24]  }
  0x4f   :  { %s244_s20 = sshll.u32 %s4637_s6, 4  ;;  %s268_s13 = sshll.u32 %s6097_s21, 4  ;;  %s245_s20 = int_to_ptr.vmem [resolvable:$true] %s244_s20  ;;  %s269_s13 = int_to_ptr.hbm [resolvable:$true] %s268_s13 }
  0x50   :  { %247 = dma.hbm_to_vmem [thread:$0]  %s243_s11, 32, %s245_s20, [#allocation27]  }
  0x51   :  { %s279_s7 = sshll.u32 %s6098_s22, 4  ;;  %s4638_s1 = smov [#allocation31]   ;;  %s280_s7 = int_to_ptr.hbm [resolvable:$true] %s279_s7 }
  0x52   :  { %s270_s18 = sshll.u32 %s4638_s1, 4  ;;  %s4639_s8 = smov [#allocation32]   ;;  %s271_s18 = int_to_ptr.vmem [resolvable:$true] %s270_s18 }
  0x53   :  { %273 = dma.hbm_to_vmem [thread:$0]  %s269_s13, 16, %s271_s18, [#allocation30]  }
  0x54   :  { %s281_s29 = sshll.u32 %s4639_s8, 4  ;;  %s282_s29 = int_to_ptr.vmem [resolvable:$true] %s281_s29 }
  0x55   :  { %284 = dma.hbm_to_vmem [thread:$0]  %s280_s7, 16, %s282_s29, [#allocation33]  }
  0x56   :  { %4592 = dma.done.wait [#allocation4], 32  }
  0x57   :  { %4593 = vsyncadd [#allocation4], 4294967264 }
  0x58   :  { %4594 = dma.done.wait [#allocation6], 544  }
  0x59   :  { %4595 = vsyncadd [#allocation6], 4294966752 }
  0x5a   :  { %4596 = dma.done.wait [#allocation9], 528  }
  0x5b   :  { %4597 = vsyncadd [#allocation9], 4294966768 }
  0x5c   :  { %4598 = dma.done.wait [#allocation12], 16400  }
  0x5d   :  { %4599 = vsyncadd [#allocation12], 4294950896 }
  0x5e   :  { %4600 = dma.done.wait [#allocation15], 576  }
  0x5f   :  { %4601 = vsyncadd [#allocation15], 4294966720 }
  0x60   :  { %4602 = dma.done.wait [#allocation18], 32  }
  0x61   :  { %4603 = vsyncadd [#allocation18], 4294967264 }
  0x62   :  { %4604 = dma.done.wait [#allocation21], 49248  }
  0x63   :  { %4605 = vsyncadd [#allocation21], 4294918048 }
  0x64   :  { %4606 = dma.done.wait [#allocation24], 49216  }
  0x65   :  { %4607 = vsyncadd [#allocation24], 4294918080 }
  0x66   :  { %4608 = dma.done.wait [#allocation27], 16416  }
  0x67   :  { %4609 = vsyncadd [#allocation27], 4294950880 }
  0x68   :  { %4610 = dma.done.wait [#allocation30], 528  }
  0x69   :  { %4611 = vsyncadd [#allocation30], 4294966768 }
  0x6a   :  { %4612 = dma.done.wait [#allocation33], 16  }
  0x6b   :  { %4613 = vsyncadd [#allocation33], 4294967280  ;;  %v372_v1 = vld [vmem:[#allocation5 + $0x10] sm:$0xff]  ;;  %v373_v2 = vld [vmem:[#allocation5 + $0x18] sm:$0xff]  ;;  %vm380_vm0 = vcmask 130048   ;;  %s6143_s24 = sld [smem:[#allocation65_spill]] }
  0x6c   :  { %v370_v3 = vld [vmem:[#allocation5] sm:$0xff]  ;;  %398 = vmatpush.msra.mxu0 %v372_v1  ;;  %418 = vmatpush.msra.mxu1 %v373_v2  ;;  %v371_v4 = vld [vmem:[#allocation5 + $0x8] sm:$0xff]  ;;  %v369_v5 = vld [vmem:[#allocation3] sm:$0x3]  ;;  %vm500_vm1 = vcmask 123904   ;;  %s6144_s4 = sld [smem:[#allocation71_spill]] }
  0x6d   :  { %v374_v38 = vld [vmem:[#allocation7] sm:$0x3]  ;;  %v5044_v45 = vld [vmem:[#allocation8 + $0x10] sm:$0xff]  ;;  %v5048_v47 = vld [vmem:[#allocation8] sm:$0xff]  ;;  %vm1162_vm5 = vcmask 58368   ;;  %vm1171_vm6 = vcmask 64512  }
  0x6e   :  { %399 = vmatpush.msra.mxu0 %v370_v3  ;;  %419 = vmatpush.msra.mxu1 %v371_v4  ;;  %v376_v39 = vperm.slane %v374_v38, 0  ;;  %v377_v40 = vperm.slane %v374_v38, 1  ;;  %v5046_v46 = vld [vmem:[#allocation8 + $0x18] sm:$0xff]  ;;  %v5052_v48 = vld [vmem:[#allocation8 + $0x8] sm:$0xff]  ;;  %vm2449_vm10 = vcmask 1041408   ;;  %vm2451_vm11 = vcmask 1045508  }
  0x6f   :  { %4037 = vmatmul.msk.f32.vlgmr.msra.gmra.mxu0 %vm380_vm0, %v369_v5  ;;  %4038 = vmatmul.msk.f32.vlgmr.msra.gmra.mxu1 %vm380_vm0, %v369_v5  ;;  %v741_v38 = vld [vmem:[#allocation13 + $0xc8] sm:$0xff]  ;;  %vm2453_vm12 = vcmask 1043456   ;;  %s6179_s6 = sld [smem:[#allocation73_spill]] }
  0x70   :  { %526 = vmatpush.msrb.mxu0 %v5044_v45  ;;  %546 = vmatpush.msrb.mxu1 %v5046_v46 }
  0x71   :  { %v4859_v6 = vld [vmem:[%s6143_s24 + $0x78] sm:$0xff]  ;;  %v4870_v8 = vld [vmem:[%s6143_s24 + $0x70] sm:$0xff]  ;;  %v4882_v10 = vld [vmem:[%s6143_s24 + $0x68] sm:$0xff] }
  0x72   :  { %460 = vmatpush.msra.mxu2 %v4859_v6  ;;  %v4865_v7 = vld [vmem:[%s6143_s24 + $0xf8] sm:$0xff]  ;;  %v4877_v9 = vld [vmem:[%s6143_s24 + $0xf0] sm:$0xff]  ;;  %v4889_v11 = vld [vmem:[%s6143_s24 + $0xe8] sm:$0xff]  ;;  %527 = vmatpush.msrb.mxu0 %v5048_v47 }
  0x73   :  { %480 = vmatpush.msra.mxu3 %v4865_v7  ;;  %v4894_v12 = vld [vmem:[%s6143_s24 + $0x60] sm:$0xff]  ;;  %v4906_v14 = vld [vmem:[%s6143_s24 + $0x58] sm:$0xff]  ;;  %v4918_v16 = vld [vmem:[%s6143_s24 + $0x50] sm:$0xff]  ;;  %547 = vmatpush.msrb.mxu1 %v5052_v48 }
  0x74   :  { %461 = vmatpush.msra.mxu2 %v4870_v8  ;;  %v4901_v13 = vld [vmem:[%s6143_s24 + $0xe0] sm:$0xff]  ;;  %v4913_v15 = vld [vmem:[%s6143_s24 + $0xd8] sm:$0xff]  ;;  %v4925_v17 = vld [vmem:[%s6143_s24 + $0xd0] sm:$0xff]  ;;  %558 = vmatpush.msra.mxu0 %v4859_v6 }
  0x75   :  { %481 = vmatpush.msra.mxu3 %v4877_v9  ;;  %v4930_v18 = vld [vmem:[%s6143_s24 + $0x48] sm:$0xff]  ;;  %v4942_v20 = vld [vmem:[%s6143_s24 + $0x40] sm:$0xff]  ;;  %v4954_v22 = vld [vmem:[%s6143_s24 + $0x38] sm:$0xff]  ;;  %578 = vmatpush.msra.mxu1 %v4865_v7 }
  0x76   :  { %462 = vmatpush.msra.mxu2 %v4882_v10  ;;  %v4937_v19 = vld [vmem:[%s6143_s24 + $0xc8] sm:$0xff]  ;;  %v4949_v21 = vld [vmem:[%s6143_s24 + $0xc0] sm:$0xff]  ;;  %v4961_v23 = vld [vmem:[%s6143_s24 + $0xb8] sm:$0xff]  ;;  %559 = vmatpush.msra.mxu0 %v4870_v8 }
  0x77   :  { %482 = vmatpush.msra.mxu3 %v4889_v11  ;;  %v4966_v24 = vld [vmem:[%s6143_s24 + $0x30] sm:$0xff]  ;;  %v4978_v26 = vld [vmem:[%s6143_s24 + $0x28] sm:$0xff]  ;;  %v4990_v28 = vld [vmem:[%s6143_s24 + $0x20] sm:$0xff]  ;;  %579 = vmatpush.msra.mxu1 %v4877_v9 }
  0x78   :  { %463 = vmatpush.msra.mxu2 %v4894_v12  ;;  %v4973_v25 = vld [vmem:[%s6143_s24 + $0xb0] sm:$0xff]  ;;  %v4985_v27 = vld [vmem:[%s6143_s24 + $0xa8] sm:$0xff]  ;;  %v4997_v29 = vld [vmem:[%s6143_s24 + $0xa0] sm:$0xff]  ;;  %560 = vmatpush.msra.mxu0 %v4882_v10 }
  0x79   :  { %483 = vmatpush.msra.mxu3 %v4901_v13  ;;  %v5002_v30 = vld [vmem:[%s6143_s24 + $0x18] sm:$0xff]  ;;  %v5014_v32 = vld [vmem:[%s6143_s24 + $0x10] sm:$0xff]  ;;  %v425_v34 = vld [vmem:[%s6143_s24 + $0x8] sm:$0xff]  ;;  %580 = vmatpush.msra.mxu1 %v4889_v11 }
  0x7a   :  { %464 = vmatpush.msra.mxu2 %v4906_v14  ;;  %v5009_v31 = vld [vmem:[%s6143_s24 + $0x98] sm:$0xff]  ;;  %v5021_v33 = vld [vmem:[%s6143_s24 + $0x90] sm:$0xff]  ;;  %v441_v35 = vld [vmem:[%s6143_s24 + $0x88] sm:$0xff]  ;;  %561 = vmatpush.msra.mxu0 %v4894_v12 }
  0x7b   :  { %484 = vmatpush.msra.mxu3 %v4913_v15  ;;  %v424_v36 = vld [vmem:[%s6143_s24] sm:$0xff]  ;;  %581 = vmatpush.msra.mxu1 %v4901_v13 }
  0x7c   :  { %465 = vmatpush.msra.mxu2 %v4918_v16  ;;  %v440_v37 = vld [vmem:[%s6143_s24 + $0x80] sm:$0xff]  ;;  %562 = vmatpush.msra.mxu0 %v4906_v14 }
  0x7d   :  { %485 = vmatpush.msra.mxu3 %v4925_v17  ;;  %582 = vmatpush.msra.mxu1 %v4913_v15  ;;  %v777_v15 = vld [vmem:[#allocation13 + $0x1e8] sm:$0xff] }
  0x7e   :  { %466 = vmatpush.msra.mxu2 %v4930_v18  ;;  %563 = vmatpush.msra.mxu0 %v4918_v16  ;;  %v841_v16 = vld [vmem:[#allocation13 + $0x3e8] sm:$0xff] }
  0x7f   :  { %486 = vmatpush.msra.mxu3 %v4937_v19  ;;  %583 = vmatpush.msra.mxu1 %v4925_v17 }
  0x80   :  { %467 = vmatpush.msra.mxu2 %v4942_v20  ;;  %564 = vmatpush.msra.mxu0 %v4930_v18  ;;  %v773_v18 = vld [vmem:[#allocation13 + $0x1c8] sm:$0xff] }
  0x81   :  { %487 = vmatpush.msra.mxu3 %v4949_v21  ;;  %584 = vmatpush.msra.mxu1 %v4937_v19  ;;  %v837_v19 = vld [vmem:[#allocation13 + $0x3c8] sm:$0xff] }
  0x82   :  { %468 = vmatpush.msra.mxu2 %v4954_v22  ;;  %565 = vmatpush.msra.mxu0 %v4942_v20  ;;  %v769_v20 = vld [vmem:[#allocation13 + $0x1a8] sm:$0xff] }
  0x83   :  { %488 = vmatpush.msra.mxu3 %v4961_v23  ;;  %585 = vmatpush.msra.mxu1 %v4949_v21  ;;  %v833_v21 = vld [vmem:[#allocation13 + $0x3a8] sm:$0xff] }
  0x84   :  { %469 = vmatpush.msra.mxu2 %v4966_v24  ;;  %566 = vmatpush.msra.mxu0 %v4954_v22  ;;  %v765_v22 = vld [vmem:[#allocation13 + $0x188] sm:$0xff] }
  0x85   :  { %489 = vmatpush.msra.mxu3 %v4973_v25  ;;  %586 = vmatpush.msra.mxu1 %v4961_v23  ;;  %v829_v23 = vld [vmem:[#allocation13 + $0x388] sm:$0xff] }
  0x86   :  { %470 = vmatpush.msra.mxu2 %v4978_v26  ;;  %567 = vmatpush.msra.mxu0 %v4966_v24  ;;  %v761_v24 = vld [vmem:[#allocation13 + $0x168] sm:$0xff] }
  0x87   :  { %490 = vmatpush.msra.mxu3 %v4985_v27  ;;  %587 = vmatpush.msra.mxu1 %v4973_v25  ;;  %v825_v25 = vld [vmem:[#allocation13 + $0x368] sm:$0xff] }
  0x88   :  { %471 = vmatpush.msra.mxu2 %v4990_v28  ;;  %568 = vmatpush.msra.mxu0 %v4978_v26  ;;  %v757_v26 = vld [vmem:[#allocation13 + $0x148] sm:$0xff] }
  0x89   :  { %491 = vmatpush.msra.mxu3 %v4997_v29  ;;  %588 = vmatpush.msra.mxu1 %v4985_v27  ;;  %v821_v27 = vld [vmem:[#allocation13 + $0x348] sm:$0xff] }
  0x8a   :  { %472 = vmatpush.msra.mxu2 %v5002_v30  ;;  %569 = vmatpush.msra.mxu0 %v4990_v28 }
  0x8b   :  { %492 = vmatpush.msra.mxu3 %v5009_v31  ;;  %589 = vmatpush.msra.mxu1 %v4997_v29  ;;  %v753_v29 = vld [vmem:[#allocation13 + $0x128] sm:$0xff] }
  0x8c   :  { %473 = vmatpush.msra.mxu2 %v5014_v32  ;;  %570 = vmatpush.msra.mxu0 %v5002_v30 }
  0x8d   :  { %493 = vmatpush.msra.mxu3 %v5021_v33  ;;  %590 = vmatpush.msra.mxu1 %v5009_v31  ;;  %v817_v31 = vld [vmem:[#allocation13 + $0x328] sm:$0xff] }
  0x8e   :  { %474 = vmatpush.msra.mxu2 %v425_v34  ;;  %571 = vmatpush.msra.mxu0 %v5014_v32  ;;  %v749_v32 = vld [vmem:[#allocation13 + $0x108] sm:$0xff] }
  0x8f   :  { %494 = vmatpush.msra.mxu3 %v441_v35  ;;  %591 = vmatpush.msra.mxu1 %v5021_v33 }
  0x90   :  { %475 = vmatpush.msra.mxu2 %v424_v36  ;;  %572 = vmatpush.msra.mxu0 %v425_v34  ;;  %v813_v34 = vld [vmem:[#allocation13 + $0x308] sm:$0xff] }
  0x91   :  { %495 = vmatpush.msra.mxu3 %v440_v37  ;;  %592 = vmatpush.msra.mxu1 %v441_v35  ;;  %v745_v35 = vld [vmem:[#allocation13 + $0xe8] sm:$0xff] }
  0x92   :  { %573 = vmatpush.msra.mxu0 %v424_v36  ;;  %894 = vmatpush.msrb.mxu2 %v777_v15  ;;  %v839_v15 = vld [vmem:[#allocation13 + $0x3d8] sm:$0xff] }
  0x93   :  { %593 = vmatpush.msra.mxu1 %v440_v37  ;;  %914 = vmatpush.msrb.mxu3 %v841_v16  ;;  %v809_v37 = vld [vmem:[#allocation13 + $0x2e8] sm:$0xff]  ;;  %v771_v16 = vld [vmem:[#allocation13 + $0x1b8] sm:$0xff] }
  0x94   :  { %895 = vmatpush.msrb.mxu2 %v773_v18  ;;  %v808_v18 = vld [vmem:[#allocation13 + $0x2e0] sm:$0xff] }
  0x95   :  { %915 = vmatpush.msrb.mxu3 %v837_v19  ;;  %v835_v19 = vld [vmem:[#allocation13 + $0x3b8] sm:$0xff] }
  0x96   :  { %896 = vmatpush.msrb.mxu2 %v769_v20  ;;  %v767_v20 = vld [vmem:[#allocation13 + $0x198] sm:$0xff] }
  0x97   :  { %916 = vmatpush.msrb.mxu3 %v833_v21  ;;  %v740_v21 = vld [vmem:[#allocation13 + $0xc0] sm:$0xff] }
  0x98   :  { %897 = vmatpush.msrb.mxu2 %v765_v22  ;;  %v804_v22 = vld [vmem:[#allocation13 + $0x2c0] sm:$0xff] }
  0x99   :  { %917 = vmatpush.msrb.mxu3 %v829_v23  ;;  %v831_v23 = vld [vmem:[#allocation13 + $0x398] sm:$0xff] }
  0x9a   :  { %898 = vmatpush.msrb.mxu2 %v761_v24  ;;  %v736_v24 = vld [vmem:[#allocation13 + $0xa0] sm:$0xff] }
  0x9b   :  { %918 = vmatpush.msrb.mxu3 %v825_v25  ;;  %v800_v25 = vld [vmem:[#allocation13 + $0x2a0] sm:$0xff] }
  0x9c   :  { %899 = vmatpush.msrb.mxu2 %v757_v26  ;;  %v732_v26 = vld [vmem:[#allocation13 + $0x80] sm:$0xff] }
  0x9d   :  { %919 = vmatpush.msrb.mxu3 %v821_v27  ;;  %v796_v27 = vld [vmem:[#allocation13 + $0x280] sm:$0xff] }
  0x9e   :  { %900 = vmatpush.msrb.mxu2 %v753_v29  ;;  %v792_v29 = vld [vmem:[#allocation13 + $0x260] sm:$0xff] }
  0x9f   :  { %920 = vmatpush.msrb.mxu3 %v817_v31  ;;  %v788_v31 = vld [vmem:[#allocation13 + $0x240] sm:$0xff] }
  0xa0   :  { %901 = vmatpush.msrb.mxu2 %v749_v32  ;;  %v720_v32 = vld [vmem:[#allocation13 + $0x20] sm:$0xff] }
  0xa1   :  { %921 = vmatpush.msrb.mxu3 %v813_v34  ;;  %v716_v34 = vld [vmem:[#allocation13] sm:$0xff] }
  0xa2   :  { %902 = vmatpush.msrb.mxu2 %v745_v35  ;;  %v780_v35 = vld [vmem:[#allocation13 + $0x200] sm:$0xff] }
  0xa3   :  { %922 = vmatpush.msrb.mxu3 %v809_v37  ;;  %v842_v37 = vld [vmem:[#allocation13 + $0x3f0] sm:$0xff] }
  0xa4   :  { %903 = vmatpush.msrb.mxu2 %v741_v38  ;;  %v774_v38 = vld [vmem:[#allocation13 + $0x1d0] sm:$0xff] }
  0xec   :  { %v401_v41 = vpop.f32.mrf.mxu0  ;;  %v421_v42 = vpop.f32.mrf.mxu1 }
  0xed   :  { %v5038_v43 = vadd.f32 %v401_v41, %v376_v39  ;;  %v5040_v44 = vadd.f32 %v421_v42, %v377_v40  ;;  %v805_v40 = vld [vmem:[#allocation13 + $0x2c8] sm:$0xff]  ;;  %v606_v42 = vld [vmem:[#allocation10] sm:$0x1] }
  0xee   :  { %v737_v41 = vld [vmem:[#allocation13 + $0xa8] sm:$0xff]  ;;  %923 = vmatpush.msrb.mxu3 %v805_v40  ;;  %v770_v40 = vld [vmem:[#allocation13 + $0x1b0] sm:$0xff] }
  0xef   :  { %476 = vmatmul.f32.vlgmr.msra.gmra.mxu2 %v5038_v43  ;;  %496 = vmatmul.f32.vlgmr.msra.gmra.mxu3 %v5040_v44 }
  0xf0   :  { %904 = vmatpush.msrb.mxu2 %v737_v41  ;;  %v834_v41 = vld [vmem:[#allocation13 + $0x3b0] sm:$0xff] }
 0x172   :  { %v477_v49 = vpop.f32.mrf.mxu2  ;;  %v497_v50 = vpop.f32.mrf.mxu3 }
 0x173   :  { %v498_v51 = vadd.f32 %v497_v50, %v477_v49  ;;  %v840_v49 = vld [vmem:[#allocation13 + $0x3e0] sm:$0xff]  ;;  %v797_v50 = vld [vmem:[#allocation13 + $0x288] sm:$0xff] }
 0x175   :  { %v501_v52 = vsel %vm500_vm1, %v498_v51, 0.0  ;;  %v729_v51 = vld [vmem:[#allocation13 + $0x68] sm:$0xff] }
 0x176   :  { %v502_v53 = vrot.slane %v501_v52, 4 }
 0x178   :  { %v503_v54 = vadd.f32 %v502_v53, %v501_v52  ;;  %v772_v52 = vld [vmem:[#allocation13 + $0x1c0] sm:$0xff] }
 0x179   :  { %v836_v53 = vld [vmem:[#allocation13 + $0x3c0] sm:$0xff] }
 0x17a   :  { %v504_v55 = vrot.slane %v503_v54, 2 }
 0x17c   :  { %v505_v56 = vadd.f32 %v504_v55, %v503_v54  ;;  %v793_v54 = vld [vmem:[#allocation13 + $0x268] sm:$0xff] }
 0x17d   :  { %v725_v55 = vld [vmem:[#allocation13 + $0x48] sm:$0xff] }
 0x17e   :  { %v506_v57 = vrot.slane %v505_v56, 1 }
 0x180   :  { %v507_v58 = vadd.f32 %v506_v57, %v505_v56  ;;  %v768_v56 = vld [vmem:[#allocation13 + $0x1a0] sm:$0xff] }
 0x181   :  { %v832_v57 = vld [vmem:[#allocation13 + $0x3a0] sm:$0xff] }
 0x182   :  { %v508_v59 = vmul.f32 0.03125, %v507_v58  ;;  %v789_v58 = vld [vmem:[#allocation13 + $0x248] sm:$0xff] }
 0x184   :  { %4039 = vmatmul.msk.f32.vlgmr.msrb.gmra.mxu0 %vm380_vm0, %v508_v59  ;;  %4040 = vmatmul.msk.f32.vlgmr.msrb.gmra.mxu1 %vm380_vm0, %v508_v59  ;;  %v721_v59 = vld [vmem:[#allocation13 + $0x28] sm:$0xff] }
 0x185   :  { %636 = vmatpush.msrb.mxu0 %v5044_v45  ;;  %656 = vmatpush.msrb.mxu1 %v5046_v46 }
 0x187   :  { %637 = vmatpush.msrb.mxu0 %v5048_v47  ;;  %657 = vmatpush.msrb.mxu1 %v5052_v48 }
 0x201   :  { %v529_v60 = vpop.f32.mrf.mxu0  ;;  %v549_v61 = vpop.f32.mrf.mxu1 }
 0x202   :  { %v552_v62 = vperm.slane %v529_v60, 0  ;;  %v553_v63 = vperm.slane %v549_v61, 0  ;;  %v764_v60 = vld [vmem:[#allocation13 + $0x180] sm:$0xff] }
 0x203   :  { %v828_v61 = vld [vmem:[#allocation13 + $0x380] sm:$0xff] }
 0x204   :  { %v5092_v0 = vsub.f32 %v5038_v43, %v552_v62  ;;  %v5095_v1 = vsub.f32 %v5040_v44, %v553_v63  ;;  %v801_v44 = vld [vmem:[#allocation13 + $0x2a8] sm:$0xff]  ;;  %v662_v62 = vld [vmem:[#allocation11] sm:$0x1]  ;;  %v760_v63 = vld [vmem:[#allocation13 + $0x160] sm:$0xff] }
 0x205   :  { %924 = vmatpush.msrb.mxu3 %v801_v44  ;;  %v762_v44 = vld [vmem:[#allocation13 + $0x170] sm:$0xff] }
 0x206   :  { %v556_v2 = vmul.f32 %v5092_v0, %v5092_v0  ;;  %v557_v3 = vmul.f32 %v5095_v1, %v5095_v1 }
 0x207   :  { %925 = vmatpush.msrb.mxu3 %v797_v50  ;;  %v759_v50 = vld [vmem:[#allocation13 + $0x158] sm:$0xff] }
 0x208   :  { %574 = vmatmul.f32.vlgmr.msra.gmra.mxu0 %v556_v2  ;;  %594 = vmatmul.f32.vlgmr.msra.gmra.mxu1 %v557_v3  ;;  %v824_v2 = vld [vmem:[#allocation13 + $0x360] sm:$0xff]  ;;  %v785_v3 = vld [vmem:[#allocation13 + $0x228] sm:$0xff] }
 0x209   :  { %680 = vmatpush.msra.mxu0 %v5044_v45  ;;  %700 = vmatpush.msra.mxu1 %v5046_v46  ;;  %v733_v45 = vld [vmem:[#allocation13 + $0x88] sm:$0xff] }
 0x20a   :  { %905 = vmatpush.msrb.mxu2 %v733_v45  ;;  %926 = vmatpush.msrb.mxu3 %v793_v54  ;;  %v826_v45 = vld [vmem:[#allocation13 + $0x370] sm:$0xff]  ;;  %v755_v54 = vld [vmem:[#allocation13 + $0x138] sm:$0xff] }
 0x20b   :  { %681 = vmatpush.msra.mxu0 %v5048_v47  ;;  %701 = vmatpush.msra.mxu1 %v5052_v48  ;;  %v776_v48 = vld [vmem:[#allocation13 + $0x1e0] sm:$0xff] }
 0x20c   :  { %906 = vmatpush.msrb.mxu2 %v729_v51  ;;  %927 = vmatpush.msrb.mxu3 %v789_v58  ;;  %v823_v51 = vld [vmem:[#allocation13 + $0x358] sm:$0xff] }
 0x20d   :  { %v751_v58 = vld [vmem:[#allocation13 + $0x118] sm:$0xff] }
 0x20e   :  { %907 = vmatpush.msrb.mxu2 %v725_v55  ;;  %928 = vmatpush.msrb.mxu3 %v785_v3  ;;  %v819_v55 = vld [vmem:[#allocation13 + $0x338] sm:$0xff]  ;;  %v806_v3 = vld [vmem:[#allocation13 + $0x2d0] sm:$0xff] }
 0x210   :  { %908 = vmatpush.msrb.mxu2 %v721_v59  ;;  %v815_v59 = vld [vmem:[#allocation13 + $0x318] sm:$0xff] }
 0x285   :  { %v575_v4 = vpop.f32.mrf.mxu0  ;;  %v595_v5 = vpop.f32.mrf.mxu1 }
 0x286   :  { %v596_v6 = vadd.f32 %v595_v5, %v575_v4  ;;  %v717_v4 = vld [vmem:[#allocation13 + $0x8] sm:$0xff]  ;;  %v756_v5 = vld [vmem:[#allocation13 + $0x140] sm:$0xff] }
 0x287   :  { %909 = vmatpush.msrb.mxu2 %v717_v4  ;;  %v743_v4 = vld [vmem:[#allocation13 + $0xd8] sm:$0xff] }
 0x288   :  { %v598_v7 = vsel %vm500_vm1, %v596_v6, 0.0  ;;  %v820_v6 = vld [vmem:[#allocation13 + $0x340] sm:$0xff] }
 0x289   :  { %v599_v8 = vrot.slane %v598_v7, 4 }
 0x28b   :  { %v600_v9 = vadd.f32 %v599_v8, %v598_v7  ;;  %v781_v7 = vld [vmem:[#allocation13 + $0x208] sm:$0xff]  ;;  %v779_v8 = vld [vmem:[#allocation13 + $0x1f8] sm:$0xff] }
 0x28c   :  { %929 = vmatpush.msrb.mxu3 %v781_v7  ;;  %974 = vmatpush.msra.mxu2 %v779_v8  ;;  %v802_v7 = vld [vmem:[#allocation13 + $0x2b0] sm:$0xff]  ;;  %v739_v8 = vld [vmem:[#allocation13 + $0xb8] sm:$0xff] }
 0x28d   :  { %v601_v10 = vrot.slane %v600_v9, 2 }
 0x28f   :  { %v602_v11 = vadd.f32 %v601_v10, %v600_v9  ;;  %v752_v9 = vld [vmem:[#allocation13 + $0x120] sm:$0xff] }
 0x290   :  { %v816_v10 = vld [vmem:[#allocation13 + $0x320] sm:$0xff] }
 0x291   :  { %v603_v12 = vrot.slane %v602_v11, 1 }
 0x293   :  { %v604_v13 = vadd.f32 %v603_v12, %v602_v11  ;;  %v843_v11 = vld [vmem:[#allocation13 + $0x3f8] sm:$0xff] }
 0x294   :  { %v775_v12 = vld [vmem:[#allocation13 + $0x1d8] sm:$0xff]  ;;  %994 = vmatpush.msra.mxu3 %v843_v11  ;;  %v798_v11 = vld [vmem:[#allocation13 + $0x290] sm:$0xff] }
 0x295   :  { %v605_v14 = vmul.f32 0.03125, %v604_v13  ;;  %v748_v13 = vld [vmem:[#allocation13 + $0x100] sm:$0xff]  ;;  %975 = vmatpush.msra.mxu2 %v775_v12  ;;  %v735_v12 = vld [vmem:[#allocation13 + $0x98] sm:$0xff] }
 0x296   :  { %995 = vmatpush.msra.mxu3 %v839_v15  ;;  %v794_v15 = vld [vmem:[#allocation13 + $0x270] sm:$0xff] }
 0x297   :  { %v607_v17 = vadd.f32 1e-05, %v605_v14  ;;  %v812_v14 = vld [vmem:[#allocation13 + $0x300] sm:$0xff]  ;;  %976 = vmatpush.msra.mxu2 %v771_v16  ;;  %v731_v16 = vld [vmem:[#allocation13 + $0x78] sm:$0xff] }
 0x298   :  { %996 = vmatpush.msra.mxu3 %v835_v19  ;;  %v790_v19 = vld [vmem:[#allocation13 + $0x250] sm:$0xff] }
 0x299   :  { %4090 = vrsqrt.f32 %v607_v17  ;;  %vm614_vm3 = vweird.f32 %v607_v17  ;;  %977 = vmatpush.msra.mxu2 %v767_v20  ;;  %v727_v20 = vld [vmem:[#allocation13 + $0x58] sm:$0xff] }
 0x29a   :  { %997 = vmatpush.msra.mxu3 %v831_v23  ;;  %v786_v23 = vld [vmem:[#allocation13 + $0x230] sm:$0xff] }
 0x29f   :  { %v4091_v28 = vpop.eup %4090 }
 0x2a0   :  { %v609_v30 = vmul.f32 %v4091_v28, %v607_v17  ;;  %vm615_vm2 = vweird.f32 %v4091_v28  ;;  %v744_v17 = vld [vmem:[#allocation13 + $0xe0] sm:$0xff] }
 0x2a1   :  { %vm616_vm4 = vmor %vm614_vm3, %vm615_vm2 }
 0x2a2   :  { %v610_v33 = vmul.f32 %v4091_v28, %v609_v30  ;;  %v724_v30 = vld [vmem:[#allocation13 + $0x40] sm:$0xff] }
 0x2a4   :  { %v611_v36 = vmul.f32 0.5, %v610_v33  ;;  %v784_v33 = vld [vmem:[#allocation13 + $0x220] sm:$0xff] }
 0x2a6   :  { %v612_v39 = vsub.f32 1.5, %v611_v36  ;;  %v778_v36 = vld [vmem:[#allocation13 + $0x1f0] sm:$0xff] }
 0x2a8   :  { %v613_v43 = vmul.f32 %v4091_v28, %v612_v39  ;;  %v838_v39 = vld [vmem:[#allocation13 + $0x3d0] sm:$0xff] }
 0x2aa   :  { %v617_v46 = vsel %vm616_vm4, %v4091_v28, %v613_v43  ;;  %v728_v28 = vld [vmem:[#allocation13 + $0x60] sm:$0xff]  ;;  %v830_v43 = vld [vmem:[#allocation13 + $0x390] sm:$0xff] }
 0x2ab   :  { %v618_v47 = vmul.f32 %v617_v46, %v606_v42  ;;  %v766_v42 = vld [vmem:[#allocation13 + $0x190] sm:$0xff]  ;;  %v763_v46 = vld [vmem:[#allocation13 + $0x178] sm:$0xff] }
 0x2ac   :  { %978 = vmatpush.msra.mxu2 %v763_v46  ;;  %v5135_v46 = vld [vmem:[%s6144_s4 + $0x70] sm:$0xff] }
 0x2ad   :  { %4041 = vmatmul.msk.f32.vlgmr.msrb.gmra.mxu0 %vm380_vm0, %v618_v47  ;;  %4042 = vmatmul.msk.f32.vlgmr.msrb.gmra.mxu1 %vm380_vm0, %v618_v47  ;;  %v827_v47 = vld [vmem:[#allocation13 + $0x378] sm:$0xff] }
 0x2ae   :  { %854 = vmatpush.msrb.mxu0 %v776_v48  ;;  %874 = vmatpush.msrb.mxu1 %v840_v49  ;;  %v758_v48 = vld [vmem:[#allocation13 + $0x150] sm:$0xff] }
 0x2af   :  { %998 = vmatpush.msra.mxu3 %v827_v47  ;;  %v822_v49 = vld [vmem:[#allocation13 + $0x350] sm:$0xff]  ;;  %979 = vmatpush.msra.mxu2 %v759_v50  ;;  %v5140_v47 = vld [vmem:[%s6144_s4 + $0xf0] sm:$0xff]  ;;  %v5157_v50 = vld [vmem:[%s6144_s4 + $0x68] sm:$0xff] }
 0x2b0   :  { %855 = vmatpush.msrb.mxu0 %v772_v52  ;;  %875 = vmatpush.msrb.mxu1 %v836_v53  ;;  %v754_v52 = vld [vmem:[#allocation13 + $0x130] sm:$0xff] }
 0x2b1   :  { %999 = vmatpush.msra.mxu3 %v823_v51  ;;  %v818_v53 = vld [vmem:[#allocation13 + $0x330] sm:$0xff]  ;;  %980 = vmatpush.msra.mxu2 %v755_v54  ;;  %v5163_v51 = vld [vmem:[%s6144_s4 + $0xe8] sm:$0xff] }
 0x2b2   :  { %856 = vmatpush.msrb.mxu0 %v768_v56  ;;  %876 = vmatpush.msrb.mxu1 %v832_v57  ;;  %v750_v56 = vld [vmem:[#allocation13 + $0x110] sm:$0xff] }
 0x2b3   :  { %v814_v57 = vld [vmem:[#allocation13 + $0x310] sm:$0xff]  ;;  %1000 = vmatpush.msra.mxu3 %v819_v55  ;;  %981 = vmatpush.msra.mxu2 %v751_v58 }
 0x2b4   :  { %857 = vmatpush.msrb.mxu0 %v764_v60  ;;  %877 = vmatpush.msrb.mxu1 %v828_v61  ;;  %v746_v60 = vld [vmem:[#allocation13 + $0xf0] sm:$0xff] }
 0x2b5   :  { %4043 = vmatmul.msk.f32.vlgmr.msra.gmra.mxu0 %vm380_vm0, %v662_v62  ;;  %4044 = vmatmul.msk.f32.vlgmr.msra.gmra.mxu1 %vm380_vm0, %v662_v62  ;;  %v810_v61 = vld [vmem:[#allocation13 + $0x2f0] sm:$0xff]  ;;  %v747_v62 = vld [vmem:[#allocation13 + $0xf8] sm:$0xff] }
 0x2b6   :  { %858 = vmatpush.msrb.mxu0 %v760_v63  ;;  %878 = vmatpush.msrb.mxu1 %v824_v2  ;;  %v811_v63 = vld [vmem:[#allocation13 + $0x2f8] sm:$0xff]  ;;  %v742_v2 = vld [vmem:[#allocation13 + $0xd0] sm:$0xff] }
 0x2b7   :  { %1001 = vmatpush.msra.mxu3 %v815_v59  ;;  %982 = vmatpush.msra.mxu2 %v747_v62  ;;  %v5185_v54 = vld [vmem:[%s6144_s4 + $0x60] sm:$0xff]  ;;  %v5207_v58 = vld [vmem:[%s6144_s4 + $0x58] sm:$0xff]  ;;  %v5229_v62 = vld [vmem:[%s6144_s4 + $0x50] sm:$0xff] }
 0x2b8   :  { %859 = vmatpush.msrb.mxu0 %v756_v5  ;;  %879 = vmatpush.msrb.mxu1 %v820_v6  ;;  %v807_v5 = vld [vmem:[#allocation13 + $0x2d8] sm:$0xff]  ;;  %v738_v6 = vld [vmem:[#allocation13 + $0xb0] sm:$0xff] }
 0x2b9   :  { %1002 = vmatpush.msra.mxu3 %v811_v63  ;;  %983 = vmatpush.msra.mxu2 %v743_v4  ;;  %v5190_v55 = vld [vmem:[%s6144_s4 + $0xe0] sm:$0xff]  ;;  %v5212_v59 = vld [vmem:[%s6144_s4 + $0xd8] sm:$0xff]  ;;  %v5235_v63 = vld [vmem:[%s6144_s4 + $0xd0] sm:$0xff] }
 0x2ba   :  { %860 = vmatpush.msrb.mxu0 %v752_v9  ;;  %880 = vmatpush.msrb.mxu1 %v816_v10  ;;  %v803_v9 = vld [vmem:[#allocation13 + $0x2b8] sm:$0xff]  ;;  %v734_v10 = vld [vmem:[#allocation13 + $0x90] sm:$0xff] }
 0x2bb   :  { %1003 = vmatpush.msra.mxu3 %v807_v5  ;;  %984 = vmatpush.msra.mxu2 %v739_v8  ;;  %v5253_v4 = vld [vmem:[%s6144_s4 + $0x48] sm:$0xff]  ;;  %v5278_v8 = vld [vmem:[%s6144_s4 + $0xc0] sm:$0xff] }
 0x2bc   :  { %861 = vmatpush.msrb.mxu0 %v748_v13  ;;  %881 = vmatpush.msrb.mxu1 %v812_v14  ;;  %v799_v13 = vld [vmem:[#allocation13 + $0x298] sm:$0xff]  ;;  %v730_v14 = vld [vmem:[#allocation13 + $0x70] sm:$0xff] }
 0x2bd   :  { %1004 = vmatpush.msra.mxu3 %v803_v9  ;;  %985 = vmatpush.msra.mxu2 %v735_v12  ;;  %v5259_v5 = vld [vmem:[%s6144_s4 + $0xc8] sm:$0xff]  ;;  %v5286_v9 = vld [vmem:[%s6144_s4 + $0x140] sm:$0xff]  ;;  %v5304_v12 = vld [vmem:[%s6144_s4 + $0x138] sm:$0xff] }
 0x2be   :  { %862 = vmatpush.msrb.mxu0 %v744_v17  ;;  %882 = vmatpush.msrb.mxu1 %v808_v18  ;;  %v795_v17 = vld [vmem:[#allocation13 + $0x278] sm:$0xff]  ;;  %v726_v18 = vld [vmem:[#allocation13 + $0x50] sm:$0xff] }
 0x2bf   :  { %1005 = vmatpush.msra.mxu3 %v799_v13  ;;  %986 = vmatpush.msra.mxu2 %v731_v16  ;;  %v5309_v13 = vld [vmem:[%s6144_s4 + $0x30] sm:$0xff]  ;;  %v5330_v16 = vld [vmem:[%s6144_s4 + $0x20] sm:$0xff] }
 0x2c0   :  { %863 = vmatpush.msrb.mxu0 %v740_v21  ;;  %883 = vmatpush.msrb.mxu1 %v804_v22  ;;  %v791_v21 = vld [vmem:[#allocation13 + $0x258] sm:$0xff]  ;;  %v722_v22 = vld [vmem:[#allocation13 + $0x30] sm:$0xff] }
 0x2c1   :  { %1006 = vmatpush.msra.mxu3 %v795_v17  ;;  %987 = vmatpush.msra.mxu2 %v727_v20  ;;  %v5336_v17 = vld [vmem:[%s6144_s4 + $0x18] sm:$0xff]  ;;  %v5353_v20 = vld [vmem:[%s6144_s4 + $0x130] sm:$0xff] }
 0x2c2   :  { %864 = vmatpush.msrb.mxu0 %v736_v24  ;;  %884 = vmatpush.msrb.mxu1 %v800_v25  ;;  %v723_v24 = vld [vmem:[#allocation13 + $0x38] sm:$0xff]  ;;  %6145 = vst [vmem:[#allocation45_spill] sm:$0xff] %v5336_v17 }
 0x2c3   :  { %v787_v25 = vld [vmem:[#allocation13 + $0x238] sm:$0xff]  ;;  %1007 = vmatpush.msra.mxu3 %v791_v21  ;;  %988 = vmatpush.msra.mxu2 %v723_v24 }
 0x2c4   :  { %865 = vmatpush.msrb.mxu0 %v732_v26  ;;  %885 = vmatpush.msrb.mxu1 %v796_v27  ;;  %v718_v26 = vld [vmem:[#allocation13 + $0x10] sm:$0xff]  ;;  %v5360_v21 = vld [vmem:[%s6144_s4 + $0x1c8] sm:$0xff] }
 0x2c5   :  { %v782_v27 = vld [vmem:[#allocation13 + $0x210] sm:$0xff]  ;;  %1008 = vmatpush.msra.mxu3 %v787_v25  ;;  %v5377_v24 = vld [vmem:[%s6144_s4 + $0x128] sm:$0xff] }
 0x2c6   :  { %866 = vmatpush.msrb.mxu0 %v728_v28  ;;  %886 = vmatpush.msrb.mxu1 %v792_v29  ;;  %v719_v28 = vld [vmem:[#allocation13 + $0x18] sm:$0xff] }
 0x2c7   :  { %v783_v29 = vld [vmem:[#allocation13 + $0x218] sm:$0xff]  ;;  %989 = vmatpush.msra.mxu2 %v719_v28 }
 0x2c8   :  { %867 = vmatpush.msrb.mxu0 %v724_v30  ;;  %887 = vmatpush.msrb.mxu1 %v788_v31  ;;  %v5384_v25 = vld [vmem:[%s6144_s4 + $0x1c0] sm:$0xff] }
 0x2c9   :  { %1009 = vmatpush.msra.mxu3 %v783_v29  ;;  %v5401_v28 = vld [vmem:[%s6144_s4 + $0x120] sm:$0xff]  ;;  %v5406_v29 = vld [vmem:[%s6144_s4 + $0x1b8] sm:$0xff] }
 0x2ca   :  { %868 = vmatpush.msrb.mxu0 %v720_v32  ;;  %888 = vmatpush.msrb.mxu1 %v784_v33 }
 0x2cc   :  { %869 = vmatpush.msrb.mxu0 %v716_v34  ;;  %889 = vmatpush.msrb.mxu1 %v780_v35 }
 0x2ce   :  { %934 = vmatpush.msra.mxu0 %v778_v36  ;;  %954 = vmatpush.msra.mxu1 %v842_v37 }
 0x2d0   :  { %935 = vmatpush.msra.mxu0 %v774_v38  ;;  %955 = vmatpush.msra.mxu1 %v838_v39 }
 0x2d2   :  { %936 = vmatpush.msra.mxu0 %v770_v40  ;;  %956 = vmatpush.msra.mxu1 %v834_v41 }
 0x2d4   :  { %937 = vmatpush.msra.mxu0 %v766_v42  ;;  %957 = vmatpush.msra.mxu1 %v830_v43 }
 0x2d6   :  { %938 = vmatpush.msra.mxu0 %v762_v44  ;;  %958 = vmatpush.msra.mxu1 %v826_v45  ;;  %v5115_v44 = vld [vmem:[%s6144_s4 + $0x78] sm:$0xff] }
 0x2d7   :  { %v5120_v45 = vld [vmem:[%s6144_s4 + $0xf8] sm:$0xff] }
 0x2d8   :  { %939 = vmatpush.msra.mxu0 %v758_v48  ;;  %959 = vmatpush.msra.mxu1 %v822_v49  ;;  %v5147_v48 = vld [vmem:[%s6144_s4 + $0x170] sm:$0xff] }
 0x2d9   :  { %v5152_v49 = vld [vmem:[%s6144_s4 + $0x1f0] sm:$0xff] }
 0x2da   :  { %940 = vmatpush.msra.mxu0 %v754_v52  ;;  %960 = vmatpush.msra.mxu1 %v818_v53  ;;  %v5171_v52 = vld [vmem:[%s6144_s4 + $0x168] sm:$0xff] }
 0x2db   :  { %v5176_v53 = vld [vmem:[%s6144_s4 + $0x1e8] sm:$0xff] }
 0x2dc   :  { %941 = vmatpush.msra.mxu0 %v750_v56  ;;  %961 = vmatpush.msra.mxu1 %v814_v57  ;;  %v5197_v56 = vld [vmem:[%s6144_s4 + $0x160] sm:$0xff] }
 0x2dd   :  { %v5202_v57 = vld [vmem:[%s6144_s4 + $0x1e0] sm:$0xff] }
 0x2de   :  { %942 = vmatpush.msra.mxu0 %v746_v60  ;;  %962 = vmatpush.msra.mxu1 %v810_v61  ;;  %v5219_v60 = vld [vmem:[%s6144_s4 + $0x158] sm:$0xff] }
 0x2df   :  { %v5224_v61 = vld [vmem:[%s6144_s4 + $0x1d8] sm:$0xff] }
 0x2e0   :  { %943 = vmatpush.msra.mxu0 %v742_v2  ;;  %963 = vmatpush.msra.mxu1 %v806_v3  ;;  %v5243_v2 = vld [vmem:[%s6144_s4 + $0x150] sm:$0xff] }
 0x2e1   :  { %v5248_v3 = vld [vmem:[%s6144_s4 + $0x1d0] sm:$0xff] }
 0x2e2   :  { %944 = vmatpush.msra.mxu0 %v738_v6  ;;  %964 = vmatpush.msra.mxu1 %v802_v7  ;;  %v5267_v6 = vld [vmem:[%s6144_s4 + $0x148] sm:$0xff]  ;;  %v5272_v7 = vld [vmem:[%s6144_s4 + $0x40] sm:$0xff] }
 0x2e4   :  { %945 = vmatpush.msra.mxu0 %v734_v10  ;;  %965 = vmatpush.msra.mxu1 %v798_v11  ;;  %v5291_v10 = vld [vmem:[%s6144_s4 + $0x38] sm:$0xff] }
 0x2e5   :  { %v5297_v11 = vld [vmem:[%s6144_s4 + $0xb8] sm:$0xff] }
 0x2e6   :  { %946 = vmatpush.msra.mxu0 %v730_v14  ;;  %966 = vmatpush.msra.mxu1 %v794_v15  ;;  %v5315_v14 = vld [vmem:[%s6144_s4 + $0xb0] sm:$0xff]  ;;  %v5322_v15 = vld [vmem:[%s6144_s4 + $0x28] sm:$0xff] }
 0x2e8   :  { %947 = vmatpush.msra.mxu0 %v726_v18  ;;  %967 = vmatpush.msra.mxu1 %v790_v19  ;;  %v5343_v18 = vld [vmem:[%s6144_s4 + $0x10] sm:$0xff]  ;;  %v5348_v19 = vld [vmem:[%s6144_s4 + $0xa8] sm:$0xff] }
 0x2e9   :  { %6146 = vst [vmem:[#allocation46_spill] sm:$0xff] %v5343_v18 }
 0x2ea   :  { %948 = vmatpush.msra.mxu0 %v722_v22  ;;  %968 = vmatpush.msra.mxu1 %v786_v23  ;;  %v5367_v22 = vld [vmem:[%s6144_s4 + $0x8] sm:$0xff]  ;;  %v5372_v23 = vld [vmem:[%s6144_s4 + $0xa0] sm:$0xff] }
 0x2eb   :  { %6147 = vst [vmem:[#allocation47_spill] sm:$0xff] %v5367_v22 }
 0x2ec   :  { %949 = vmatpush.msra.mxu0 %v718_v26  ;;  %969 = vmatpush.msra.mxu1 %v782_v27  ;;  %v5389_v26 = vld [vmem:[%s6144_s4] sm:$0xff]  ;;  %v5394_v27 = vld [vmem:[%s6144_s4 + $0x98] sm:$0xff] }
 0x2ed   :  { %6148 = vst [vmem:[#allocation48_spill] sm:$0xff] %v5389_v26 }
 0x2ee   :  { %6149 = vst [vmem:[#allocation49_spill] sm:$0xff] %v5394_v27 }
 0x32a   :  { %v639_v30 = vpop.f32.mrf.mxu0  ;;  %v659_v31 = vpop.f32.mrf.mxu1 }
 0x32b   :  { %v706_v32 = vperm.slane %v639_v30, 0  ;;  %v707_v33 = vperm.slane %v659_v31, 0  ;;  %v5415_v30 = vld [vmem:[%s6144_s4 + $0x90] sm:$0xff]  ;;  %v5420_v31 = vld [vmem:[%s6144_s4 + $0x118] sm:$0xff] }
 0x32c   :  { %6150 = vst [vmem:[#allocation50_spill] sm:$0xff] %v5415_v30 }
 0x32d   :  { %v708_v36 = vmul.f32 %v706_v32, %v5092_v0  ;;  %v709_v37 = vmul.f32 %v707_v33, %v5095_v1  ;;  %v5125_v0 = vld [vmem:[%s6144_s4 + $0x178] sm:$0xff]  ;;  %6151 = vst [vmem:[#allocation51_spill] sm:$0xff] %v5420_v31  ;;  %v5425_v32 = vld [vmem:[%s6144_s4 + $0x1b0] sm:$0xff]  ;;  %v5433_v33 = vld [vmem:[%s6144_s4 + $0x88] sm:$0xff] }
 0x32e   :  { %v5130_v1 = vld [vmem:[%s6144_s4 + $0x1f8] sm:$0xff]  ;;  %6152 = vst [vmem:[#allocation52_spill] sm:$0xff] %v5433_v33 }
 0x332   :  { %v683_v34 = vpop.f32.mrf.mxu0  ;;  %v703_v35 = vpop.f32.mrf.mxu1 }
 0x333   :  { %v710_v38 = vperm.slane %v683_v34, 0  ;;  %v711_v39 = vperm.slane %v703_v35, 0  ;;  %v5438_v34 = vld [vmem:[%s6144_s4 + $0x110] sm:$0xff]  ;;  %v5443_v35 = vld [vmem:[%s6144_s4 + $0x1a8] sm:$0xff] }
 0x334   :  { %6153 = vst [vmem:[#allocation53_spill] sm:$0xff] %v5438_v34 }
 0x335   :  { %v712_v40 = vadd.f32 %v710_v38, %v708_v36  ;;  %v713_v41 = vadd.f32 %v711_v39, %v709_v37  ;;  %v5451_v36 = vld [vmem:[%s6144_s4 + $0x80] sm:$0xff]  ;;  %v5456_v37 = vld [vmem:[%s6144_s4 + $0x108] sm:$0xff] }
 0x336   :  { %6154 = vst [vmem:[#allocation54_spill] sm:$0xff] %v5451_v36  ;;  %v5461_v38 = vld [vmem:[%s6144_s4 + $0x1a0] sm:$0xff] }
 0x337   :  { %v714_v42 = vmax.f32 %v712_v40, 0.0  ;;  %v715_v43 = vmax.f32 %v713_v41, 0.0  ;;  %6155 = vst [vmem:[#allocation55_spill] sm:$0xff] %v5456_v37  ;;  %v5469_v39 = vld [vmem:[%s6144_s4 + $0x100] sm:$0xff]  ;;  %v5474_v40 = vld [vmem:[%s6144_s4 + $0x198] sm:$0xff]  ;;  %v5481_v41 = vld [vmem:[%s6144_s4 + $0x190] sm:$0xff] }
 0x338   :  { %6156 = vst [vmem:[#allocation56_spill] sm:$0xff] %v5461_v38 }
 0x339   :  { %870 = vmatmul.f32.vlgmr.msrb.gmra.mxu0 %v714_v42  ;;  %890 = vmatmul.f32.vlgmr.msrb.gmra.mxu1 %v715_v43  ;;  %6157 = vst [vmem:[#allocation57_spill] sm:$0xff] %v5469_v39 }
 0x33a   :  { %910 = vmatmul.f32.vlgmr.msrb.gmra.mxu2 %v714_v42  ;;  %930 = vmatmul.f32.vlgmr.msrb.gmra.mxu3 %v715_v43  ;;  %6158 = vst [vmem:[#allocation58_spill] sm:$0xff] %v5474_v40 }
 0x33b   :  { %1082 = vmatpush.msrb.mxu0 %v5115_v44  ;;  %1102 = vmatpush.msrb.mxu1 %v5120_v45  ;;  %6159 = vst [vmem:[#allocation59_spill] sm:$0xff] %v5481_v41 }
 0x33c   :  { %1122 = vmatpush.msrb.mxu2 %v5125_v0  ;;  %1142 = vmatpush.msrb.mxu3 %v5130_v1 }
 0x33d   :  { %1083 = vmatpush.msrb.mxu0 %v5135_v46  ;;  %1103 = vmatpush.msrb.mxu1 %v5140_v47 }
 0x33e   :  { %1123 = vmatpush.msrb.mxu2 %v5147_v48  ;;  %1143 = vmatpush.msrb.mxu3 %v5152_v49 }
 0x33f   :  { %1084 = vmatpush.msrb.mxu0 %v5157_v50  ;;  %1104 = vmatpush.msrb.mxu1 %v5163_v51 }
 0x340   :  { %1124 = vmatpush.msrb.mxu2 %v5171_v52  ;;  %1144 = vmatpush.msrb.mxu3 %v5176_v53 }
 0x341   :  { %950 = vmatmul.f32.vlgmr.msra.gmra.mxu0 %v714_v42  ;;  %970 = vmatmul.f32.vlgmr.msra.gmra.mxu1 %v715_v43 }
 0x342   :  { %990 = vmatmul.f32.vlgmr.msra.gmra.mxu2 %v714_v42  ;;  %1010 = vmatmul.f32.vlgmr.msra.gmra.mxu3 %v715_v43  ;;  %v5487_v42 = vld [vmem:[%s6144_s4 + $0x188] sm:$0xff]  ;;  %v5493_v43 = vld [vmem:[%s6144_s4 + $0x180] sm:$0xff] }
 0x343   :  { %1085 = vmatpush.msrb.mxu0 %v5185_v54  ;;  %1105 = vmatpush.msrb.mxu1 %v5190_v55  ;;  %6160 = vst [vmem:[#allocation60_spill] sm:$0xff] %v5487_v42 }
 0x344   :  { %1125 = vmatpush.msrb.mxu2 %v5197_v56  ;;  %1145 = vmatpush.msrb.mxu3 %v5202_v57  ;;  %6161 = vst [vmem:[#allocation61_spill] sm:$0xff] %v5493_v43 }
 0x345   :  { %1086 = vmatpush.msrb.mxu0 %v5207_v58  ;;  %1106 = vmatpush.msrb.mxu1 %v5212_v59 }
 0x346   :  { %1126 = vmatpush.msrb.mxu2 %v5219_v60  ;;  %1146 = vmatpush.msrb.mxu3 %v5224_v61 }
 0x347   :  { %1087 = vmatpush.msrb.mxu0 %v5229_v62  ;;  %1107 = vmatpush.msrb.mxu1 %v5235_v63 }
 0x348   :  { %1127 = vmatpush.msrb.mxu2 %v5243_v2  ;;  %1147 = vmatpush.msrb.mxu3 %v5248_v3 }
 0x349   :  { %1088 = vmatpush.msrb.mxu0 %v5253_v4  ;;  %1108 = vmatpush.msrb.mxu1 %v5259_v5 }
 0x34a   :  { %1128 = vmatpush.msrb.mxu2 %v5267_v6  ;;  %1148 = vmatpush.msrb.mxu3 %v5360_v21 }
 0x34b   :  { %1089 = vmatpush.msrb.mxu0 %v5272_v7  ;;  %1109 = vmatpush.msrb.mxu1 %v5278_v8 }
 0x34c   :  { %1129 = vmatpush.msrb.mxu2 %v5286_v9  ;;  %1149 = vmatpush.msrb.mxu3 %v5384_v25 }
 0x34d   :  { %1090 = vmatpush.msrb.mxu0 %v5291_v10  ;;  %1110 = vmatpush.msrb.mxu1 %v5297_v11 }
 0x34e   :  { %1130 = vmatpush.msrb.mxu2 %v5304_v12  ;;  %1150 = vmatpush.msrb.mxu3 %v5406_v29 }
 0x34f   :  { %1091 = vmatpush.msrb.mxu0 %v5309_v13  ;;  %1111 = vmatpush.msrb.mxu1 %v5315_v14 }
 0x350   :  { %1131 = vmatpush.msrb.mxu2 %v5353_v20  ;;  %1151 = vmatpush.msrb.mxu3 %v5425_v32 }
 0x351   :  { %1092 = vmatpush.msrb.mxu0 %v5322_v15  ;;  %1112 = vmatpush.msrb.mxu1 %v5348_v19 }
 0x352   :  { %1132 = vmatpush.msrb.mxu2 %v5377_v24  ;;  %1152 = vmatpush.msrb.mxu3 %v5443_v35 }
 0x353   :  { %1093 = vmatpush.msrb.mxu0 %v5330_v16  ;;  %1113 = vmatpush.msrb.mxu1 %v5372_v23 }
 0x354   :  { %1133 = vmatpush.msrb.mxu2 %v5401_v28  ;;  %1153 = vmatpush.msrb.mxu3 %v5461_v38 }
 0x355   :  { %1094 = vmatpush.msrb.mxu0 %v5336_v17  ;;  %1114 = vmatpush.msrb.mxu1 %v5394_v27 }
 0x356   :  { %1134 = vmatpush.msrb.mxu2 %v5420_v31  ;;  %1154 = vmatpush.msrb.mxu3 %v5474_v40 }
 0x357   :  { %1095 = vmatpush.msrb.mxu0 %v5343_v18  ;;  %1115 = vmatpush.msrb.mxu1 %v5415_v30 }
 0x358   :  { %1135 = vmatpush.msrb.mxu2 %v5438_v34  ;;  %1155 = vmatpush.msrb.mxu3 %v5481_v41 }
 0x359   :  { %1096 = vmatpush.msrb.mxu0 %v5367_v22  ;;  %1116 = vmatpush.msrb.mxu1 %v5433_v33 }
 0x35a   :  { %1136 = vmatpush.msrb.mxu2 %v5456_v37  ;;  %1156 = vmatpush.msrb.mxu3 %v5487_v42 }
 0x35b   :  { %1097 = vmatpush.msrb.mxu0 %v5389_v26  ;;  %1117 = vmatpush.msrb.mxu1 %v5451_v36 }
 0x35c   :  { %1137 = vmatpush.msrb.mxu2 %v5469_v39  ;;  %1157 = vmatpush.msrb.mxu3 %v5493_v43  ;;  %v844_v39 = vld [vmem:[#allocation14] sm:$0xf] }
 0x35d   :  { %v846_v36 = vperm.slane %v844_v39, 0  ;;  %v847_v41 = vperm.slane %v844_v39, 1  ;;  %v848_v34 = vperm.slane %v844_v39, 2  ;;  %v849_v38 = vperm.slane %v844_v39, 3 }
 0x3b6   :  { %v871_v26 = vpop.f32.mrf.mxu0  ;;  %v891_v37 = vpop.f32.mrf.mxu1 }
 0x3b7   :  { %v872_v33 = vadd.f32 %v871_v26, %v846_v36 }
 0x3b9   :  { %v5496_v22 = vadd.f32 %v891_v37, %v872_v33 }
 0x3bb   :  { %1098 = vmatmul.f32.vlgmr.msrb.gmra.mxu0 %v5496_v22 }
 0x3bd   :  { %v911_v30 = vpop.f32.mrf.mxu2  ;;  %v931_v42 = vpop.f32.mrf.mxu3 }
 0x3be   :  { %v912_v18 = vadd.f32 %v911_v30, %v847_v41  ;;  %v951_v40 = vpop.f32.mrf.mxu0  ;;  %v971_v17 = vpop.f32.mrf.mxu1  ;;  %v5508_v30 = vld [vmem:[#allocation16] sm:$0xff] }
 0x3bf   :  { %v952_v31 = vadd.f32 %v951_v40, %v848_v34  ;;  %v5510_v34 = vld [vmem:[#allocation16 + $0x8] sm:$0xff]  ;;  %1190 = vmatpush.msra.mxu0 %v5508_v30 }
 0x3c0   :  { %v5499_v27 = vadd.f32 %v931_v42, %v912_v18  ;;  %v5512_v18 = vld [vmem:[#allocation16 + $0x10] sm:$0xff]  ;;  %1210 = vmatpush.msra.mxu1 %v5510_v34 }
 0x3c1   :  { %v5501_v43 = vadd.f32 %v971_v17, %v952_v31  ;;  %v5516_v17 = vld [vmem:[#allocation16 + $0x18] sm:$0xff]  ;;  %1230 = vmatpush.msra.mxu2 %v5512_v18  ;;  %1267 = vmatpush.msrb.mxu0 %v5115_v44 }
 0x3c2   :  { %1118 = vmatmul.f32.vlgmr.msrb.gmra.mxu1 %v5499_v27  ;;  %1250 = vmatpush.msra.mxu3 %v5516_v17 }
 0x3c3   :  { %1138 = vmatmul.f32.vlgmr.msrb.gmra.mxu2 %v5501_v43  ;;  %1287 = vmatpush.msrb.mxu1 %v5120_v45 }
 0x3c4   :  { %1307 = vmatpush.msrb.mxu2 %v5125_v0  ;;  %1268 = vmatpush.msrb.mxu0 %v5135_v46 }
 0x3c5   :  { %v991_v26 = vpop.f32.mrf.mxu2  ;;  %v1011_v36 = vpop.f32.mrf.mxu3  ;;  %1288 = vmatpush.msrb.mxu1 %v5140_v47 }
 0x3c6   :  { %v992_v33 = vadd.f32 %v991_v26, %v849_v38  ;;  %1308 = vmatpush.msrb.mxu2 %v5147_v48  ;;  %1269 = vmatpush.msrb.mxu0 %v5157_v50 }
 0x3c7   :  { %1289 = vmatpush.msrb.mxu1 %v5163_v51 }
 0x3c8   :  { %v5505_v37 = vadd.f32 %v1011_v36, %v992_v33  ;;  %1309 = vmatpush.msrb.mxu2 %v5171_v52  ;;  %1270 = vmatpush.msrb.mxu0 %v5185_v54  ;;  %v6162_v54 = vld [vmem:[#allocation56_spill] sm:$0xff] }
 0x3c9   :  { %1290 = vmatpush.msrb.mxu1 %v5190_v55  ;;  %v6163_v55 = vld [vmem:[#allocation45_spill] sm:$0xff] }
 0x3ca   :  { %1158 = vmatmul.f32.vlgmr.msrb.gmra.mxu3 %v5505_v37  ;;  %1310 = vmatpush.msrb.mxu2 %v5197_v56  ;;  %v6164_v56 = vld [vmem:[#allocation49_spill] sm:$0xff] }
 0x3cb   :  { %1327 = vmatpush.msrb.mxu3 %v5130_v1  ;;  %1271 = vmatpush.msrb.mxu0 %v5207_v58  ;;  %v6165_v58 = vld [vmem:[#allocation51_spill] sm:$0xff] }
 0x3cc   :  { %1291 = vmatpush.msrb.mxu1 %v5212_v59  ;;  %1311 = vmatpush.msrb.mxu2 %v5219_v60  ;;  %v6166_v59 = vld [vmem:[#allocation58_spill] sm:$0xff] }
 0x3cd   :  { %1328 = vmatpush.msrb.mxu3 %v5152_v49  ;;  %1272 = vmatpush.msrb.mxu0 %v5229_v62  ;;  %v6167_v60 = vld [vmem:[#allocation46_spill] sm:$0xff] }
 0x3ce   :  { %1292 = vmatpush.msrb.mxu1 %v5235_v63  ;;  %1312 = vmatpush.msrb.mxu2 %v5243_v2  ;;  %v6169_v63 = vld [vmem:[#allocation53_spill] sm:$0xff]  ;;  %v6170_v2 = vld [vmem:[#allocation59_spill] sm:$0xff] }
 0x3cf   :  { %1329 = vmatpush.msrb.mxu3 %v5176_v53  ;;  %1273 = vmatpush.msrb.mxu0 %v5253_v4  ;;  %v6172_v4 = vld [vmem:[#allocation52_spill] sm:$0xff] }
 0x3d0   :  { %1293 = vmatpush.msrb.mxu1 %v5259_v5  ;;  %1313 = vmatpush.msrb.mxu2 %v5267_v6  ;;  %v6173_v6 = vld [vmem:[#allocation55_spill] sm:$0xff] }
 0x3d1   :  { %1330 = vmatpush.msrb.mxu3 %v5202_v57  ;;  %1274 = vmatpush.msrb.mxu0 %v5272_v7  ;;  %v6174_v7 = vld [vmem:[#allocation60_spill] sm:$0xff] }
 0x3d2   :  { %1294 = vmatpush.msrb.mxu1 %v5278_v8  ;;  %1314 = vmatpush.msrb.mxu2 %v5286_v9  ;;  %v6175_v8 = vld [vmem:[#allocation48_spill] sm:$0xff]  ;;  %v6176_v9 = vld [vmem:[#allocation54_spill] sm:$0xff] }
 0x3d3   :  { %1331 = vmatpush.msrb.mxu3 %v5224_v61  ;;  %1275 = vmatpush.msrb.mxu0 %v5291_v10  ;;  %v6168_v61 = vld [vmem:[#allocation50_spill] sm:$0xff]  ;;  %v6177_v10 = vld [vmem:[#allocation57_spill] sm:$0xff] }
 0x3d4   :  { %1295 = vmatpush.msrb.mxu1 %v5297_v11  ;;  %1315 = vmatpush.msrb.mxu2 %v5304_v12  ;;  %v6178_v11 = vld [vmem:[#allocation61_spill] sm:$0xff] }
 0x3d5   :  { %1332 = vmatpush.msrb.mxu3 %v5248_v3  ;;  %1276 = vmatpush.msrb.mxu0 %v5309_v13  ;;  %v6171_v3 = vld [vmem:[#allocation47_spill] sm:$0xff] }
 0x3d6   :  { %1296 = vmatpush.msrb.mxu1 %v5315_v14  ;;  %1316 = vmatpush.msrb.mxu2 %v5353_v20 }
 0x3d7   :  { %1333 = vmatpush.msrb.mxu3 %v5360_v21  ;;  %1277 = vmatpush.msrb.mxu0 %v5322_v15 }
 0x3d8   :  { %1297 = vmatpush.msrb.mxu1 %v5348_v19  ;;  %1317 = vmatpush.msrb.mxu2 %v5377_v24 }
 0x3d9   :  { %1334 = vmatpush.msrb.mxu3 %v5384_v25  ;;  %1278 = vmatpush.msrb.mxu0 %v5330_v16 }
 0x3da   :  { %1298 = vmatpush.msrb.mxu1 %v5372_v23  ;;  %1318 = vmatpush.msrb.mxu2 %v5401_v28 }
 0x3db   :  { %1335 = vmatpush.msrb.mxu3 %v5406_v29  ;;  %1279 = vmatpush.msrb.mxu0 %v6163_v55  ;;  %v1639_v55 = vld [vmem:[#allocation20 + $0x2a0] sm:$0xff] }
 0x3dc   :  { %1299 = vmatpush.msrb.mxu1 %v6164_v56  ;;  %1319 = vmatpush.msrb.mxu2 %v6165_v58  ;;  %v1735_v56 = vld [vmem:[#allocation20 + $0x5a0] sm:$0xff] }
 0x3dd   :  { %1336 = vmatpush.msrb.mxu3 %v5425_v32  ;;  %1280 = vmatpush.msrb.mxu0 %v6167_v60  ;;  %v1927_v58 = vld [vmem:[#allocation20 + $0xba0] sm:$0xff]  ;;  %v1729_v60 = vld [vmem:[#allocation20 + $0x570] sm:$0xff] }
 0x3de   :  { %1300 = vmatpush.msrb.mxu1 %v6168_v61  ;;  %1320 = vmatpush.msrb.mxu2 %v6169_v63  ;;  %v1825_v61 = vld [vmem:[#allocation20 + $0x870] sm:$0xff]  ;;  %v1451_v63 = vld [vmem:[#allocation19] sm:$0x1] }
 0x3df   :  { %1337 = vmatpush.msrb.mxu3 %v5443_v35  ;;  %1281 = vmatpush.msrb.mxu0 %v6171_v3  ;;  %v1723_v3 = vld [vmem:[#allocation20 + $0x540] sm:$0xff] }
 0x3e0   :  { %1301 = vmatpush.msrb.mxu1 %v6172_v4  ;;  %1321 = vmatpush.msrb.mxu2 %v6173_v6  ;;  %v1819_v4 = vld [vmem:[#allocation20 + $0x840] sm:$0xff]  ;;  %v1621_v6 = vld [vmem:[#allocation20 + $0x210] sm:$0xff] }
 0x3e1   :  { %1338 = vmatpush.msrb.mxu3 %v6162_v54  ;;  %1282 = vmatpush.msrb.mxu0 %v6175_v8  ;;  %v1933_v54 = vld [vmem:[#allocation20 + $0xbd0] sm:$0xff] }
 0x3e2   :  { %1302 = vmatpush.msrb.mxu1 %v6176_v9  ;;  %1322 = vmatpush.msrb.mxu2 %v6177_v10  ;;  %v1813_v8 = vld [vmem:[#allocation20 + $0x810] sm:$0xff]  ;;  %v1615_v10 = vld [vmem:[#allocation20 + $0x1e0] sm:$0xff] }
 0x3e3   :  { %1339 = vmatpush.msrb.mxu3 %v6166_v59  ;;  %v1633_v59 = vld [vmem:[#allocation20 + $0x270] sm:$0xff] }
 0x3e4   :  { %v1909_v9 = vld [vmem:[#allocation20 + $0xb10] sm:$0xff] }
 0x3e5   :  { %1340 = vmatpush.msrb.mxu3 %v6170_v2  ;;  %v1627_v2 = vld [vmem:[#allocation20 + $0x240] sm:$0xff] }
 0x3e7   :  { %1341 = vmatpush.msrb.mxu3 %v6174_v7  ;;  %v1717_v7 = vld [vmem:[#allocation20 + $0x510] sm:$0xff] }
 0x3e9   :  { %1342 = vmatpush.msrb.mxu3 %v6178_v11  ;;  %v1711_v11 = vld [vmem:[#allocation20 + $0x4e0] sm:$0xff] }
 0x438   :  { %v1099_v45 = vpop.f32.mrf.mxu0 }
 0x43f   :  { %v1119_v44 = vpop.f32.mrf.mxu1 }
 0x440   :  { %v1120_v1 = vadd.f32 %v1119_v44, %v1099_v45 }
 0x446   :  { %v1139_v0 = vpop.f32.mrf.mxu2 }
 0x447   :  { %v1140_v46 = vadd.f32 %v1139_v0, %v1120_v1 }
 0x44d   :  { %v1159_v47 = vpop.f32.mrf.mxu3 }
 0x44e   :  { %v1160_v48 = vadd.f32 %v1159_v47, %v1140_v46  ;;  %v1355_v47 = vld [vmem:[#allocation17] sm:$0x1] }
 0x450   :  { %v1163_v49 = vsel %vm1162_vm5, %v1160_v48, 0.0 }
 0x451   :  { %v1164_v50 = vrot.slane %v1163_v49, 4 }
 0x453   :  { %v1165_v51 = vadd.f32 %v1164_v50, %v1163_v49 }
 0x455   :  { %v1166_v52 = vrot.slane %v1165_v51, 2 }
 0x457   :  { %v1167_v53 = vadd.f32 %v1166_v52, %v1165_v51  ;;  %v1645_v51 = vld [vmem:[#allocation20 + $0x2d0] sm:$0xff] }
 0x458   :  { %v1741_v52 = vld [vmem:[#allocation20 + $0x5d0] sm:$0xff] }
 0x459   :  { %v1168_v57 = vrot.slane %v1167_v53, 1 }
 0x45b   :  { %v1169_v62 = vadd.f32 %v1168_v57, %v1167_v53  ;;  %v1837_v53 = vld [vmem:[#allocation20 + $0x8d0] sm:$0xff]  ;;  %v1831_v57 = vld [vmem:[#allocation20 + $0x8a0] sm:$0xff] }
 0x45d   :  { %v1170_v5 = vmul.f32 0.0078125, %v1169_v62  ;;  %v1921_v62 = vld [vmem:[#allocation20 + $0xb70] sm:$0xff] }
 0x45f   :  { %4045 = vmatmul.msk.f32.vlgmr.msra.gmra.mxu0 %vm1171_vm6, %v1170_v5  ;;  %4046 = vmatmul.msk.f32.vlgmr.msra.gmra.mxu1 %vm1171_vm6, %v1170_v5 }
 0x460   :  { %4047 = vmatmul.msk.f32.vlgmr.msra.gmra.mxu2 %vm1171_vm6, %v1170_v5  ;;  %4048 = vmatmul.msk.f32.vlgmr.msra.gmra.mxu3 %vm1171_vm6, %v1170_v5  ;;  %v1915_v5 = vld [vmem:[#allocation20 + $0xb40] sm:$0xff] }
 0x461   :  { %1386 = vmatpush.msra.mxu0 %v5508_v30  ;;  %1406 = vmatpush.msra.mxu1 %v5510_v34 }
 0x462   :  { %1426 = vmatpush.msra.mxu2 %v5512_v18  ;;  %1446 = vmatpush.msra.mxu3 %v5516_v17 }
 0x4dc   :  { %v1192_v12 = vpop.f32.mrf.mxu0  ;;  %v1212_v13 = vpop.f32.mrf.mxu1 }
 0x4dd   :  { %v1255_v14 = vperm.slane %v1192_v12, 0  ;;  %v1256_v15 = vperm.slane %v1212_v13, 0  ;;  %v1807_v12 = vld [vmem:[#allocation20 + $0x7e0] sm:$0xff] }
 0x4de   :  { %v1903_v13 = vld [vmem:[#allocation20 + $0xae0] sm:$0xff] }
 0x4df   :  { %v5594_v16 = vsub.f32 %v5496_v22, %v1255_v14  ;;  %v5597_v19 = vsub.f32 %v5499_v27, %v1256_v15  ;;  %v1609_v14 = vld [vmem:[#allocation20 + $0x1b0] sm:$0xff] }
 0x4e0   :  { %v1705_v15 = vld [vmem:[#allocation20 + $0x4b0] sm:$0xff] }
 0x4e1   :  { %v1263_v20 = vmul.f32 %v5594_v16, %v5594_v16  ;;  %v1264_v21 = vmul.f32 %v5597_v19, %v5597_v19 }
 0x4e3   :  { %v1232_v23 = vpop.f32.mrf.mxu2  ;;  %v1252_v24 = vpop.f32.mrf.mxu3  ;;  %1283 = vmatmul.f32.vlgmr.msrb.gmra.mxu0 %v1263_v20  ;;  %1303 = vmatmul.f32.vlgmr.msrb.gmra.mxu1 %v1264_v21  ;;  %v1801_v20 = vld [vmem:[#allocation20 + $0x7b0] sm:$0xff] }
 0x4e4   :  { %v1257_v25 = vperm.slane %v1232_v23, 0  ;;  %v1258_v28 = vperm.slane %v1252_v24, 0  ;;  %1470 = vmatpush.msrb.mxu0 %v5508_v30  ;;  %1490 = vmatpush.msrb.mxu1 %v5510_v34  ;;  %v1897_v21 = vld [vmem:[#allocation20 + $0xab0] sm:$0xff]  ;;  %v1603_v23 = vld [vmem:[#allocation20 + $0x180] sm:$0xff] }
 0x4e5   :  { %v1699_v24 = vld [vmem:[#allocation20 + $0x480] sm:$0xff] }
 0x4e6   :  { %v5606_v22 = vsub.f32 %v5501_v43, %v1257_v25  ;;  %v5609_v27 = vsub.f32 %v5505_v37, %v1258_v28  ;;  %v1795_v25 = vld [vmem:[#allocation20 + $0x780] sm:$0xff] }
 0x4e7   :  { %v1891_v28 = vld [vmem:[#allocation20 + $0xa80] sm:$0xff] }
 0x4e8   :  { %v1265_v29 = vmul.f32 %v5606_v22, %v5606_v22  ;;  %v1266_v31 = vmul.f32 %v5609_v27, %v5609_v27 }
 0x4ea   :  { %1323 = vmatmul.f32.vlgmr.msrb.gmra.mxu2 %v1265_v29  ;;  %1343 = vmatmul.f32.vlgmr.msrb.gmra.mxu3 %v1266_v31  ;;  %v1597_v29 = vld [vmem:[#allocation20 + $0x150] sm:$0xff] }
 0x4eb   :  { %1510 = vmatpush.msrb.mxu2 %v5512_v18  ;;  %1530 = vmatpush.msrb.mxu3 %v5516_v17  ;;  %v1693_v31 = vld [vmem:[#allocation20 + $0x450] sm:$0xff] }
 0x560   :  { %v1284_v32 = vpop.f32.mrf.mxu0  ;;  %v1304_v35 = vpop.f32.mrf.mxu1 }
 0x561   :  { %v1305_v38 = vadd.f32 %v1304_v35, %v1284_v32  ;;  %v1789_v32 = vld [vmem:[#allocation20 + $0x750] sm:$0xff] }
 0x562   :  { %v1885_v35 = vld [vmem:[#allocation20 + $0xa50] sm:$0xff] }
 0x56d   :  { %v1324_v39 = vpop.f32.mrf.mxu2  ;;  %v1344_v41 = vpop.f32.mrf.mxu3 }
 0x56e   :  { %v1325_v40 = vadd.f32 %v1324_v39, %v1305_v38  ;;  %v1591_v38 = vld [vmem:[#allocation20 + $0x120] sm:$0xff] }
 0x56f   :  { %v1687_v39 = vld [vmem:[#allocation20 + $0x420] sm:$0xff] }
 0x570   :  { %v1345_v42 = vadd.f32 %v1344_v41, %v1325_v40  ;;  %v1783_v40 = vld [vmem:[#allocation20 + $0x720] sm:$0xff] }
 0x571   :  { %v1879_v41 = vld [vmem:[#allocation20 + $0xa20] sm:$0xff] }
 0x572   :  { %v1347_v43 = vsel %vm1162_vm5, %v1345_v42, 0.0  ;;  %v1585_v42 = vld [vmem:[#allocation20 + $0xf0] sm:$0xff] }
 0x573   :  { %v1348_v26 = vrot.slane %v1347_v43, 4 }
 0x575   :  { %v1349_v33 = vadd.f32 %v1348_v26, %v1347_v43  ;;  %v1681_v43 = vld [vmem:[#allocation20 + $0x3f0] sm:$0xff] }
 0x576   :  { %v1777_v26 = vld [vmem:[#allocation20 + $0x6f0] sm:$0xff] }
 0x577   :  { %v1350_v36 = vrot.slane %v1349_v33, 2 }
 0x579   :  { %v1351_v37 = vadd.f32 %v1350_v36, %v1349_v33  ;;  %v1873_v33 = vld [vmem:[#allocation20 + $0x9f0] sm:$0xff]  ;;  %v1579_v36 = vld [vmem:[#allocation20 + $0xc0] sm:$0xff] }
 0x57b   :  { %v1352_v30 = vrot.slane %v1351_v37, 1 }
 0x57d   :  { %v1353_v34 = vadd.f32 %v1352_v30, %v1351_v37  ;;  %v1675_v37 = vld [vmem:[#allocation20 + $0x3c0] sm:$0xff] }
 0x57e   :  { %v1771_v30 = vld [vmem:[#allocation20 + $0x6c0] sm:$0xff] }
 0x57f   :  { %v1354_v44 = vmul.f32 0.0078125, %v1353_v34  ;;  %v1867_v34 = vld [vmem:[#allocation20 + $0x9c0] sm:$0xff] }
 0x581   :  { %v1356_v45 = vadd.f32 1e-05, %v1354_v44  ;;  %v1573_v44 = vld [vmem:[#allocation20 + $0x90] sm:$0xff] }
 0x583   :  { %4092 = vrsqrt.f32 %v1356_v45  ;;  %vm1363_vm8 = vweird.f32 %v1356_v45 }
 0x589   :  { %v4093_v18 = vpop.eup %4092 }
 0x58a   :  { %v1358_v17 = vmul.f32 %v4093_v18, %v1356_v45  ;;  %vm1364_vm7 = vweird.f32 %v4093_v18  ;;  %v1669_v45 = vld [vmem:[#allocation20 + $0x390] sm:$0xff] }
 0x58b   :  { %vm1365_vm9 = vmor %vm1363_vm8, %vm1364_vm7 }
 0x58c   :  { %v1359_v0 = vmul.f32 %v4093_v18, %v1358_v17  ;;  %v1861_v17 = vld [vmem:[#allocation20 + $0x990] sm:$0xff] }
 0x58e   :  { %v1360_v1 = vmul.f32 0.5, %v1359_v0  ;;  %v1567_v0 = vld [vmem:[#allocation20 + $0x60] sm:$0xff] }
 0x590   :  { %v1361_v46 = vsub.f32 1.5, %v1360_v1  ;;  %v1663_v1 = vld [vmem:[#allocation20 + $0x360] sm:$0xff] }
 0x592   :  { %v1362_v48 = vmul.f32 %v4093_v18, %v1361_v46  ;;  %v1759_v46 = vld [vmem:[#allocation20 + $0x660] sm:$0xff] }
 0x594   :  { %v1366_v49 = vsel %vm1365_vm9, %v4093_v18, %v1362_v48  ;;  %v1765_v18 = vld [vmem:[#allocation20 + $0x690] sm:$0xff] }
 0x595   :  { %v1367_v50 = vmul.f32 %v1366_v49, %v1355_v47  ;;  %v1855_v47 = vld [vmem:[#allocation20 + $0x960] sm:$0xff]  ;;  %v1561_v48 = vld [vmem:[#allocation20 + $0x30] sm:$0xff] }
 0x596   :  { %v1657_v49 = vld [vmem:[#allocation20 + $0x330] sm:$0xff] }
 0x597   :  { %4049 = vmatmul.msk.f32.vlgmr.msra.gmra.mxu0 %vm1171_vm6, %v1367_v50  ;;  %4050 = vmatmul.msk.f32.vlgmr.msra.gmra.mxu1 %vm1171_vm6, %v1367_v50 }
 0x598   :  { %4051 = vmatmul.msk.f32.vlgmr.msra.gmra.mxu2 %vm1171_vm6, %v1367_v50  ;;  %4052 = vmatmul.msk.f32.vlgmr.msra.gmra.mxu3 %vm1171_vm6, %v1367_v50  ;;  %v1753_v50 = vld [vmem:[#allocation20 + $0x630] sm:$0xff] }
 0x599   :  { %1953 = vmatpush.msra.mxu0 %v1645_v51  ;;  %1973 = vmatpush.msra.mxu1 %v1741_v52  ;;  %v1849_v51 = vld [vmem:[#allocation20 + $0x930] sm:$0xff]  ;;  %v1555_v52 = vld [vmem:[#allocation20] sm:$0xff] }
 0x59a   :  { %1993 = vmatpush.msra.mxu2 %v1837_v53  ;;  %2013 = vmatpush.msra.mxu3 %v1933_v54  ;;  %v1651_v53 = vld [vmem:[#allocation20 + $0x300] sm:$0xff]  ;;  %v1646_v54 = vld [vmem:[#allocation20 + $0x2d8] sm:$0xff] }
 0x59b   :  { %1954 = vmatpush.msra.mxu0 %v1639_v55  ;;  %1974 = vmatpush.msra.mxu1 %v1735_v56  ;;  %v1742_v55 = vld [vmem:[#allocation20 + $0x5d8] sm:$0xff]  ;;  %v1747_v56 = vld [vmem:[#allocation20 + $0x600] sm:$0xff] }
 0x59c   :  { %1994 = vmatpush.msra.mxu2 %v1831_v57  ;;  %2014 = vmatpush.msra.mxu3 %v1927_v58  ;;  %v1843_v57 = vld [vmem:[#allocation20 + $0x900] sm:$0xff]  ;;  %v1640_v58 = vld [vmem:[#allocation20 + $0x2a8] sm:$0xff] }
 0x59d   :  { %1955 = vmatpush.msra.mxu0 %v1633_v59  ;;  %1975 = vmatpush.msra.mxu1 %v1729_v60  ;;  %v1736_v59 = vld [vmem:[#allocation20 + $0x5a8] sm:$0xff]  ;;  %v1838_v60 = vld [vmem:[#allocation20 + $0x8d8] sm:$0xff] }
 0x59e   :  { %1995 = vmatpush.msra.mxu2 %v1825_v61  ;;  %2015 = vmatpush.msra.mxu3 %v1921_v62  ;;  %v1934_v61 = vld [vmem:[#allocation20 + $0xbd8] sm:$0xff] }
 0x59f   :  { %4053 = vmatmul.msk.f32.vlgmr.msrb.gmra.mxu0 %vm1171_vm6, %v1451_v63  ;;  %4054 = vmatmul.msk.f32.vlgmr.msrb.gmra.mxu1 %vm1171_vm6, %v1451_v63  ;;  %v1634_v62 = vld [vmem:[#allocation20 + $0x278] sm:$0xff] }
 0x5a0   :  { %4055 = vmatmul.msk.f32.vlgmr.msrb.gmra.mxu2 %vm1171_vm6, %v1451_v63  ;;  %4056 = vmatmul.msk.f32.vlgmr.msrb.gmra.mxu3 %vm1171_vm6, %v1451_v63  ;;  %v1730_v63 = vld [vmem:[#allocation20 + $0x578] sm:$0xff]  ;;  %vm4016_vm6 = vcmask 1024  }
 0x5a1   :  { %1956 = vmatpush.msra.mxu0 %v1627_v2  ;;  %1976 = vmatpush.msra.mxu1 %v1723_v3  ;;  %v1832_v2 = vld [vmem:[#allocation20 + $0x8a8] sm:$0xff] }
 0x5a2   :  { %1996 = vmatpush.msra.mxu2 %v1819_v4  ;;  %2016 = vmatpush.msra.mxu3 %v1915_v5  ;;  %v1928_v3 = vld [vmem:[#allocation20 + $0xba8] sm:$0xff] }
 0x5a3   :  { %1957 = vmatpush.msra.mxu0 %v1621_v6  ;;  %1977 = vmatpush.msra.mxu1 %v1717_v7  ;;  %v1628_v4 = vld [vmem:[#allocation20 + $0x248] sm:$0xff]  ;;  %v1826_v6 = vld [vmem:[#allocation20 + $0x878] sm:$0xff] }
 0x5a4   :  { %1997 = vmatpush.msra.mxu2 %v1813_v8  ;;  %2017 = vmatpush.msra.mxu3 %v1909_v9  ;;  %v1724_v5 = vld [vmem:[#allocation20 + $0x548] sm:$0xff]  ;;  %v1922_v7 = vld [vmem:[#allocation20 + $0xb78] sm:$0xff] }
 0x5a5   :  { %1958 = vmatpush.msra.mxu0 %v1615_v10  ;;  %1978 = vmatpush.msra.mxu1 %v1711_v11  ;;  %v1622_v8 = vld [vmem:[#allocation20 + $0x218] sm:$0xff]  ;;  %v1820_v10 = vld [vmem:[#allocation20 + $0x848] sm:$0xff] }
 0x5a6   :  { %1998 = vmatpush.msra.mxu2 %v1807_v12  ;;  %2018 = vmatpush.msra.mxu3 %v1903_v13  ;;  %v1718_v9 = vld [vmem:[#allocation20 + $0x518] sm:$0xff]  ;;  %v1916_v11 = vld [vmem:[#allocation20 + $0xb48] sm:$0xff] }
 0x5a7   :  { %1959 = vmatpush.msra.mxu0 %v1609_v14  ;;  %1979 = vmatpush.msra.mxu1 %v1705_v15  ;;  %v1616_v12 = vld [vmem:[#allocation20 + $0x1e8] sm:$0xff]  ;;  %v1814_v14 = vld [vmem:[#allocation20 + $0x818] sm:$0xff] }
 0x5a8   :  { %1999 = vmatpush.msra.mxu2 %v1801_v20  ;;  %2019 = vmatpush.msra.mxu3 %v1897_v21  ;;  %v1712_v13 = vld [vmem:[#allocation20 + $0x4e8] sm:$0xff]  ;;  %v1910_v15 = vld [vmem:[#allocation20 + $0xb18] sm:$0xff] }
 0x5a9   :  { %1960 = vmatpush.msra.mxu0 %v1603_v23  ;;  %1980 = vmatpush.msra.mxu1 %v1699_v24  ;;  %v1610_v20 = vld [vmem:[#allocation20 + $0x1b8] sm:$0xff]  ;;  %v1604_v23 = vld [vmem:[#allocation20 + $0x188] sm:$0xff] }
 0x5aa   :  { %2000 = vmatpush.msra.mxu2 %v1795_v25  ;;  %2020 = vmatpush.msra.mxu3 %v1891_v28  ;;  %v1706_v21 = vld [vmem:[#allocation20 + $0x4b8] sm:$0xff]  ;;  %v1700_v24 = vld [vmem:[#allocation20 + $0x488] sm:$0xff] }
 0x5ab   :  { %1961 = vmatpush.msra.mxu0 %v1597_v29  ;;  %1981 = vmatpush.msra.mxu1 %v1693_v31  ;;  %v1598_v25 = vld [vmem:[#allocation20 + $0x158] sm:$0xff]  ;;  %v1808_v29 = vld [vmem:[#allocation20 + $0x7e8] sm:$0xff] }
 0x5ac   :  { %2001 = vmatpush.msra.mxu2 %v1789_v32  ;;  %2021 = vmatpush.msra.mxu3 %v1885_v35  ;;  %v1694_v28 = vld [vmem:[#allocation20 + $0x458] sm:$0xff]  ;;  %v1904_v31 = vld [vmem:[#allocation20 + $0xae8] sm:$0xff] }
 0x5ad   :  { %1962 = vmatpush.msra.mxu0 %v1591_v38  ;;  %1982 = vmatpush.msra.mxu1 %v1687_v39  ;;  %v1592_v32 = vld [vmem:[#allocation20 + $0x128] sm:$0xff]  ;;  %v1802_v38 = vld [vmem:[#allocation20 + $0x7b8] sm:$0xff] }
 0x5ae   :  { %2002 = vmatpush.msra.mxu2 %v1783_v40  ;;  %2022 = vmatpush.msra.mxu3 %v1879_v41  ;;  %v1688_v35 = vld [vmem:[#allocation20 + $0x428] sm:$0xff]  ;;  %v1898_v39 = vld [vmem:[#allocation20 + $0xab8] sm:$0xff] }
 0x5af   :  { %1963 = vmatpush.msra.mxu0 %v1585_v42  ;;  %1983 = vmatpush.msra.mxu1 %v1681_v43  ;;  %v1586_v40 = vld [vmem:[#allocation20 + $0xf8] sm:$0xff]  ;;  %v1796_v42 = vld [vmem:[#allocation20 + $0x788] sm:$0xff] }
 0x5b0   :  { %2003 = vmatpush.msra.mxu2 %v1777_v26  ;;  %2023 = vmatpush.msra.mxu3 %v1873_v33  ;;  %v1682_v41 = vld [vmem:[#allocation20 + $0x3f8] sm:$0xff]  ;;  %v1892_v43 = vld [vmem:[#allocation20 + $0xa88] sm:$0xff] }
 0x5b1   :  { %1964 = vmatpush.msra.mxu0 %v1579_v36  ;;  %1984 = vmatpush.msra.mxu1 %v1675_v37  ;;  %v1580_v26 = vld [vmem:[#allocation20 + $0xc8] sm:$0xff]  ;;  %v1790_v36 = vld [vmem:[#allocation20 + $0x758] sm:$0xff] }
 0x5b2   :  { %2004 = vmatpush.msra.mxu2 %v1771_v30  ;;  %2024 = vmatpush.msra.mxu3 %v1867_v34  ;;  %v1676_v33 = vld [vmem:[#allocation20 + $0x3c8] sm:$0xff]  ;;  %v1886_v37 = vld [vmem:[#allocation20 + $0xa58] sm:$0xff] }
 0x5b3   :  { %1965 = vmatpush.msra.mxu0 %v1573_v44  ;;  %1985 = vmatpush.msra.mxu1 %v1669_v45  ;;  %v1574_v30 = vld [vmem:[#allocation20 + $0x98] sm:$0xff]  ;;  %v1784_v44 = vld [vmem:[#allocation20 + $0x728] sm:$0xff] }
 0x5b4   :  { %2005 = vmatpush.msra.mxu2 %v1765_v18  ;;  %2025 = vmatpush.msra.mxu3 %v1861_v17  ;;  %v1670_v34 = vld [vmem:[#allocation20 + $0x398] sm:$0xff]  ;;  %v1880_v45 = vld [vmem:[#allocation20 + $0xa28] sm:$0xff] }
 0x5b5   :  { %1966 = vmatpush.msra.mxu0 %v1567_v0  ;;  %1986 = vmatpush.msra.mxu1 %v1663_v1  ;;  %v1568_v18 = vld [vmem:[#allocation20 + $0x68] sm:$0xff]  ;;  %v1778_v0 = vld [vmem:[#allocation20 + $0x6f8] sm:$0xff] }
 0x5b6   :  { %2006 = vmatpush.msra.mxu2 %v1759_v46  ;;  %2026 = vmatpush.msra.mxu3 %v1855_v47  ;;  %v1664_v17 = vld [vmem:[#allocation20 + $0x368] sm:$0xff]  ;;  %v1874_v1 = vld [vmem:[#allocation20 + $0x9f8] sm:$0xff] }
 0x5b7   :  { %1967 = vmatpush.msra.mxu0 %v1561_v48  ;;  %1987 = vmatpush.msra.mxu1 %v1657_v49  ;;  %v1562_v46 = vld [vmem:[#allocation20 + $0x38] sm:$0xff]  ;;  %v1772_v48 = vld [vmem:[#allocation20 + $0x6c8] sm:$0xff] }
 0x5b8   :  { %2007 = vmatpush.msra.mxu2 %v1753_v50  ;;  %2027 = vmatpush.msra.mxu3 %v1849_v51  ;;  %v1658_v47 = vld [vmem:[#allocation20 + $0x338] sm:$0xff]  ;;  %v1868_v49 = vld [vmem:[#allocation20 + $0x9c8] sm:$0xff] }
 0x5b9   :  { %1968 = vmatpush.msra.mxu0 %v1555_v52  ;;  %1988 = vmatpush.msra.mxu1 %v1651_v53  ;;  %v1556_v50 = vld [vmem:[#allocation20 + $0x8] sm:$0xff]  ;;  %v1766_v52 = vld [vmem:[#allocation20 + $0x698] sm:$0xff] }
 0x5ba   :  { %2008 = vmatpush.msra.mxu2 %v1747_v56  ;;  %2028 = vmatpush.msra.mxu3 %v1843_v57  ;;  %v1652_v51 = vld [vmem:[#allocation20 + $0x308] sm:$0xff]  ;;  %v1862_v53 = vld [vmem:[#allocation20 + $0x998] sm:$0xff] }
 0x5bb   :  { %2033 = vmatpush.msrb.mxu0 %v1646_v54  ;;  %2053 = vmatpush.msrb.mxu1 %v1742_v55  ;;  %v1760_v54 = vld [vmem:[#allocation20 + $0x668] sm:$0xff]  ;;  %v1754_v56 = vld [vmem:[#allocation20 + $0x638] sm:$0xff] }
 0x5bc   :  { %2073 = vmatpush.msrb.mxu2 %v1838_v60  ;;  %2093 = vmatpush.msrb.mxu3 %v1934_v61  ;;  %v1856_v55 = vld [vmem:[#allocation20 + $0x968] sm:$0xff]  ;;  %v1850_v57 = vld [vmem:[#allocation20 + $0x938] sm:$0xff] }
 0x5bd   :  { %2034 = vmatpush.msrb.mxu0 %v1640_v58  ;;  %2054 = vmatpush.msrb.mxu1 %v1736_v59  ;;  %v1748_v58 = vld [vmem:[#allocation20 + $0x608] sm:$0xff] }
 0x5be   :  { %2074 = vmatpush.msrb.mxu2 %v1832_v2  ;;  %2094 = vmatpush.msrb.mxu3 %v1928_v3  ;;  %v1844_v59 = vld [vmem:[#allocation20 + $0x908] sm:$0xff] }
 0x5bf   :  { %2035 = vmatpush.msrb.mxu0 %v1634_v62  ;;  %2055 = vmatpush.msrb.mxu1 %v1730_v63 }
 0x5c0   :  { %2075 = vmatpush.msrb.mxu2 %v1826_v6  ;;  %2095 = vmatpush.msrb.mxu3 %v1922_v7 }
 0x5c1   :  { %2036 = vmatpush.msrb.mxu0 %v1628_v4  ;;  %2056 = vmatpush.msrb.mxu1 %v1724_v5 }
 0x5c2   :  { %2076 = vmatpush.msrb.mxu2 %v1820_v10  ;;  %2096 = vmatpush.msrb.mxu3 %v1916_v11 }
 0x5c3   :  { %2037 = vmatpush.msrb.mxu0 %v1622_v8  ;;  %2057 = vmatpush.msrb.mxu1 %v1718_v9 }
 0x5c4   :  { %2077 = vmatpush.msrb.mxu2 %v1814_v14  ;;  %2097 = vmatpush.msrb.mxu3 %v1910_v15 }
 0x5c5   :  { %2038 = vmatpush.msrb.mxu0 %v1616_v12  ;;  %2058 = vmatpush.msrb.mxu1 %v1712_v13 }
 0x5c6   :  { %2078 = vmatpush.msrb.mxu2 %v1808_v29  ;;  %2098 = vmatpush.msrb.mxu3 %v1904_v31 }
 0x5c7   :  { %2039 = vmatpush.msrb.mxu0 %v1610_v20  ;;  %2059 = vmatpush.msrb.mxu1 %v1706_v21  ;;  %v1647_v20 = vld [vmem:[#allocation20 + $0x2e0] sm:$0xff] }
 0x5c8   :  { %2079 = vmatpush.msrb.mxu2 %v1802_v38  ;;  %2099 = vmatpush.msrb.mxu3 %v1898_v39  ;;  %v1743_v21 = vld [vmem:[#allocation20 + $0x5e0] sm:$0xff] }
 0x5c9   :  { %2040 = vmatpush.msrb.mxu0 %v1604_v23  ;;  %2060 = vmatpush.msrb.mxu1 %v1700_v24 }
 0x5ca   :  { %2080 = vmatpush.msrb.mxu2 %v1796_v42  ;;  %2100 = vmatpush.msrb.mxu3 %v1892_v43  ;;  %v1629_v42 = vld [vmem:[#allocation20 + $0x250] sm:$0xff]  ;;  %v1839_v43 = vld [vmem:[#allocation20 + $0x8e0] sm:$0xff] }
 0x5cb   :  { %2041 = vmatpush.msrb.mxu0 %v1598_v25  ;;  %2061 = vmatpush.msrb.mxu1 %v1694_v28 }
 0x5cc   :  { %2081 = vmatpush.msrb.mxu2 %v1790_v36  ;;  %2101 = vmatpush.msrb.mxu3 %v1886_v37  ;;  %v1833_v36 = vld [vmem:[#allocation20 + $0x8b0] sm:$0xff] }
 0x5cd   :  { %2042 = vmatpush.msrb.mxu0 %v1592_v32  ;;  %2062 = vmatpush.msrb.mxu1 %v1688_v35  ;;  %v1635_v32 = vld [vmem:[#allocation20 + $0x280] sm:$0xff]  ;;  %v1929_v37 = vld [vmem:[#allocation20 + $0xbb0] sm:$0xff] }
 0x5ce   :  { %2082 = vmatpush.msrb.mxu2 %v1784_v44  ;;  %2102 = vmatpush.msrb.mxu3 %v1880_v45  ;;  %v1731_v35 = vld [vmem:[#allocation20 + $0x580] sm:$0xff] }
 0x5cf   :  { %2043 = vmatpush.msrb.mxu0 %v1586_v40  ;;  %2063 = vmatpush.msrb.mxu1 %v1682_v41  ;;  %v1827_v44 = vld [vmem:[#allocation20 + $0x880] sm:$0xff] }
 0x5d0   :  { %2083 = vmatpush.msrb.mxu2 %v1778_v0  ;;  %2103 = vmatpush.msrb.mxu3 %v1874_v1  ;;  %v1923_v45 = vld [vmem:[#allocation20 + $0xb80] sm:$0xff]  ;;  %v1821_v0 = vld [vmem:[#allocation20 + $0x850] sm:$0xff] }
 0x5d1   :  { %2044 = vmatpush.msrb.mxu0 %v1580_v26  ;;  %2064 = vmatpush.msrb.mxu1 %v1676_v33  ;;  %v1623_v26 = vld [vmem:[#allocation20 + $0x220] sm:$0xff]  ;;  %v1917_v1 = vld [vmem:[#allocation20 + $0xb50] sm:$0xff] }
 0x5d2   :  { %2084 = vmatpush.msrb.mxu2 %v1772_v48  ;;  %2104 = vmatpush.msrb.mxu3 %v1868_v49  ;;  %v1719_v33 = vld [vmem:[#allocation20 + $0x520] sm:$0xff] }
 0x5d3   :  { %2045 = vmatpush.msrb.mxu0 %v1574_v30  ;;  %2065 = vmatpush.msrb.mxu1 %v1670_v34  ;;  %v1617_v30 = vld [vmem:[#allocation20 + $0x1f0] sm:$0xff]  ;;  %v1815_v48 = vld [vmem:[#allocation20 + $0x820] sm:$0xff] }
 0x5d4   :  { %2085 = vmatpush.msrb.mxu2 %v1766_v52  ;;  %2105 = vmatpush.msrb.mxu3 %v1862_v53  ;;  %v1713_v34 = vld [vmem:[#allocation20 + $0x4f0] sm:$0xff]  ;;  %v1911_v49 = vld [vmem:[#allocation20 + $0xb20] sm:$0xff] }
 0x5d5   :  { %2046 = vmatpush.msrb.mxu0 %v1568_v18  ;;  %2066 = vmatpush.msrb.mxu1 %v1664_v17  ;;  %v1611_v18 = vld [vmem:[#allocation20 + $0x1c0] sm:$0xff]  ;;  %v1809_v52 = vld [vmem:[#allocation20 + $0x7f0] sm:$0xff] }
 0x5d6   :  { %2086 = vmatpush.msrb.mxu2 %v1760_v54  ;;  %2106 = vmatpush.msrb.mxu3 %v1856_v55  ;;  %v1707_v17 = vld [vmem:[#allocation20 + $0x4c0] sm:$0xff]  ;;  %v1905_v53 = vld [vmem:[#allocation20 + $0xaf0] sm:$0xff] }
 0x5d7   :  { %2047 = vmatpush.msrb.mxu0 %v1562_v46  ;;  %2067 = vmatpush.msrb.mxu1 %v1658_v47  ;;  %v1605_v46 = vld [vmem:[#allocation20 + $0x190] sm:$0xff] }
 0x5d8   :  { %2087 = vmatpush.msrb.mxu2 %v1754_v56  ;;  %2107 = vmatpush.msrb.mxu3 %v1850_v57  ;;  %v1701_v47 = vld [vmem:[#allocation20 + $0x490] sm:$0xff]  ;;  %v1803_v56 = vld [vmem:[#allocation20 + $0x7c0] sm:$0xff] }
 0x5d9   :  { %2048 = vmatpush.msrb.mxu0 %v1556_v50  ;;  %2068 = vmatpush.msrb.mxu1 %v1652_v51  ;;  %v1599_v50 = vld [vmem:[#allocation20 + $0x160] sm:$0xff]  ;;  %v1593_v54 = vld [vmem:[#allocation20 + $0x130] sm:$0xff] }
 0x5da   :  { %2088 = vmatpush.msrb.mxu2 %v1748_v58  ;;  %2108 = vmatpush.msrb.mxu3 %v1844_v59  ;;  %v1695_v51 = vld [vmem:[#allocation20 + $0x460] sm:$0xff]  ;;  %v1689_v55 = vld [vmem:[#allocation20 + $0x430] sm:$0xff] }
 0x5db   :  { %v1899_v57 = vld [vmem:[#allocation20 + $0xac0] sm:$0xff] }
 0x5dc   :  { %v1587_v58 = vld [vmem:[#allocation20 + $0x100] sm:$0xff] }
 0x5dd   :  { %v1683_v59 = vld [vmem:[#allocation20 + $0x400] sm:$0xff] }
 0x614   :  { %v1388_v60 = vpop.f32.mrf.mxu0  ;;  %v1408_v61 = vpop.f32.mrf.mxu1 }
 0x615   :  { %v1535_v62 = vperm.slane %v1388_v60, 0  ;;  %v1536_v63 = vperm.slane %v1408_v61, 0  ;;  %v1797_v60 = vld [vmem:[#allocation20 + $0x790] sm:$0xff] }
 0x616   :  { %v1893_v61 = vld [vmem:[#allocation20 + $0xa90] sm:$0xff] }
 0x617   :  { %v1539_v6 = vmul.f32 %v1535_v62, %v5594_v16  ;;  %v1540_v7 = vmul.f32 %v1536_v63, %v5597_v19  ;;  %v1641_v16 = vld [vmem:[#allocation20 + $0x2b0] sm:$0xff] }
 0x618   :  { %v1737_v19 = vld [vmem:[#allocation20 + $0x5b0] sm:$0xff] }
 0x619   :  { %v1581_v62 = vld [vmem:[#allocation20 + $0xd0] sm:$0xff] }
 0x61a   :  { %v1677_v63 = vld [vmem:[#allocation20 + $0x3d0] sm:$0xff] }
 0x61b   :  { %v1428_v2 = vpop.f32.mrf.mxu2  ;;  %v1448_v3 = vpop.f32.mrf.mxu3 }
 0x61c   :  { %v1472_v4 = vpop.f32.mrf.mxu0  ;;  %v1492_v5 = vpop.f32.mrf.mxu1  ;;  %v1537_v12 = vperm.slane %v1428_v2, 0  ;;  %v1538_v13 = vperm.slane %v1448_v3, 0  ;;  %v1791_v2 = vld [vmem:[#allocation20 + $0x760] sm:$0xff] }
 0x61d   :  { %v1543_v8 = vperm.slane %v1472_v4, 0  ;;  %v1544_v9 = vperm.slane %v1492_v5, 0  ;;  %v1887_v3 = vld [vmem:[#allocation20 + $0xa60] sm:$0xff] }
 0x61e   :  { %v1541_v25 = vmul.f32 %v1537_v12, %v5606_v22  ;;  %v1542_v28 = vmul.f32 %v1538_v13, %v5609_v27  ;;  %v1725_v22 = vld [vmem:[#allocation20 + $0x550] sm:$0xff]  ;;  %v1935_v27 = vld [vmem:[#allocation20 + $0xbe0] sm:$0xff] }
 0x61f   :  { %v1547_v10 = vadd.f32 %v1543_v8, %v1539_v6  ;;  %v1548_v11 = vadd.f32 %v1544_v9, %v1540_v7  ;;  %v1575_v4 = vld [vmem:[#allocation20 + $0xa0] sm:$0xff]  ;;  %v1785_v6 = vld [vmem:[#allocation20 + $0x730] sm:$0xff] }
 0x620   :  { %v1671_v5 = vld [vmem:[#allocation20 + $0x3a0] sm:$0xff]  ;;  %v1881_v7 = vld [vmem:[#allocation20 + $0xa30] sm:$0xff] }
 0x621   :  { %v5628_v14 = vmax.f32 %v1547_v10, 0.0  ;;  %v5630_v15 = vmax.f32 %v1548_v11, 0.0  ;;  %v1569_v8 = vld [vmem:[#allocation20 + $0x70] sm:$0xff]  ;;  %v1779_v10 = vld [vmem:[#allocation20 + $0x700] sm:$0xff] }
 0x622   :  { %v1665_v9 = vld [vmem:[#allocation20 + $0x370] sm:$0xff]  ;;  %v1875_v11 = vld [vmem:[#allocation20 + $0xa00] sm:$0xff] }
 0x623   :  { %v1512_v23 = vpop.f32.mrf.mxu2  ;;  %v1532_v24 = vpop.f32.mrf.mxu3  ;;  %1969 = vmatmul.f32.vlgmr.msra.gmra.mxu0 %v5628_v14  ;;  %1989 = vmatmul.f32.vlgmr.msra.gmra.mxu1 %v5630_v15  ;;  %v1563_v12 = vld [vmem:[#allocation20 + $0x40] sm:$0xff] }
 0x624   :  { %v1545_v29 = vperm.slane %v1512_v23, 0  ;;  %v1546_v31 = vperm.slane %v1532_v24, 0  ;;  %2113 = vmatpush.msra.mxu0 %v1647_v20  ;;  %2133 = vmatpush.msra.mxu1 %v1743_v21  ;;  %v1659_v13 = vld [vmem:[#allocation20 + $0x340] sm:$0xff]  ;;  %v1773_v20 = vld [vmem:[#allocation20 + $0x6d0] sm:$0xff] }
 0x625   :  { %v1869_v21 = vld [vmem:[#allocation20 + $0x9d0] sm:$0xff] }
 0x626   :  { %v1549_v38 = vadd.f32 %v1545_v29, %v1541_v25  ;;  %v1550_v39 = vadd.f32 %v1546_v31, %v1542_v28  ;;  %2114 = vmatpush.msra.mxu0 %v1641_v16  ;;  %2134 = vmatpush.msra.mxu1 %v1737_v19  ;;  %v1557_v23 = vld [vmem:[#allocation20 + $0x10] sm:$0xff]  ;;  %v1767_v16 = vld [vmem:[#allocation20 + $0x6a0] sm:$0xff]  ;;  %v1648_v25 = vld [vmem:[#allocation20 + $0x2e8] sm:$0xff] }
 0x627   :  { %v1653_v24 = vld [vmem:[#allocation20 + $0x310] sm:$0xff]  ;;  %v1863_v19 = vld [vmem:[#allocation20 + $0x9a0] sm:$0xff]  ;;  %v1744_v28 = vld [vmem:[#allocation20 + $0x5e8] sm:$0xff] }
 0x628   :  { %v5636_v40 = vmax.f32 %v1549_v38, 0.0  ;;  %v5638_v41 = vmax.f32 %v1550_v39, 0.0  ;;  %2115 = vmatpush.msra.mxu0 %v1635_v32  ;;  %2135 = vmatpush.msra.mxu1 %v1731_v35  ;;  %v1761_v29 = vld [vmem:[#allocation20 + $0x670] sm:$0xff]  ;;  %v1642_v32 = vld [vmem:[#allocation20 + $0x2b8] sm:$0xff]  ;;  %v1755_v38 = vld [vmem:[#allocation20 + $0x640] sm:$0xff] }
 0x629   :  { %v1857_v31 = vld [vmem:[#allocation20 + $0x970] sm:$0xff]  ;;  %v1738_v35 = vld [vmem:[#allocation20 + $0x5b8] sm:$0xff]  ;;  %v1851_v39 = vld [vmem:[#allocation20 + $0x940] sm:$0xff] }
 0x62a   :  { %2009 = vmatmul.f32.vlgmr.msra.gmra.mxu2 %v5636_v40  ;;  %2029 = vmatmul.f32.vlgmr.msra.gmra.mxu3 %v5638_v41 }
 0x62b   :  { %2116 = vmatpush.msra.mxu0 %v1629_v42  ;;  %2136 = vmatpush.msra.mxu1 %v1725_v22  ;;  %v1636_v42 = vld [vmem:[#allocation20 + $0x288] sm:$0xff] }
 0x62c   :  { %2153 = vmatpush.msra.mxu2 %v1839_v43  ;;  %2173 = vmatpush.msra.mxu3 %v1935_v27  ;;  %v1732_v22 = vld [vmem:[#allocation20 + $0x588] sm:$0xff]  ;;  %v1749_v43 = vld [vmem:[#allocation20 + $0x610] sm:$0xff] }
 0x62d   :  { %2049 = vmatmul.f32.vlgmr.msrb.gmra.mxu0 %v5628_v14  ;;  %2069 = vmatmul.f32.vlgmr.msrb.gmra.mxu1 %v5630_v15  ;;  %v1845_v27 = vld [vmem:[#allocation20 + $0x910] sm:$0xff] }
 0x62e   :  { %2117 = vmatpush.msra.mxu0 %v1623_v26  ;;  %2137 = vmatpush.msra.mxu1 %v1719_v33  ;;  %v1630_v26 = vld [vmem:[#allocation20 + $0x258] sm:$0xff] }
 0x62f   :  { %2154 = vmatpush.msra.mxu2 %v1833_v36  ;;  %2174 = vmatpush.msra.mxu3 %v1929_v37  ;;  %v1726_v33 = vld [vmem:[#allocation20 + $0x558] sm:$0xff]  ;;  %v1840_v36 = vld [vmem:[#allocation20 + $0x8e8] sm:$0xff] }
 0x630   :  { %2118 = vmatpush.msra.mxu0 %v1617_v30  ;;  %2138 = vmatpush.msra.mxu1 %v1713_v34  ;;  %v1936_v37 = vld [vmem:[#allocation20 + $0xbe8] sm:$0xff] }
 0x631   :  { %2155 = vmatpush.msra.mxu2 %v1827_v44  ;;  %2175 = vmatpush.msra.mxu3 %v1923_v45  ;;  %v1624_v30 = vld [vmem:[#allocation20 + $0x228] sm:$0xff]  ;;  %v1834_v44 = vld [vmem:[#allocation20 + $0x8b8] sm:$0xff] }
 0x632   :  { %2119 = vmatpush.msra.mxu0 %v1611_v18  ;;  %2139 = vmatpush.msra.mxu1 %v1707_v17  ;;  %v1720_v34 = vld [vmem:[#allocation20 + $0x528] sm:$0xff]  ;;  %v1930_v45 = vld [vmem:[#allocation20 + $0xbb8] sm:$0xff] }
 0x633   :  { %2156 = vmatpush.msra.mxu2 %v1821_v0  ;;  %2176 = vmatpush.msra.mxu3 %v1917_v1  ;;  %v1618_v18 = vld [vmem:[#allocation20 + $0x1f8] sm:$0xff]  ;;  %v1828_v0 = vld [vmem:[#allocation20 + $0x888] sm:$0xff] }
 0x634   :  { %2089 = vmatmul.f32.vlgmr.msrb.gmra.mxu2 %v5636_v40  ;;  %2109 = vmatmul.f32.vlgmr.msrb.gmra.mxu3 %v5638_v41  ;;  %v1714_v17 = vld [vmem:[#allocation20 + $0x4f8] sm:$0xff]  ;;  %v1924_v1 = vld [vmem:[#allocation20 + $0xb88] sm:$0xff] }
 0x635   :  { %2120 = vmatpush.msra.mxu0 %v1605_v46  ;;  %2140 = vmatpush.msra.mxu1 %v1701_v47  ;;  %v1612_v46 = vld [vmem:[#allocation20 + $0x1c8] sm:$0xff] }
 0x636   :  { %2157 = vmatpush.msra.mxu2 %v1815_v48  ;;  %2177 = vmatpush.msra.mxu3 %v1911_v49  ;;  %v1708_v47 = vld [vmem:[#allocation20 + $0x4c8] sm:$0xff]  ;;  %v1822_v48 = vld [vmem:[#allocation20 + $0x858] sm:$0xff] }
 0x637   :  { %2121 = vmatpush.msra.mxu0 %v1599_v50  ;;  %2141 = vmatpush.msra.mxu1 %v1695_v51  ;;  %v1918_v49 = vld [vmem:[#allocation20 + $0xb58] sm:$0xff] }
 0x638   :  { %2158 = vmatpush.msra.mxu2 %v1809_v52  ;;  %2178 = vmatpush.msra.mxu3 %v1905_v53  ;;  %v1606_v50 = vld [vmem:[#allocation20 + $0x198] sm:$0xff]  ;;  %v1816_v52 = vld [vmem:[#allocation20 + $0x828] sm:$0xff] }
 0x639   :  { %2122 = vmatpush.msra.mxu0 %v1593_v54  ;;  %2142 = vmatpush.msra.mxu1 %v1689_v55  ;;  %v1702_v51 = vld [vmem:[#allocation20 + $0x498] sm:$0xff]  ;;  %v1912_v53 = vld [vmem:[#allocation20 + $0xb28] sm:$0xff] }
 0x63a   :  { %2159 = vmatpush.msra.mxu2 %v1803_v56  ;;  %2179 = vmatpush.msra.mxu3 %v1899_v57  ;;  %v1600_v54 = vld [vmem:[#allocation20 + $0x168] sm:$0xff]  ;;  %v1810_v56 = vld [vmem:[#allocation20 + $0x7f8] sm:$0xff] }
 0x63b   :  { %2123 = vmatpush.msra.mxu0 %v1587_v58  ;;  %2143 = vmatpush.msra.mxu1 %v1683_v59  ;;  %v1696_v55 = vld [vmem:[#allocation20 + $0x468] sm:$0xff]  ;;  %v1906_v57 = vld [vmem:[#allocation20 + $0xaf8] sm:$0xff] }
 0x63c   :  { %2160 = vmatpush.msra.mxu2 %v1797_v60  ;;  %2180 = vmatpush.msra.mxu3 %v1893_v61  ;;  %v1594_v58 = vld [vmem:[#allocation20 + $0x138] sm:$0xff]  ;;  %v1804_v60 = vld [vmem:[#allocation20 + $0x7c8] sm:$0xff] }
 0x63d   :  { %2124 = vmatpush.msra.mxu0 %v1581_v62  ;;  %2144 = vmatpush.msra.mxu1 %v1677_v63  ;;  %v1690_v59 = vld [vmem:[#allocation20 + $0x438] sm:$0xff]  ;;  %v1900_v61 = vld [vmem:[#allocation20 + $0xac8] sm:$0xff] }
 0x63e   :  { %2161 = vmatpush.msra.mxu2 %v1791_v2  ;;  %2181 = vmatpush.msra.mxu3 %v1887_v3  ;;  %v1588_v62 = vld [vmem:[#allocation20 + $0x108] sm:$0xff]  ;;  %v1798_v2 = vld [vmem:[#allocation20 + $0x798] sm:$0xff] }
 0x63f   :  { %2125 = vmatpush.msra.mxu0 %v1575_v4  ;;  %2145 = vmatpush.msra.mxu1 %v1671_v5  ;;  %v1684_v63 = vld [vmem:[#allocation20 + $0x408] sm:$0xff]  ;;  %v1894_v3 = vld [vmem:[#allocation20 + $0xa98] sm:$0xff] }
 0x640   :  { %2162 = vmatpush.msra.mxu2 %v1785_v6  ;;  %2182 = vmatpush.msra.mxu3 %v1881_v7  ;;  %v1582_v4 = vld [vmem:[#allocation20 + $0xd8] sm:$0xff]  ;;  %v1792_v6 = vld [vmem:[#allocation20 + $0x768] sm:$0xff] }
 0x641   :  { %2126 = vmatpush.msra.mxu0 %v1569_v8  ;;  %2146 = vmatpush.msra.mxu1 %v1665_v9  ;;  %v1678_v5 = vld [vmem:[#allocation20 + $0x3d8] sm:$0xff]  ;;  %v1888_v7 = vld [vmem:[#allocation20 + $0xa68] sm:$0xff] }
 0x642   :  { %2163 = vmatpush.msra.mxu2 %v1779_v10  ;;  %2183 = vmatpush.msra.mxu3 %v1875_v11  ;;  %v1576_v8 = vld [vmem:[#allocation20 + $0xa8] sm:$0xff]  ;;  %v1786_v10 = vld [vmem:[#allocation20 + $0x738] sm:$0xff] }
 0x643   :  { %2127 = vmatpush.msra.mxu0 %v1563_v12  ;;  %2147 = vmatpush.msra.mxu1 %v1659_v13  ;;  %v1672_v9 = vld [vmem:[#allocation20 + $0x3a8] sm:$0xff]  ;;  %v1882_v11 = vld [vmem:[#allocation20 + $0xa38] sm:$0xff] }
 0x644   :  { %2164 = vmatpush.msra.mxu2 %v1773_v20  ;;  %2184 = vmatpush.msra.mxu3 %v1869_v21  ;;  %v1570_v12 = vld [vmem:[#allocation20 + $0x78] sm:$0xff]  ;;  %v1780_v20 = vld [vmem:[#allocation20 + $0x708] sm:$0xff] }
 0x645   :  { %2128 = vmatpush.msra.mxu0 %v1557_v23  ;;  %2148 = vmatpush.msra.mxu1 %v1653_v24  ;;  %v1666_v13 = vld [vmem:[#allocation20 + $0x378] sm:$0xff]  ;;  %v1876_v21 = vld [vmem:[#allocation20 + $0xa08] sm:$0xff] }
 0x646   :  { %2165 = vmatpush.msra.mxu2 %v1767_v16  ;;  %2185 = vmatpush.msra.mxu3 %v1863_v19  ;;  %v1564_v23 = vld [vmem:[#allocation20 + $0x48] sm:$0xff]  ;;  %v1774_v16 = vld [vmem:[#allocation20 + $0x6d8] sm:$0xff] }
 0x647   :  { %2129 = vmatmul.f32.vlgmr.msra.gmra.mxu0 %v5628_v14  ;;  %2149 = vmatmul.f32.vlgmr.msra.gmra.mxu1 %v5630_v15  ;;  %v1660_v24 = vld [vmem:[#allocation20 + $0x348] sm:$0xff]  ;;  %v1870_v19 = vld [vmem:[#allocation20 + $0x9d8] sm:$0xff] }
 0x648   :  { %2193 = vmatpush.msrb.mxu0 %v1648_v25  ;;  %2213 = vmatpush.msrb.mxu1 %v1744_v28  ;;  %v1558_v25 = vld [vmem:[#allocation20 + $0x18] sm:$0xff] }
 0x649   :  { %2166 = vmatpush.msra.mxu2 %v1761_v29  ;;  %2186 = vmatpush.msra.mxu3 %v1857_v31  ;;  %v1654_v28 = vld [vmem:[#allocation20 + $0x318] sm:$0xff]  ;;  %v1768_v29 = vld [vmem:[#allocation20 + $0x6a8] sm:$0xff] }
 0x64a   :  { %2194 = vmatpush.msrb.mxu0 %v1642_v32  ;;  %2214 = vmatpush.msrb.mxu1 %v1738_v35  ;;  %v1864_v31 = vld [vmem:[#allocation20 + $0x9a8] sm:$0xff]  ;;  %v1649_v32 = vld [vmem:[#allocation20 + $0x2f0] sm:$0xff] }
 0x64b   :  { %2167 = vmatpush.msra.mxu2 %v1755_v38  ;;  %2187 = vmatpush.msra.mxu3 %v1851_v39  ;;  %v1745_v35 = vld [vmem:[#allocation20 + $0x5f0] sm:$0xff]  ;;  %v1762_v38 = vld [vmem:[#allocation20 + $0x678] sm:$0xff] }
 0x64c   :  { %2195 = vmatpush.msrb.mxu0 %v1636_v42  ;;  %2215 = vmatpush.msrb.mxu1 %v1732_v22  ;;  %v1858_v39 = vld [vmem:[#allocation20 + $0x978] sm:$0xff]  ;;  %v1643_v42 = vld [vmem:[#allocation20 + $0x2c0] sm:$0xff] }
 0x64d   :  { %2168 = vmatpush.msra.mxu2 %v1749_v43  ;;  %2188 = vmatpush.msra.mxu3 %v1845_v27  ;;  %v1739_v22 = vld [vmem:[#allocation20 + $0x5c0] sm:$0xff]  ;;  %v1756_v43 = vld [vmem:[#allocation20 + $0x648] sm:$0xff] }
 0x64e   :  { %2169 = vmatmul.f32.vlgmr.msra.gmra.mxu2 %v5636_v40  ;;  %2189 = vmatmul.f32.vlgmr.msra.gmra.mxu3 %v5638_v41  ;;  %v1852_v27 = vld [vmem:[#allocation20 + $0x948] sm:$0xff] }
 0x64f   :  { %2196 = vmatpush.msrb.mxu0 %v1630_v26  ;;  %2216 = vmatpush.msrb.mxu1 %v1726_v33  ;;  %v1637_v26 = vld [vmem:[#allocation20 + $0x290] sm:$0xff] }
 0x650   :  { %2233 = vmatpush.msrb.mxu2 %v1840_v36  ;;  %2253 = vmatpush.msrb.mxu3 %v1936_v37  ;;  %v1733_v33 = vld [vmem:[#allocation20 + $0x590] sm:$0xff]  ;;  %v1750_v36 = vld [vmem:[#allocation20 + $0x618] sm:$0xff] }
 0x651   :  { %2197 = vmatpush.msrb.mxu0 %v1624_v30  ;;  %2217 = vmatpush.msrb.mxu1 %v1720_v34  ;;  %v1846_v37 = vld [vmem:[#allocation20 + $0x918] sm:$0xff]  ;;  %v1631_v30 = vld [vmem:[#allocation20 + $0x260] sm:$0xff] }
 0x652   :  { %2234 = vmatpush.msrb.mxu2 %v1834_v44  ;;  %2254 = vmatpush.msrb.mxu3 %v1930_v45  ;;  %v1727_v34 = vld [vmem:[#allocation20 + $0x560] sm:$0xff]  ;;  %v1841_v44 = vld [vmem:[#allocation20 + $0x8f0] sm:$0xff] }
 0x653   :  { %2198 = vmatpush.msrb.mxu0 %v1618_v18  ;;  %2218 = vmatpush.msrb.mxu1 %v1714_v17  ;;  %v1937_v45 = vld [vmem:[#allocation20 + $0xbf0] sm:$0xff] }
 0x654   :  { %2235 = vmatpush.msrb.mxu2 %v1828_v0  ;;  %2255 = vmatpush.msrb.mxu3 %v1924_v1  ;;  %v1625_v18 = vld [vmem:[#allocation20 + $0x230] sm:$0xff]  ;;  %v1835_v0 = vld [vmem:[#allocation20 + $0x8c0] sm:$0xff] }
 0x655   :  { %2199 = vmatpush.msrb.mxu0 %v1612_v46  ;;  %2219 = vmatpush.msrb.mxu1 %v1708_v47  ;;  %v1721_v17 = vld [vmem:[#allocation20 + $0x530] sm:$0xff]  ;;  %v1931_v1 = vld [vmem:[#allocation20 + $0xbc0] sm:$0xff] }
 0x656   :  { %2236 = vmatpush.msrb.mxu2 %v1822_v48  ;;  %2256 = vmatpush.msrb.mxu3 %v1918_v49  ;;  %v1619_v46 = vld [vmem:[#allocation20 + $0x200] sm:$0xff]  ;;  %v1829_v48 = vld [vmem:[#allocation20 + $0x890] sm:$0xff] }
 0x657   :  { %2200 = vmatpush.msrb.mxu0 %v1606_v50  ;;  %2220 = vmatpush.msrb.mxu1 %v1702_v51  ;;  %v1715_v47 = vld [vmem:[#allocation20 + $0x500] sm:$0xff]  ;;  %v1925_v49 = vld [vmem:[#allocation20 + $0xb90] sm:$0xff] }
 0x658   :  { %2237 = vmatpush.msrb.mxu2 %v1816_v52  ;;  %2257 = vmatpush.msrb.mxu3 %v1912_v53  ;;  %v1613_v50 = vld [vmem:[#allocation20 + $0x1d0] sm:$0xff]  ;;  %v1823_v52 = vld [vmem:[#allocation20 + $0x860] sm:$0xff] }
 0x659   :  { %2201 = vmatpush.msrb.mxu0 %v1600_v54  ;;  %2221 = vmatpush.msrb.mxu1 %v1696_v55  ;;  %v1709_v51 = vld [vmem:[#allocation20 + $0x4d0] sm:$0xff]  ;;  %v1919_v53 = vld [vmem:[#allocation20 + $0xb60] sm:$0xff] }
 0x65a   :  { %2238 = vmatpush.msrb.mxu2 %v1810_v56  ;;  %2258 = vmatpush.msrb.mxu3 %v1906_v57  ;;  %v1607_v54 = vld [vmem:[#allocation20 + $0x1a0] sm:$0xff]  ;;  %v1817_v56 = vld [vmem:[#allocation20 + $0x830] sm:$0xff] }
 0x65b   :  { %2202 = vmatpush.msrb.mxu0 %v1594_v58  ;;  %2222 = vmatpush.msrb.mxu1 %v1690_v59  ;;  %v1703_v55 = vld [vmem:[#allocation20 + $0x4a0] sm:$0xff]  ;;  %v1913_v57 = vld [vmem:[#allocation20 + $0xb30] sm:$0xff] }
 0x65c   :  { %2239 = vmatpush.msrb.mxu2 %v1804_v60  ;;  %2259 = vmatpush.msrb.mxu3 %v1900_v61  ;;  %v1601_v58 = vld [vmem:[#allocation20 + $0x170] sm:$0xff]  ;;  %v1811_v60 = vld [vmem:[#allocation20 + $0x800] sm:$0xff] }
 0x65d   :  { %2203 = vmatpush.msrb.mxu0 %v1588_v62  ;;  %2223 = vmatpush.msrb.mxu1 %v1684_v63  ;;  %v1697_v59 = vld [vmem:[#allocation20 + $0x470] sm:$0xff]  ;;  %v1907_v61 = vld [vmem:[#allocation20 + $0xb00] sm:$0xff] }
 0x65e   :  { %2240 = vmatpush.msrb.mxu2 %v1798_v2  ;;  %2260 = vmatpush.msrb.mxu3 %v1894_v3  ;;  %v1595_v62 = vld [vmem:[#allocation20 + $0x140] sm:$0xff]  ;;  %v1805_v2 = vld [vmem:[#allocation20 + $0x7d0] sm:$0xff] }
 0x65f   :  { %2204 = vmatpush.msrb.mxu0 %v1582_v4  ;;  %2224 = vmatpush.msrb.mxu1 %v1678_v5  ;;  %v1691_v63 = vld [vmem:[#allocation20 + $0x440] sm:$0xff]  ;;  %v1901_v3 = vld [vmem:[#allocation20 + $0xad0] sm:$0xff] }
 0x660   :  { %2241 = vmatpush.msrb.mxu2 %v1792_v6  ;;  %2261 = vmatpush.msrb.mxu3 %v1888_v7  ;;  %v1589_v4 = vld [vmem:[#allocation20 + $0x110] sm:$0xff]  ;;  %v1799_v6 = vld [vmem:[#allocation20 + $0x7a0] sm:$0xff] }
 0x661   :  { %2205 = vmatpush.msrb.mxu0 %v1576_v8  ;;  %2225 = vmatpush.msrb.mxu1 %v1672_v9  ;;  %v1685_v5 = vld [vmem:[#allocation20 + $0x410] sm:$0xff]  ;;  %v1895_v7 = vld [vmem:[#allocation20 + $0xaa0] sm:$0xff] }
 0x662   :  { %2242 = vmatpush.msrb.mxu2 %v1786_v10  ;;  %2262 = vmatpush.msrb.mxu3 %v1882_v11  ;;  %v1583_v8 = vld [vmem:[#allocation20 + $0xe0] sm:$0xff]  ;;  %v1793_v10 = vld [vmem:[#allocation20 + $0x770] sm:$0xff] }
 0x663   :  { %2206 = vmatpush.msrb.mxu0 %v1570_v12  ;;  %2226 = vmatpush.msrb.mxu1 %v1666_v13  ;;  %v1679_v9 = vld [vmem:[#allocation20 + $0x3e0] sm:$0xff]  ;;  %v1889_v11 = vld [vmem:[#allocation20 + $0xa70] sm:$0xff] }
 0x664   :  { %2243 = vmatpush.msrb.mxu2 %v1780_v20  ;;  %2263 = vmatpush.msrb.mxu3 %v1876_v21  ;;  %v1577_v12 = vld [vmem:[#allocation20 + $0xb0] sm:$0xff]  ;;  %v1787_v20 = vld [vmem:[#allocation20 + $0x740] sm:$0xff] }
 0x665   :  { %2207 = vmatpush.msrb.mxu0 %v1564_v23  ;;  %2227 = vmatpush.msrb.mxu1 %v1660_v24  ;;  %v1673_v13 = vld [vmem:[#allocation20 + $0x3b0] sm:$0xff]  ;;  %v1883_v21 = vld [vmem:[#allocation20 + $0xa40] sm:$0xff] }
 0x666   :  { %2244 = vmatpush.msrb.mxu2 %v1774_v16  ;;  %2264 = vmatpush.msrb.mxu3 %v1870_v19  ;;  %v1571_v23 = vld [vmem:[#allocation20 + $0x80] sm:$0xff]  ;;  %v1781_v16 = vld [vmem:[#allocation20 + $0x710] sm:$0xff] }
 0x667   :  { %2208 = vmatpush.msrb.mxu0 %v1558_v25  ;;  %2228 = vmatpush.msrb.mxu1 %v1654_v28  ;;  %v1667_v24 = vld [vmem:[#allocation20 + $0x380] sm:$0xff]  ;;  %v1877_v19 = vld [vmem:[#allocation20 + $0xa10] sm:$0xff] }
 0x668   :  { %2245 = vmatpush.msrb.mxu2 %v1768_v29  ;;  %2265 = vmatpush.msrb.mxu3 %v1864_v31  ;;  %v1565_v25 = vld [vmem:[#allocation20 + $0x50] sm:$0xff]  ;;  %v1775_v29 = vld [vmem:[#allocation20 + $0x6e0] sm:$0xff] }
 0x669   :  { %2209 = vmatmul.f32.vlgmr.msrb.gmra.mxu0 %v5628_v14  ;;  %2229 = vmatmul.f32.vlgmr.msrb.gmra.mxu1 %v5630_v15  ;;  %v1661_v28 = vld [vmem:[#allocation20 + $0x350] sm:$0xff]  ;;  %v1871_v31 = vld [vmem:[#allocation20 + $0x9e0] sm:$0xff] }
 0x66a   :  { %2273 = vmatpush.msra.mxu0 %v1649_v32  ;;  %2293 = vmatpush.msra.mxu1 %v1745_v35  ;;  %v1559_v32 = vld [vmem:[#allocation20 + $0x20] sm:$0xff] }
 0x66b   :  { %2246 = vmatpush.msrb.mxu2 %v1762_v38  ;;  %2266 = vmatpush.msrb.mxu3 %v1858_v39  ;;  %v1655_v35 = vld [vmem:[#allocation20 + $0x320] sm:$0xff]  ;;  %v1769_v38 = vld [vmem:[#allocation20 + $0x6b0] sm:$0xff] }
 0x66c   :  { %2274 = vmatpush.msra.mxu0 %v1643_v42  ;;  %2294 = vmatpush.msra.mxu1 %v1739_v22  ;;  %v1865_v39 = vld [vmem:[#allocation20 + $0x9b0] sm:$0xff]  ;;  %v1650_v42 = vld [vmem:[#allocation20 + $0x2f8] sm:$0xff] }
 0x66d   :  { %2247 = vmatpush.msrb.mxu2 %v1756_v43  ;;  %2267 = vmatpush.msrb.mxu3 %v1852_v27  ;;  %v1746_v22 = vld [vmem:[#allocation20 + $0x5f8] sm:$0xff]  ;;  %v1763_v43 = vld [vmem:[#allocation20 + $0x680] sm:$0xff] }
 0x66e   :  { %2275 = vmatpush.msra.mxu0 %v1637_v26  ;;  %2295 = vmatpush.msra.mxu1 %v1733_v33  ;;  %v1859_v27 = vld [vmem:[#allocation20 + $0x980] sm:$0xff]  ;;  %v1644_v26 = vld [vmem:[#allocation20 + $0x2c8] sm:$0xff] }
 0x66f   :  { %2248 = vmatpush.msrb.mxu2 %v1750_v36  ;;  %2268 = vmatpush.msrb.mxu3 %v1846_v37  ;;  %v1740_v33 = vld [vmem:[#allocation20 + $0x5c8] sm:$0xff]  ;;  %v1757_v36 = vld [vmem:[#allocation20 + $0x650] sm:$0xff] }
 0x670   :  { %2249 = vmatmul.f32.vlgmr.msrb.gmra.mxu2 %v5636_v40  ;;  %2269 = vmatmul.f32.vlgmr.msrb.gmra.mxu3 %v5638_v41  ;;  %v1853_v37 = vld [vmem:[#allocation20 + $0x950] sm:$0xff] }
 0x671   :  { %2276 = vmatpush.msra.mxu0 %v1631_v30  ;;  %2296 = vmatpush.msra.mxu1 %v1727_v34  ;;  %v1638_v30 = vld [vmem:[#allocation20 + $0x298] sm:$0xff] }
 0x672   :  { %2313 = vmatpush.msra.mxu2 %v1841_v44  ;;  %2333 = vmatpush.msra.mxu3 %v1937_v45  ;;  %v1734_v34 = vld [vmem:[#allocation20 + $0x598] sm:$0xff]  ;;  %v1751_v44 = vld [vmem:[#allocation20 + $0x620] sm:$0xff] }
 0x673   :  { %2277 = vmatpush.msra.mxu0 %v1625_v18  ;;  %2297 = vmatpush.msra.mxu1 %v1721_v17  ;;  %v1847_v45 = vld [vmem:[#allocation20 + $0x920] sm:$0xff]  ;;  %v1632_v18 = vld [vmem:[#allocation20 + $0x268] sm:$0xff] }
 0x674   :  { %2314 = vmatpush.msra.mxu2 %v1835_v0  ;;  %2334 = vmatpush.msra.mxu3 %v1931_v1  ;;  %v1728_v17 = vld [vmem:[#allocation20 + $0x568] sm:$0xff]  ;;  %v1842_v0 = vld [vmem:[#allocation20 + $0x8f8] sm:$0xff] }
 0x675   :  { %2278 = vmatpush.msra.mxu0 %v1619_v46  ;;  %2298 = vmatpush.msra.mxu1 %v1715_v47  ;;  %v1938_v1 = vld [vmem:[#allocation20 + $0xbf8] sm:$0xff] }
 0x676   :  { %2315 = vmatpush.msra.mxu2 %v1829_v48  ;;  %2335 = vmatpush.msra.mxu3 %v1925_v49  ;;  %v1626_v46 = vld [vmem:[#allocation20 + $0x238] sm:$0xff]  ;;  %v1836_v48 = vld [vmem:[#allocation20 + $0x8c8] sm:$0xff] }
 0x677   :  { %2279 = vmatpush.msra.mxu0 %v1613_v50  ;;  %2299 = vmatpush.msra.mxu1 %v1709_v51  ;;  %v1722_v47 = vld [vmem:[#allocation20 + $0x538] sm:$0xff]  ;;  %v1932_v49 = vld [vmem:[#allocation20 + $0xbc8] sm:$0xff] }
 0x678   :  { %2316 = vmatpush.msra.mxu2 %v1823_v52  ;;  %2336 = vmatpush.msra.mxu3 %v1919_v53  ;;  %v1620_v50 = vld [vmem:[#allocation20 + $0x208] sm:$0xff]  ;;  %v1830_v52 = vld [vmem:[#allocation20 + $0x898] sm:$0xff] }
 0x679   :  { %2280 = vmatpush.msra.mxu0 %v1607_v54  ;;  %2300 = vmatpush.msra.mxu1 %v1703_v55  ;;  %v1716_v51 = vld [vmem:[#allocation20 + $0x508] sm:$0xff]  ;;  %v1926_v53 = vld [vmem:[#allocation20 + $0xb98] sm:$0xff] }
 0x67a   :  { %2317 = vmatpush.msra.mxu2 %v1817_v56  ;;  %2337 = vmatpush.msra.mxu3 %v1913_v57  ;;  %v1614_v54 = vld [vmem:[#allocation20 + $0x1d8] sm:$0xff]  ;;  %v1824_v56 = vld [vmem:[#allocation20 + $0x868] sm:$0xff] }
 0x67b   :  { %2281 = vmatpush.msra.mxu0 %v1601_v58  ;;  %2301 = vmatpush.msra.mxu1 %v1697_v59  ;;  %v1710_v55 = vld [vmem:[#allocation20 + $0x4d8] sm:$0xff]  ;;  %v1920_v57 = vld [vmem:[#allocation20 + $0xb68] sm:$0xff] }
 0x67c   :  { %2318 = vmatpush.msra.mxu2 %v1811_v60  ;;  %2338 = vmatpush.msra.mxu3 %v1907_v61  ;;  %v1608_v58 = vld [vmem:[#allocation20 + $0x1a8] sm:$0xff]  ;;  %v1818_v60 = vld [vmem:[#allocation20 + $0x838] sm:$0xff] }
 0x67d   :  { %2282 = vmatpush.msra.mxu0 %v1595_v62  ;;  %2302 = vmatpush.msra.mxu1 %v1691_v63  ;;  %v1704_v59 = vld [vmem:[#allocation20 + $0x4a8] sm:$0xff]  ;;  %v1914_v61 = vld [vmem:[#allocation20 + $0xb38] sm:$0xff] }
 0x67e   :  { %2319 = vmatpush.msra.mxu2 %v1805_v2  ;;  %2339 = vmatpush.msra.mxu3 %v1901_v3  ;;  %v1602_v62 = vld [vmem:[#allocation20 + $0x178] sm:$0xff]  ;;  %v1812_v2 = vld [vmem:[#allocation20 + $0x808] sm:$0xff] }
 0x67f   :  { %2283 = vmatpush.msra.mxu0 %v1589_v4  ;;  %2303 = vmatpush.msra.mxu1 %v1685_v5  ;;  %v1698_v63 = vld [vmem:[#allocation20 + $0x478] sm:$0xff]  ;;  %v1908_v3 = vld [vmem:[#allocation20 + $0xb08] sm:$0xff] }
 0x680   :  { %2320 = vmatpush.msra.mxu2 %v1799_v6  ;;  %2340 = vmatpush.msra.mxu3 %v1895_v7  ;;  %v1596_v4 = vld [vmem:[#allocation20 + $0x148] sm:$0xff]  ;;  %v1806_v6 = vld [vmem:[#allocation20 + $0x7d8] sm:$0xff] }
 0x681   :  { %2284 = vmatpush.msra.mxu0 %v1583_v8  ;;  %2304 = vmatpush.msra.mxu1 %v1679_v9  ;;  %v1692_v5 = vld [vmem:[#allocation20 + $0x448] sm:$0xff]  ;;  %v1902_v7 = vld [vmem:[#allocation20 + $0xad8] sm:$0xff] }
 0x682   :  { %2321 = vmatpush.msra.mxu2 %v1793_v10  ;;  %2341 = vmatpush.msra.mxu3 %v1889_v11  ;;  %v1590_v8 = vld [vmem:[#allocation20 + $0x118] sm:$0xff]  ;;  %v1800_v10 = vld [vmem:[#allocation20 + $0x7a8] sm:$0xff] }
 0x683   :  { %2285 = vmatpush.msra.mxu0 %v1577_v12  ;;  %2305 = vmatpush.msra.mxu1 %v1673_v13  ;;  %v1686_v9 = vld [vmem:[#allocation20 + $0x418] sm:$0xff]  ;;  %v1896_v11 = vld [vmem:[#allocation20 + $0xaa8] sm:$0xff] }
 0x684   :  { %2322 = vmatpush.msra.mxu2 %v1787_v20  ;;  %2342 = vmatpush.msra.mxu3 %v1883_v21  ;;  %v1584_v12 = vld [vmem:[#allocation20 + $0xe8] sm:$0xff]  ;;  %v1794_v20 = vld [vmem:[#allocation20 + $0x778] sm:$0xff] }
 0x685   :  { %2286 = vmatpush.msra.mxu0 %v1571_v23  ;;  %2306 = vmatpush.msra.mxu1 %v1667_v24  ;;  %v1680_v13 = vld [vmem:[#allocation20 + $0x3e8] sm:$0xff]  ;;  %v1890_v21 = vld [vmem:[#allocation20 + $0xa78] sm:$0xff] }
 0x686   :  { %2323 = vmatpush.msra.mxu2 %v1781_v16  ;;  %2343 = vmatpush.msra.mxu3 %v1877_v19  ;;  %v1578_v23 = vld [vmem:[#allocation20 + $0xb8] sm:$0xff]  ;;  %v1788_v16 = vld [vmem:[#allocation20 + $0x748] sm:$0xff] }
 0x687   :  { %2287 = vmatpush.msra.mxu0 %v1565_v25  ;;  %2307 = vmatpush.msra.mxu1 %v1661_v28  ;;  %v1674_v24 = vld [vmem:[#allocation20 + $0x3b8] sm:$0xff]  ;;  %v1884_v19 = vld [vmem:[#allocation20 + $0xa48] sm:$0xff] }
 0x688   :  { %2324 = vmatpush.msra.mxu2 %v1775_v29  ;;  %2344 = vmatpush.msra.mxu3 %v1871_v31  ;;  %v1572_v25 = vld [vmem:[#allocation20 + $0x88] sm:$0xff]  ;;  %v1782_v29 = vld [vmem:[#allocation20 + $0x718] sm:$0xff] }
 0x689   :  { %2288 = vmatpush.msra.mxu0 %v1559_v32  ;;  %2308 = vmatpush.msra.mxu1 %v1655_v35  ;;  %v1668_v28 = vld [vmem:[#allocation20 + $0x388] sm:$0xff]  ;;  %v1878_v31 = vld [vmem:[#allocation20 + $0xa18] sm:$0xff] }
 0x68a   :  { %2325 = vmatpush.msra.mxu2 %v1769_v38  ;;  %2345 = vmatpush.msra.mxu3 %v1865_v39  ;;  %v1566_v32 = vld [vmem:[#allocation20 + $0x58] sm:$0xff]  ;;  %v1776_v38 = vld [vmem:[#allocation20 + $0x6e8] sm:$0xff] }
 0x68b   :  { %2289 = vmatmul.f32.vlgmr.msra.gmra.mxu0 %v5628_v14  ;;  %2309 = vmatmul.f32.vlgmr.msra.gmra.mxu1 %v5630_v15  ;;  %v1662_v35 = vld [vmem:[#allocation20 + $0x358] sm:$0xff]  ;;  %v1872_v39 = vld [vmem:[#allocation20 + $0x9e8] sm:$0xff] }
 0x68c   :  { %2353 = vmatpush.msrb.mxu0 %v1650_v42  ;;  %2373 = vmatpush.msrb.mxu1 %v1746_v22  ;;  %v1560_v42 = vld [vmem:[#allocation20 + $0x28] sm:$0xff] }
 0x68d   :  { %2326 = vmatpush.msra.mxu2 %v1763_v43  ;;  %2346 = vmatpush.msra.mxu3 %v1859_v27  ;;  %v1656_v22 = vld [vmem:[#allocation20 + $0x328] sm:$0xff]  ;;  %v1770_v43 = vld [vmem:[#allocation20 + $0x6b8] sm:$0xff] }
 0x68e   :  { %2354 = vmatpush.msrb.mxu0 %v1644_v26  ;;  %2374 = vmatpush.msrb.mxu1 %v1740_v33  ;;  %v1866_v27 = vld [vmem:[#allocation20 + $0x9b8] sm:$0xff]  ;;  %v2520_v26 = vld [vmem:[#allocation23 + $0x1e0] sm:$0xff] }
 0x68f   :  { %2327 = vmatpush.msra.mxu2 %v1757_v36  ;;  %2347 = vmatpush.msra.mxu3 %v1853_v37  ;;  %v1764_v33 = vld [vmem:[#allocation20 + $0x688] sm:$0xff] }
 0x690   :  { %2355 = vmatpush.msrb.mxu0 %v1638_v30  ;;  %2375 = vmatpush.msrb.mxu1 %v1734_v34  ;;  %v1860_v37 = vld [vmem:[#allocation20 + $0x988] sm:$0xff] }
 0x691   :  { %2328 = vmatpush.msra.mxu2 %v1751_v44  ;;  %2348 = vmatpush.msra.mxu3 %v1847_v45  ;;  %v2584_v30 = vld [vmem:[#allocation23 + $0x3e0] sm:$0xff]  ;;  %v1758_v44 = vld [vmem:[#allocation20 + $0x658] sm:$0xff] }
 0x692   :  { %2329 = vmatmul.f32.vlgmr.msra.gmra.mxu2 %v5636_v40  ;;  %2349 = vmatmul.f32.vlgmr.msra.gmra.mxu3 %v5638_v41  ;;  %v2516_v34 = vld [vmem:[#allocation23 + $0x1c0] sm:$0xff]  ;;  %v1854_v45 = vld [vmem:[#allocation20 + $0x958] sm:$0xff] }
 0x693   :  { %2356 = vmatpush.msrb.mxu0 %v1632_v18  ;;  %2376 = vmatpush.msrb.mxu1 %v1728_v17  ;;  %v2580_v18 = vld [vmem:[#allocation23 + $0x3c0] sm:$0xff] }
 0x694   :  { %2393 = vmatpush.msrb.mxu2 %v1842_v0  ;;  %2413 = vmatpush.msrb.mxu3 %v1938_v1  ;;  %v2512_v17 = vld [vmem:[#allocation23 + $0x1a0] sm:$0xff] }
 0x695   :  { %2357 = vmatpush.msrb.mxu0 %v1626_v46  ;;  %2377 = vmatpush.msrb.mxu1 %v1722_v47  ;;  %v1752_v0 = vld [vmem:[#allocation20 + $0x628] sm:$0xff]  ;;  %v5660_v46 = vld [vmem:[#allocation22] sm:$0x3f] }
 0x696   :  { %2394 = vmatpush.msrb.mxu2 %v1836_v48  ;;  %2414 = vmatpush.msrb.mxu3 %v1932_v49  ;;  %v1848_v1 = vld [vmem:[#allocation20 + $0x928] sm:$0xff] }
 0x697   :  { %2358 = vmatpush.msrb.mxu0 %v1620_v50  ;;  %2378 = vmatpush.msrb.mxu1 %v1716_v51  ;;  %v2648_v48 = vld [vmem:[#allocation23 + $0x5e0] sm:$0xff] }
 0x698   :  { %2395 = vmatpush.msrb.mxu2 %v1830_v52  ;;  %2415 = vmatpush.msrb.mxu3 %v1926_v53  ;;  %v2504_v50 = vld [vmem:[#allocation23 + $0x160] sm:$0xff]  ;;  %v1941_v52 = vperm.slane %v5660_v46, 0 }
 0x699   :  { %2359 = vmatpush.msrb.mxu0 %v1614_v54  ;;  %2379 = vmatpush.msrb.mxu1 %v1710_v55  ;;  %v2712_v51 = vld [vmem:[#allocation23 + $0x7e0] sm:$0xff]  ;;  %v1942_v55 = vperm.slane %v5660_v46, 1 }
 0x69a   :  { %2396 = vmatpush.msrb.mxu2 %v1824_v56  ;;  %2416 = vmatpush.msrb.mxu3 %v1920_v57  ;;  %v2572_v53 = vld [vmem:[#allocation23 + $0x380] sm:$0xff] }
 0x69b   :  { %2360 = vmatpush.msrb.mxu0 %v1608_v58  ;;  %2380 = vmatpush.msrb.mxu1 %v1704_v59  ;;  %v2644_v54 = vld [vmem:[#allocation23 + $0x5c0] sm:$0xff] }
 0x69c   :  { %2397 = vmatpush.msrb.mxu2 %v1818_v60  ;;  %2417 = vmatpush.msrb.mxu3 %v1914_v61  ;;  %v2500_v56 = vld [vmem:[#allocation23 + $0x140] sm:$0xff] }
 0x69d   :  { %2361 = vmatpush.msrb.mxu0 %v1602_v62  ;;  %2381 = vmatpush.msrb.mxu1 %v1698_v63  ;;  %v2708_v57 = vld [vmem:[#allocation23 + $0x7c0] sm:$0xff] }
 0x69e   :  { %2398 = vmatpush.msrb.mxu2 %v1812_v2  ;;  %2418 = vmatpush.msrb.mxu3 %v1908_v3  ;;  %v2568_v59 = vld [vmem:[#allocation23 + $0x360] sm:$0xff] }
 0x69f   :  { %2362 = vmatpush.msrb.mxu0 %v1596_v4  ;;  %2382 = vmatpush.msrb.mxu1 %v1692_v5  ;;  %v2640_v60 = vld [vmem:[#allocation23 + $0x5a0] sm:$0xff] }
 0x6a0   :  { %2399 = vmatpush.msrb.mxu2 %v1806_v6  ;;  %2419 = vmatpush.msrb.mxu3 %v1902_v7  ;;  %v1970_v36 = vpop.f32.mrf.mxu0  ;;  %v1990_v47 = vpop.f32.mrf.mxu1  ;;  %v2704_v61 = vld [vmem:[#allocation23 + $0x7a0] sm:$0xff] }
 0x6a1   :  { %2363 = vmatpush.msrb.mxu0 %v1590_v8  ;;  %2383 = vmatpush.msrb.mxu1 %v1686_v9  ;;  %v1971_v62 = vadd.f32 %v1970_v36, %v1941_v52  ;;  %v2636_v63 = vld [vmem:[#allocation23 + $0x580] sm:$0xff] }
 0x6a2   :  { %2400 = vmatpush.msrb.mxu2 %v1800_v10  ;;  %2420 = vmatpush.msrb.mxu3 %v1896_v11  ;;  %v2492_v4 = vld [vmem:[#allocation23 + $0x100] sm:$0xff] }
 0x6a3   :  { %2364 = vmatpush.msrb.mxu0 %v1584_v12  ;;  %2384 = vmatpush.msrb.mxu1 %v1680_v13  ;;  %v2700_v5 = vld [vmem:[#allocation23 + $0x780] sm:$0xff]  ;;  %v1991_v10 = vadd.f32 %v1990_v47, %v1971_v62  ;;  %v1943_v47 = vperm.slane %v5660_v46, 2 }
 0x6a4   :  { %2401 = vmatpush.msrb.mxu2 %v1794_v20  ;;  %2421 = vmatpush.msrb.mxu3 %v1890_v21  ;;  %v2560_v6 = vld [vmem:[#allocation23 + $0x320] sm:$0xff] }
 0x6a5   :  { %2365 = vmatpush.msrb.mxu0 %v1578_v23  ;;  %2385 = vmatpush.msrb.mxu1 %v1674_v24  ;;  %v2632_v7 = vld [vmem:[#allocation23 + $0x560] sm:$0xff] }
 0x6a6   :  { %2402 = vmatpush.msrb.mxu2 %v1788_v16  ;;  %2422 = vmatpush.msrb.mxu3 %v1884_v19  ;;  %v2488_v8 = vld [vmem:[#allocation23 + $0xe0] sm:$0xff] }
 0x6a7   :  { %2366 = vmatpush.msrb.mxu0 %v1572_v25  ;;  %2386 = vmatpush.msrb.mxu1 %v1668_v28  ;;  %v2696_v9 = vld [vmem:[#allocation23 + $0x760] sm:$0xff] }
 0x6a8   :  { %2403 = vmatpush.msrb.mxu2 %v1782_v29  ;;  %2423 = vmatpush.msrb.mxu3 %v1878_v31  ;;  %v2556_v12 = vld [vmem:[#allocation23 + $0x300] sm:$0xff] }
 0x6a9   :  { %2367 = vmatpush.msrb.mxu0 %v1566_v32  ;;  %2387 = vmatpush.msrb.mxu1 %v1662_v35  ;;  %v2628_v13 = vld [vmem:[#allocation23 + $0x540] sm:$0xff] }
 0x6aa   :  { %2404 = vmatpush.msrb.mxu2 %v1776_v38  ;;  %2424 = vmatpush.msrb.mxu3 %v1872_v39  ;;  %v2050_v58 = vpop.f32.mrf.mxu0  ;;  %v2070_v11 = vpop.f32.mrf.mxu1  ;;  %v2484_v23 = vld [vmem:[#allocation23 + $0xc0] sm:$0xff] }
 0x6ab   :  { %2368 = vmatpush.msrb.mxu0 %v1560_v42  ;;  %2388 = vmatpush.msrb.mxu1 %v1656_v22  ;;  %v2051_v3 = vadd.f32 %v2050_v58, %v1942_v55  ;;  %v2692_v24 = vld [vmem:[#allocation23 + $0x740] sm:$0xff] }
 0x6ac   :  { %2405 = vmatpush.msrb.mxu2 %v1770_v43  ;;  %2425 = vmatpush.msrb.mxu3 %v1866_v27  ;;  %v2552_v19 = vld [vmem:[#allocation23 + $0x2e0] sm:$0xff] }
 0x6ad   :  { %2369 = vmatmul.f32.vlgmr.msrb.gmra.mxu0 %v5628_v14  ;;  %2389 = vmatmul.f32.vlgmr.msrb.gmra.mxu1 %v5630_v15  ;;  %v2508_v14 = vld [vmem:[#allocation23 + $0x180] sm:$0xff]  ;;  %v2010_v49 = vpop.f32.mrf.mxu2  ;;  %v2030_v2 = vpop.f32.mrf.mxu3  ;;  %v2071_v21 = vadd.f32 %v2070_v11, %v2051_v3  ;;  %v2581_v11 = vld [vmem:[#allocation23 + $0x3c8] sm:$0xff] }
 0x6ae   :  { %2854 = vmatpush.msra.mxu0 %v2520_v26  ;;  %2406 = vmatpush.msrb.mxu2 %v1764_v33  ;;  %v2576_v15 = vld [vmem:[#allocation23 + $0x3a0] sm:$0xff]  ;;  %v2011_v16 = vadd.f32 %v2010_v49, %v1991_v10 }
 0x6af   :  { %2426 = vmatpush.msrb.mxu3 %v1860_v37  ;;  %2874 = vmatpush.msra.mxu1 %v2584_v30  ;;  %v2624_v25 = vld [vmem:[#allocation23 + $0x520] sm:$0xff] }
 0x6b0   :  { %2855 = vmatpush.msra.mxu0 %v2516_v34  ;;  %2407 = vmatpush.msrb.mxu2 %v1758_v44  ;;  %v2480_v28 = vld [vmem:[#allocation23 + $0xa0] sm:$0xff]  ;;  %v2031_v42 = vadd.f32 %v2030_v2, %v2011_v16  ;;  %v2521_v2 = vld [vmem:[#allocation23 + $0x1e8] sm:$0xff] }
 0x6b1   :  { %2427 = vmatpush.msrb.mxu3 %v1854_v45  ;;  %2875 = vmatpush.msra.mxu1 %v2580_v18  ;;  %v2688_v31 = vld [vmem:[#allocation23 + $0x720] sm:$0xff] }
 0x6b2   :  { %2856 = vmatpush.msra.mxu0 %v2512_v17  ;;  %2408 = vmatpush.msrb.mxu2 %v1752_v0  ;;  %v2548_v32 = vld [vmem:[#allocation23 + $0x2c0] sm:$0xff]  ;;  %4094 = vtanh.f32 %v2031_v42  ;;  %v2493_v42 = vld [vmem:[#allocation23 + $0x108] sm:$0xff] }
 0x6b3   :  { %2428 = vmatpush.msrb.mxu3 %v1848_v1  ;;  %2409 = vmatmul.f32.vlgmr.msrb.gmra.mxu2 %v5636_v40  ;;  %v2496_v40 = vld [vmem:[#allocation23 + $0x120] sm:$0xff] }
 0x6b4   :  { %2429 = vmatmul.f32.vlgmr.msrb.gmra.mxu3 %v5638_v41  ;;  %2857 = vmatpush.msra.mxu0 %v2508_v14  ;;  %v2564_v41 = vld [vmem:[#allocation23 + $0x340] sm:$0xff] }
 0x6b5   :  { %2876 = vmatpush.msra.mxu1 %v2576_v15  ;;  %2894 = vmatpush.msra.mxu2 %v2648_v48  ;;  %v2620_v35 = vld [vmem:[#allocation23 + $0x500] sm:$0xff] }
 0x6b6   :  { %2858 = vmatpush.msra.mxu0 %v2504_v50  ;;  %2914 = vmatpush.msra.mxu3 %v2712_v51  ;;  %v2476_v38 = vld [vmem:[#allocation23 + $0x80] sm:$0xff] }
 0x6b7   :  { %2877 = vmatpush.msra.mxu1 %v2572_v53  ;;  %2895 = vmatpush.msra.mxu2 %v2644_v54  ;;  %v2090_v20 = vpop.f32.mrf.mxu2  ;;  %v2684_v39 = vld [vmem:[#allocation23 + $0x700] sm:$0xff]  ;;  %v2110_v22 = vpop.f32.mrf.mxu3 }
 0x6b8   :  { %2859 = vmatpush.msra.mxu0 %v2500_v56  ;;  %2915 = vmatpush.msra.mxu3 %v2708_v57  ;;  %v2091_v29 = vadd.f32 %v2090_v20, %v2071_v21  ;;  %v2544_v43 = vld [vmem:[#allocation23 + $0x2a0] sm:$0xff]  ;;  %v5667_v53 = vpop.eup %4094  ;;  %v2577_v20 = vld [vmem:[#allocation23 + $0x3a8] sm:$0xff] }
 0x6b9   :  { %2878 = vmatpush.msra.mxu1 %v2568_v59  ;;  %2896 = vmatpush.msra.mxu2 %v2640_v60  ;;  %v2616_v27 = vld [vmem:[#allocation23 + $0x4e0] sm:$0xff] }
 0x6ba   :  { %2860 = vmatpush.msra.mxu0 %v2496_v40  ;;  %2916 = vmatpush.msra.mxu3 %v2704_v61  ;;  %v2111_v26 = vadd.f32 %v2110_v22, %v2091_v29  ;;  %v2472_v33 = vld [vmem:[#allocation23 + $0x60] sm:$0xff] }
 0x6bb   :  { %2879 = vmatpush.msra.mxu1 %v2564_v41  ;;  %2897 = vmatpush.msra.mxu2 %v2636_v63  ;;  %v2680_v36 = vld [vmem:[#allocation23 + $0x6e0] sm:$0xff] }
 0x6bc   :  { %2861 = vmatpush.msra.mxu0 %v2492_v4  ;;  %2917 = vmatpush.msra.mxu3 %v2700_v5  ;;  %v2540_v37 = vld [vmem:[#allocation23 + $0x280] sm:$0xff]  ;;  %4096 = vtanh.f32 %v2111_v26 }
 0x6bd   :  { %2880 = vmatpush.msra.mxu1 %v2560_v6  ;;  %2898 = vmatpush.msra.mxu2 %v2632_v7  ;;  %v2612_v30 = vld [vmem:[#allocation23 + $0x4c0] sm:$0xff]  ;;  %v2585_v6 = vld [vmem:[#allocation23 + $0x3e8] sm:$0xff] }
 0x6be   :  { %2862 = vmatpush.msra.mxu0 %v2488_v8  ;;  %2918 = vmatpush.msra.mxu3 %v2696_v9  ;;  %v2468_v34 = vld [vmem:[#allocation23 + $0x40] sm:$0xff]  ;;  %v2517_v8 = vld [vmem:[#allocation23 + $0x1c8] sm:$0xff] }
 0x6bf   :  { %2881 = vmatpush.msra.mxu1 %v2556_v12  ;;  %2899 = vmatpush.msra.mxu2 %v2628_v13  ;;  %v2676_v44 = vld [vmem:[#allocation23 + $0x6c0] sm:$0xff]  ;;  %v2513_v13 = vld [vmem:[#allocation23 + $0x1a8] sm:$0xff] }
 0x6c0   :  { %2863 = vmatpush.msra.mxu0 %v2484_v23  ;;  %2919 = vmatpush.msra.mxu3 %v2692_v24  ;;  %v2536_v45 = vld [vmem:[#allocation23 + $0x260] sm:$0xff]  ;;  %v2509_v23 = vld [vmem:[#allocation23 + $0x188] sm:$0xff] }
 0x6c1   :  { %2882 = vmatpush.msra.mxu1 %v2552_v19  ;;  %2900 = vmatpush.msra.mxu2 %v2624_v25  ;;  %v2608_v18 = vld [vmem:[#allocation23 + $0x4a0] sm:$0xff]  ;;  %v2573_v24 = vld [vmem:[#allocation23 + $0x388] sm:$0xff] }
 0x6c2   :  { %2864 = vmatpush.msra.mxu0 %v2480_v28  ;;  %2920 = vmatpush.msra.mxu3 %v2688_v31  ;;  %v2464_v17 = vld [vmem:[#allocation23 + $0x20] sm:$0xff]  ;;  %v5669_v57 = vpop.eup %4096  ;;  %v2505_v19 = vld [vmem:[#allocation23 + $0x168] sm:$0xff] }
 0x6c3   :  { %2883 = vmatpush.msra.mxu1 %v2548_v32  ;;  %2901 = vmatpush.msra.mxu2 %v2620_v35  ;;  %v2672_v0 = vld [vmem:[#allocation23 + $0x6a0] sm:$0xff]  ;;  %v2569_v25 = vld [vmem:[#allocation23 + $0x368] sm:$0xff] }
 0x6c4   :  { %2865 = vmatpush.msra.mxu0 %v2476_v38  ;;  %2921 = vmatpush.msra.mxu3 %v2684_v39  ;;  %v2532_v1 = vld [vmem:[#allocation23 + $0x240] sm:$0xff]  ;;  %v2130_v48 = vpop.f32.mrf.mxu0  ;;  %v2150_v40 = vpop.f32.mrf.mxu1  ;;  %v2501_v28 = vld [vmem:[#allocation23 + $0x148] sm:$0xff] }
 0x6c5   :  { %2884 = vmatpush.msra.mxu1 %v2544_v43  ;;  %2902 = vmatpush.msra.mxu2 %v2616_v27  ;;  %v2604_v14 = vld [vmem:[#allocation23 + $0x480] sm:$0xff]  ;;  %v2131_v54 = vadd.f32 %v2130_v48, %v1943_v47  ;;  %v2565_v32 = vld [vmem:[#allocation23 + $0x348] sm:$0xff]  ;;  %v1944_v48 = vperm.slane %v5660_v46, 3 }
 0x6c6   :  { %2866 = vmatpush.msra.mxu0 %v2472_v33  ;;  %2922 = vmatpush.msra.mxu3 %v2680_v36  ;;  %v2460_v15 = vld [vmem:[#allocation23] sm:$0xff]  ;;  %v2497_v35 = vld [vmem:[#allocation23 + $0x128] sm:$0xff] }
 0x6c7   :  { %2885 = vmatpush.msra.mxu1 %v2540_v37  ;;  %2903 = vmatpush.msra.mxu2 %v2612_v30  ;;  %v2668_v49 = vld [vmem:[#allocation23 + $0x680] sm:$0xff]  ;;  %v2151_v62 = vadd.f32 %v2150_v40, %v2131_v54  ;;  %v2561_v39 = vld [vmem:[#allocation23 + $0x328] sm:$0xff] }
 0x6c8   :  { %2867 = vmatpush.msra.mxu0 %v2468_v34  ;;  %2923 = vmatpush.msra.mxu3 %v2676_v44  ;;  %v2528_v50 = vld [vmem:[#allocation23 + $0x220] sm:$0xff]  ;;  %v2557_v43 = vld [vmem:[#allocation23 + $0x308] sm:$0xff] }
 0x6c9   :  { %2886 = vmatpush.msra.mxu1 %v2536_v45  ;;  %2904 = vmatpush.msra.mxu2 %v2608_v18  ;;  %v2600_v51 = vld [vmem:[#allocation23 + $0x460] sm:$0xff]  ;;  %v2489_v27 = vld [vmem:[#allocation23 + $0xe8] sm:$0xff] }
 0x6ca   :  { %2868 = vmatpush.msra.mxu0 %v2464_v17  ;;  %2924 = vmatpush.msra.mxu3 %v2672_v0  ;;  %v2664_v52 = vld [vmem:[#allocation23 + $0x660] sm:$0xff]  ;;  %v2553_v33 = vld [vmem:[#allocation23 + $0x2e8] sm:$0xff] }
 0x6cb   :  { %2887 = vmatpush.msra.mxu1 %v2532_v1  ;;  %2905 = vmatpush.msra.mxu2 %v2604_v14  ;;  %v2524_v55 = vld [vmem:[#allocation23 + $0x200] sm:$0xff]  ;;  %v2485_v36 = vld [vmem:[#allocation23 + $0xc8] sm:$0xff] }
 0x6cc   :  { %2869 = vmatpush.msra.mxu0 %v2460_v15  ;;  %v2596_v56 = vld [vmem:[#allocation23 + $0x440] sm:$0xff]  ;;  %2925 = vmatpush.msra.mxu3 %v2668_v49  ;;  %v2549_v30 = vld [vmem:[#allocation23 + $0x2c8] sm:$0xff] }
 0x6cd   :  { %2888 = vmatpush.msra.mxu1 %v2528_v50  ;;  %2906 = vmatpush.msra.mxu2 %v2600_v51  ;;  %v2660_v58 = vld [vmem:[#allocation23 + $0x640] sm:$0xff]  ;;  %v2481_v34 = vld [vmem:[#allocation23 + $0xa8] sm:$0xff] }
 0x6ce   :  { %2870 = vmatmul.f32.vlgmr.msra.gmra.mxu0 %v5667_v53  ;;  %v2592_v59 = vld [vmem:[#allocation23 + $0x420] sm:$0xff]  ;;  %2926 = vmatpush.msra.mxu3 %v2664_v52  ;;  %v2545_v45 = vld [vmem:[#allocation23 + $0x2a8] sm:$0xff] }
 0x6cf   :  { %v2776_v60 = vld [vmem:[#allocation23 + $0x9e0] sm:$0xff]  ;;  %2889 = vmatpush.msra.mxu1 %v2524_v55  ;;  %2907 = vmatpush.msra.mxu2 %v2596_v56  ;;  %v2477_v17 = vld [vmem:[#allocation23 + $0x88] sm:$0xff] }
 0x6d0   :  { %v2656_v61 = vld [vmem:[#allocation23 + $0x620] sm:$0xff]  ;;  %2890 = vmatmul.f32.vlgmr.msra.gmra.mxu1 %v5669_v57  ;;  %2927 = vmatpush.msra.mxu3 %v2660_v58  ;;  %v2541_v1 = vld [vmem:[#allocation23 + $0x288] sm:$0xff] }
 0x6d1   :  { %v2588_v41 = vld [vmem:[#allocation23 + $0x400] sm:$0xff]  ;;  %2908 = vmatpush.msra.mxu2 %v2592_v59  ;;  %v2170_v3 = vpop.f32.mrf.mxu2  ;;  %2934 = vmatpush.msrb.mxu0 %v2776_v60  ;;  %v2190_v9 = vpop.f32.mrf.mxu3  ;;  %v2473_v47 = vld [vmem:[#allocation23 + $0x68] sm:$0xff] }
 0x6d2   :  { %v2772_v63 = vld [vmem:[#allocation23 + $0x9c0] sm:$0xff]  ;;  %v2171_v5 = vadd.f32 %v2170_v3, %v2151_v62  ;;  %2928 = vmatpush.msra.mxu3 %v2656_v61  ;;  %v2537_v49 = vld [vmem:[#allocation23 + $0x268] sm:$0xff] }
 0x6d3   :  { %v2652_v4 = vld [vmem:[#allocation23 + $0x600] sm:$0xff]  ;;  %2909 = vmatpush.msra.mxu2 %v2588_v41  ;;  %2935 = vmatpush.msrb.mxu0 %v2772_v63  ;;  %v2469_v52 = vld [vmem:[#allocation23 + $0x48] sm:$0xff] }
 0x6d4   :  { %v2768_v7 = vld [vmem:[#allocation23 + $0x9a0] sm:$0xff]  ;;  %v2191_v10 = vadd.f32 %v2190_v9, %v2171_v5  ;;  %2929 = vmatpush.msra.mxu3 %v2652_v4  ;;  %v2533_v55 = vld [vmem:[#allocation23 + $0x248] sm:$0xff] }
 0x6d5   :  { %2974 = vmatpush.msrb.mxu2 %v2521_v2  ;;  %v2764_v12 = vld [vmem:[#allocation23 + $0x980] sm:$0xff]  ;;  %2936 = vmatpush.msrb.mxu0 %v2768_v7  ;;  %v2465_v58 = vld [vmem:[#allocation23 + $0x28] sm:$0xff] }
 0x6d6   :  { %2994 = vmatpush.msrb.mxu3 %v2585_v6  ;;  %4098 = vtanh.f32 %v2191_v10  ;;  %v2760_v21 = vld [vmem:[#allocation23 + $0x960] sm:$0xff]  ;;  %v2529_v40 = vld [vmem:[#allocation23 + $0x228] sm:$0xff] }
 0x6d7   :  { %2975 = vmatpush.msrb.mxu2 %v2517_v8  ;;  %2937 = vmatpush.msrb.mxu0 %v2764_v12  ;;  %v2756_v16 = vld [vmem:[#allocation23 + $0x940] sm:$0xff]  ;;  %v2649_v61 = vld [vmem:[#allocation23 + $0x5e8] sm:$0xff] }
 0x6d8   :  { %2995 = vmatpush.msrb.mxu3 %v2581_v11  ;;  %v2752_v29 = vld [vmem:[#allocation23 + $0x920] sm:$0xff]  ;;  %v2461_v41 = vld [vmem:[#allocation23 + $0x8] sm:$0xff] }
 0x6d9   :  { %2976 = vmatpush.msrb.mxu2 %v2513_v13  ;;  %2938 = vmatpush.msrb.mxu0 %v2760_v21  ;;  %v2748_v38 = vld [vmem:[#allocation23 + $0x900] sm:$0xff]  ;;  %v2525_v63 = vld [vmem:[#allocation23 + $0x208] sm:$0xff] }
 0x6da   :  { %2996 = vmatpush.msrb.mxu3 %v2577_v20  ;;  %v2744_v22 = vld [vmem:[#allocation23 + $0x8e0] sm:$0xff]  ;;  %v2777_v4 = vld [vmem:[#allocation23 + $0x9e8] sm:$0xff] }
 0x6db   :  { %2977 = vmatpush.msrb.mxu2 %v2509_v23  ;;  %2939 = vmatpush.msrb.mxu0 %v2756_v16  ;;  %v2740_v26 = vld [vmem:[#allocation23 + $0x8c0] sm:$0xff]  ;;  %v2645_v5 = vld [vmem:[#allocation23 + $0x5c8] sm:$0xff] }
 0x6dc   :  { %2997 = vmatpush.msrb.mxu3 %v2573_v24  ;;  %v5673_v31 = vpop.eup %4098  ;;  %v2736_v37 = vld [vmem:[#allocation23 + $0x8a0] sm:$0xff]  ;;  %v2773_v8 = vld [vmem:[#allocation23 + $0x9c8] sm:$0xff] }
 0x6dd   :  { %2978 = vmatpush.msrb.mxu2 %v2505_v19  ;;  %2940 = vmatpush.msrb.mxu0 %v2752_v29  ;;  %v2732_v44 = vld [vmem:[#allocation23 + $0x880] sm:$0xff]  ;;  %v2641_v10 = vld [vmem:[#allocation23 + $0x5a8] sm:$0xff] }
 0x6de   :  { %2910 = vmatmul.f32.vlgmr.msra.gmra.mxu2 %v5673_v31  ;;  %2998 = vmatpush.msrb.mxu3 %v2569_v25  ;;  %v2840_v18 = vld [vmem:[#allocation23 + $0xbe0] sm:$0xff]  ;;  %v2769_v13 = vld [vmem:[#allocation23 + $0x9a8] sm:$0xff] }
 0x6df   :  { %2979 = vmatpush.msrb.mxu2 %v2501_v28  ;;  %2941 = vmatpush.msrb.mxu0 %v2748_v38  ;;  %v2728_v0 = vld [vmem:[#allocation23 + $0x860] sm:$0xff]  ;;  %v2637_v21 = vld [vmem:[#allocation23 + $0x588] sm:$0xff] }
 0x6e0   :  { %2999 = vmatpush.msrb.mxu3 %v2565_v32  ;;  %2954 = vmatpush.msrb.mxu1 %v2840_v18  ;;  %v2836_v14 = vld [vmem:[#allocation23 + $0xbc0] sm:$0xff]  ;;  %v2765_v16 = vld [vmem:[#allocation23 + $0x988] sm:$0xff] }
 0x6e1   :  { %2980 = vmatpush.msrb.mxu2 %v2497_v35  ;;  %2942 = vmatpush.msrb.mxu0 %v2744_v22  ;;  %v2724_v15 = vld [vmem:[#allocation23 + $0x840] sm:$0xff]  ;;  %v2633_v19 = vld [vmem:[#allocation23 + $0x568] sm:$0xff] }
 0x6e2   :  { %3000 = vmatpush.msrb.mxu3 %v2561_v39  ;;  %2955 = vmatpush.msrb.mxu1 %v2836_v14  ;;  %v2832_v50 = vld [vmem:[#allocation23 + $0xba0] sm:$0xff]  ;;  %v2761_v28 = vld [vmem:[#allocation23 + $0x968] sm:$0xff] }
 0x6e3   :  { %2981 = vmatpush.msrb.mxu2 %v2493_v42  ;;  %2943 = vmatpush.msrb.mxu0 %v2740_v26  ;;  %v2720_v54 = vld [vmem:[#allocation23 + $0x820] sm:$0xff]  ;;  %v2629_v29 = vld [vmem:[#allocation23 + $0x548] sm:$0xff]  ;;  %v2445_v42 = vrot.slane %v5669_v57, 6 }
 0x6e4   :  { %3001 = vmatpush.msrb.mxu3 %v2557_v43  ;;  %2956 = vmatpush.msrb.mxu1 %v2832_v50  ;;  %v2828_v56 = vld [vmem:[#allocation23 + $0xb80] sm:$0xff]  ;;  %v2757_v35 = vld [vmem:[#allocation23 + $0x948] sm:$0xff] }
 0x6e5   :  { %2982 = vmatpush.msrb.mxu2 %v2489_v27  ;;  %2944 = vmatpush.msrb.mxu0 %v2736_v37  ;;  %v2716_v59 = vld [vmem:[#allocation23 + $0x800] sm:$0xff]  ;;  %v2625_v38 = vld [vmem:[#allocation23 + $0x528] sm:$0xff]  ;;  %v2450_v18 = vsel %vm2449_vm10, %v5667_v53, %v2445_v42 }
 0x6e6   :  { %3002 = vmatpush.msrb.mxu3 %v2553_v33  ;;  %v2210_v51 = vpop.f32.mrf.mxu0  ;;  %2957 = vmatpush.msrb.mxu1 %v2828_v56  ;;  %v2824_v62 = vld [vmem:[#allocation23 + $0xb60] sm:$0xff]  ;;  %v2230_v3 = vpop.f32.mrf.mxu1  ;;  %v2753_v22 = vld [vmem:[#allocation23 + $0x928] sm:$0xff] }
 0x6e7   :  { %2983 = vmatpush.msrb.mxu2 %v2485_v36  ;;  %2945 = vmatpush.msrb.mxu0 %v2732_v44  ;;  %v2211_v60 = vadd.f32 %v2210_v51, %v1944_v48  ;;  %v2820_v2 = vld [vmem:[#allocation23 + $0xb40] sm:$0xff]  ;;  %v2841_v43 = vld [vmem:[#allocation23 + $0xbe8] sm:$0xff]  ;;  %v2446_v36 = vrot.slane %v5673_v31, 4 }
 0x6e8   :  { %3003 = vmatpush.msrb.mxu3 %v2549_v30  ;;  %2958 = vmatpush.msrb.mxu1 %v2824_v62  ;;  %v2816_v7 = vld [vmem:[#allocation23 + $0xb20] sm:$0xff]  ;;  %v2621_v26 = vld [vmem:[#allocation23 + $0x508] sm:$0xff] }
 0x6e9   :  { %2984 = vmatpush.msrb.mxu2 %v2481_v34  ;;  %2946 = vmatpush.msrb.mxu0 %v2728_v0  ;;  %v2231_v6 = vadd.f32 %v2230_v3, %v2211_v60  ;;  %v2812_v12 = vld [vmem:[#allocation23 + $0xb00] sm:$0xff]  ;;  %v2749_v30 = vld [vmem:[#allocation23 + $0x908] sm:$0xff]  ;;  %v1945_v3 = vperm.slane %v5660_v46, 4 }
 0x6ea   :  { %3004 = vmatpush.msrb.mxu3 %v2545_v45  ;;  %2959 = vmatpush.msrb.mxu1 %v2820_v2  ;;  %v2808_v24 = vld [vmem:[#allocation23 + $0xae0] sm:$0xff]  ;;  %v2837_v34 = vld [vmem:[#allocation23 + $0xbc8] sm:$0xff] }
 0x6eb   :  { %2985 = vmatpush.msrb.mxu2 %v2477_v17  ;;  %2947 = vmatpush.msrb.mxu0 %v2724_v15  ;;  %v2804_v25 = vld [vmem:[#allocation23 + $0xac0] sm:$0xff]  ;;  %v2617_v44 = vld [vmem:[#allocation23 + $0x4e8] sm:$0xff] }
 0x6ec   :  { %3005 = vmatpush.msrb.mxu3 %v2541_v1  ;;  %2960 = vmatpush.msrb.mxu1 %v2816_v7  ;;  %v2800_v32 = vld [vmem:[#allocation23 + $0xaa0] sm:$0xff]  ;;  %v2745_v0 = vld [vmem:[#allocation23 + $0x8e8] sm:$0xff] }
 0x6ed   :  { %2986 = vmatpush.msrb.mxu2 %v2473_v47  ;;  %2948 = vmatpush.msrb.mxu0 %v2720_v54  ;;  %v2796_v39 = vld [vmem:[#allocation23 + $0xa80] sm:$0xff]  ;;  %v2833_v1 = vld [vmem:[#allocation23 + $0xba8] sm:$0xff] }
 0x6ee   :  { %3006 = vmatpush.msrb.mxu3 %v2537_v49  ;;  %2961 = vmatpush.msrb.mxu1 %v2812_v12  ;;  %v2792_v33 = vld [vmem:[#allocation23 + $0xa60] sm:$0xff]  ;;  %v2613_v47 = vld [vmem:[#allocation23 + $0x4c8] sm:$0xff] }
 0x6ef   :  { %2987 = vmatpush.msrb.mxu2 %v2469_v52  ;;  %2949 = vmatpush.msrb.mxu0 %v2716_v59  ;;  %v2788_v45 = vld [vmem:[#allocation23 + $0xa40] sm:$0xff]  ;;  %v2741_v48 = vld [vmem:[#allocation23 + $0x8c8] sm:$0xff] }
 0x6f0   :  { %3007 = vmatpush.msrb.mxu3 %v2533_v55  ;;  %2962 = vmatpush.msrb.mxu1 %v2808_v24  ;;  %v2784_v15 = vld [vmem:[#allocation23 + $0xa20] sm:$0xff]  ;;  %v2829_v49 = vld [vmem:[#allocation23 + $0xb88] sm:$0xff]  ;;  %v2646_v24 = vld [vmem:[#allocation23 + $0x5d0] sm:$0xff] }
 0x6f1   :  { %2988 = vmatpush.msrb.mxu2 %v2465_v58  ;;  %3014 = vmatpush.msra.mxu0 %v2649_v61  ;;  %v2609_v50 = vld [vmem:[#allocation23 + $0x4a8] sm:$0xff]  ;;  %v2780_v55 = vld [vmem:[#allocation23 + $0xa00] sm:$0xff] }
 0x6f2   :  { %3008 = vmatpush.msrb.mxu3 %v2529_v40  ;;  %2963 = vmatpush.msrb.mxu1 %v2804_v25  ;;  %v2737_v51 = vld [vmem:[#allocation23 + $0x8a8] sm:$0xff] }
 0x6f3   :  { %2989 = vmatpush.msrb.mxu2 %v2461_v41  ;;  %v2250_v9 = vpop.f32.mrf.mxu2  ;;  %3015 = vmatpush.msra.mxu0 %v2645_v5  ;;  %v2270_v20 = vpop.f32.mrf.mxu3  ;;  %v2825_v52 = vld [vmem:[#allocation23 + $0xb68] sm:$0xff] }
 0x6f4   :  { %2990 = vmatmul.f32.vlgmr.msrb.gmra.mxu2 %v5667_v53  ;;  %3009 = vmatpush.msrb.mxu3 %v2525_v63  ;;  %v2251_v11 = vadd.f32 %v2250_v9, %v2231_v6  ;;  %v2605_v54 = vld [vmem:[#allocation23 + $0x488] sm:$0xff] }
 0x6f5   :  { %3054 = vmatpush.msra.mxu2 %v2777_v4  ;;  %3016 = vmatpush.msra.mxu0 %v2641_v10  ;;  %v2733_v56 = vld [vmem:[#allocation23 + $0x888] sm:$0xff] }
 0x6f6   :  { %v2271_v23 = vadd.f32 %v2270_v20, %v2251_v11  ;;  %2964 = vmatpush.msrb.mxu1 %v2800_v32  ;;  %v2821_v58 = vld [vmem:[#allocation23 + $0xb48] sm:$0xff]  ;;  %v2650_v20 = vld [vmem:[#allocation23 + $0x5f0] sm:$0xff] }
 0x6f7   :  { %3055 = vmatpush.msra.mxu2 %v2773_v8  ;;  %3017 = vmatpush.msra.mxu0 %v2637_v21  ;;  %v2601_v59 = vld [vmem:[#allocation23 + $0x468] sm:$0xff] }
 0x6f8   :  { %4100 = vtanh.f32 %v2271_v23  ;;  %2965 = vmatpush.msrb.mxu1 %v2796_v39  ;;  %v2713_v60 = vld [vmem:[#allocation23 + $0x7e8] sm:$0xff]  ;;  %v2638_v39 = vld [vmem:[#allocation23 + $0x590] sm:$0xff] }
 0x6f9   :  { %3056 = vmatpush.msra.mxu2 %v2769_v13  ;;  %3018 = vmatpush.msra.mxu0 %v2633_v19  ;;  %v2729_v40 = vld [vmem:[#allocation23 + $0x868] sm:$0xff] }
 0x6fa   :  { %2966 = vmatpush.msrb.mxu1 %v2792_v33  ;;  %v2817_v61 = vld [vmem:[#allocation23 + $0xb28] sm:$0xff] }
 0x6fb   :  { %3057 = vmatpush.msra.mxu2 %v2765_v16  ;;  %3019 = vmatpush.msra.mxu0 %v2629_v29  ;;  %v2597_v62 = vld [vmem:[#allocation23 + $0x448] sm:$0xff]  ;;  %v2642_v29 = vld [vmem:[#allocation23 + $0x5b0] sm:$0xff] }
 0x6fc   :  { %2967 = vmatpush.msrb.mxu1 %v2788_v45  ;;  %v2709_v41 = vld [vmem:[#allocation23 + $0x7c8] sm:$0xff] }
 0x6fd   :  { %3058 = vmatpush.msra.mxu2 %v2761_v28  ;;  %3020 = vmatpush.msra.mxu0 %v2625_v38  ;;  %v2725_v63 = vld [vmem:[#allocation23 + $0x848] sm:$0xff] }
 0x6fe   :  { %v5679_v27 = vpop.eup %4100  ;;  %2968 = vmatpush.msrb.mxu1 %v2784_v15  ;;  %v2813_v2 = vld [vmem:[#allocation23 + $0xb08] sm:$0xff]  ;;  %v2618_v15 = vld [vmem:[#allocation23 + $0x4f0] sm:$0xff] }
 0x6ff   :  { %3059 = vmatpush.msra.mxu2 %v2757_v35  ;;  %v2447_v37 = vrot.slane %v5679_v27, 2  ;;  %2930 = vmatmul.f32.vlgmr.msra.gmra.mxu3 %v5679_v27  ;;  %v2593_v4 = vld [vmem:[#allocation23 + $0x428] sm:$0xff] }
 0x700   :  { %3074 = vmatpush.msra.mxu3 %v2841_v43  ;;  %3021 = vmatpush.msra.mxu0 %v2621_v26  ;;  %v2705_v5 = vld [vmem:[#allocation23 + $0x7a8] sm:$0xff] }
 0x701   :  { %3060 = vmatpush.msra.mxu2 %v2753_v22  ;;  %v2452_v17 = vsel %vm2451_vm11, %v2446_v36, %v2447_v37  ;;  %2969 = vmatpush.msrb.mxu1 %v2780_v55  ;;  %v2721_v7 = vld [vmem:[#allocation23 + $0x828] sm:$0xff]  ;;  %v2634_v36 = vld [vmem:[#allocation23 + $0x570] sm:$0xff] }
 0x702   :  { %v2454_v14 = vsel %vm2453_vm12, %v2450_v18, %v2452_v17  ;;  %3075 = vmatpush.msra.mxu3 %v2837_v34  ;;  %3022 = vmatpush.msra.mxu0 %v2617_v44  ;;  %v2809_v8 = vld [vmem:[#allocation23 + $0xae8] sm:$0xff]  ;;  %v2630_v34 = vld [vmem:[#allocation23 + $0x550] sm:$0xff] }
 0x703   :  { %3061 = vmatpush.msra.mxu2 %v2749_v30  ;;  %2458 = vst [vmem:[%s6101_s25] sm:$0xff] %v2454_v14  ;;  %3034 = vmatpush.msra.mxu1 %v2713_v60  ;;  %v2589_v9 = vld [vmem:[#allocation23 + $0x408] sm:$0xff]  ;;  %v2626_v18 = vld [vmem:[#allocation23 + $0x530] sm:$0xff] }
 0x704   :  { %3076 = vmatpush.msra.mxu3 %v2833_v1  ;;  %3023 = vmatpush.msra.mxu0 %v2613_v47  ;;  %v2701_v10 = vld [vmem:[#allocation23 + $0x788] sm:$0xff]  ;;  %v2714_v17 = vld [vmem:[#allocation23 + $0x7f0] sm:$0xff] }
 0x705   :  { %3062 = vmatpush.msra.mxu2 %v2745_v0  ;;  %3035 = vmatpush.msra.mxu1 %v2709_v41  ;;  %v2717_v11 = vld [vmem:[#allocation23 + $0x808] sm:$0xff]  ;;  %v2622_v1 = vld [vmem:[#allocation23 + $0x510] sm:$0xff] }
 0x706   :  { %3077 = vmatpush.msra.mxu3 %v2829_v49  ;;  %3024 = vmatpush.msra.mxu0 %v2609_v50  ;;  %v2805_v12 = vld [vmem:[#allocation23 + $0xac8] sm:$0xff]  ;;  %v2522_v14 = vld [vmem:[#allocation23 + $0x1f0] sm:$0xff] }
 0x707   :  { %3063 = vmatpush.msra.mxu2 %v2741_v48  ;;  %3010 = vmatmul.f32.vlgmr.msrb.gmra.mxu3 %v5669_v57  ;;  %v2697_v21 = vld [vmem:[#allocation23 + $0x768] sm:$0xff]  ;;  %v2710_v48 = vld [vmem:[#allocation23 + $0x7d0] sm:$0xff] }
 0x708   :  { %3078 = vmatpush.msra.mxu3 %v2825_v52  ;;  %3025 = vmatpush.msra.mxu0 %v2605_v54  ;;  %v2290_v6 = vpop.f32.mrf.mxu0  ;;  %v2801_v23 = vld [vmem:[#allocation23 + $0xaa8] sm:$0xff]  ;;  %v2310_v19 = vpop.f32.mrf.mxu1  ;;  %v2518_v49 = vld [vmem:[#allocation23 + $0x1d0] sm:$0xff] }
 0x709   :  { %3064 = vmatpush.msra.mxu2 %v2737_v51  ;;  %3036 = vmatpush.msra.mxu1 %v2705_v5  ;;  %v2291_v13 = vadd.f32 %v2290_v6, %v1945_v3  ;;  %v2693_v16 = vld [vmem:[#allocation23 + $0x748] sm:$0xff]  ;;  %v2614_v51 = vld [vmem:[#allocation23 + $0x4d0] sm:$0xff] }
 0x70a   :  { %3079 = vmatpush.msra.mxu3 %v2821_v58  ;;  %3026 = vmatpush.msra.mxu0 %v2601_v59  ;;  %v2797_v25 = vld [vmem:[#allocation23 + $0xa88] sm:$0xff]  ;;  %v2706_v52 = vld [vmem:[#allocation23 + $0x7b0] sm:$0xff] }
 0x70b   :  { %3065 = vmatpush.msra.mxu2 %v2733_v56  ;;  %3037 = vmatpush.msra.mxu1 %v2701_v10  ;;  %v2311_v28 = vadd.f32 %v2310_v19, %v2291_v13  ;;  %v2689_v32 = vld [vmem:[#allocation23 + $0x728] sm:$0xff]  ;;  %v2514_v54 = vld [vmem:[#allocation23 + $0x1b0] sm:$0xff] }
 0x70c   :  { %3080 = vmatpush.msra.mxu3 %v2817_v61  ;;  %3027 = vmatpush.msra.mxu0 %v2597_v62  ;;  %v2793_v38 = vld [vmem:[#allocation23 + $0xa68] sm:$0xff]  ;;  %v2610_v56 = vld [vmem:[#allocation23 + $0x4b0] sm:$0xff] }
 0x70d   :  { %3066 = vmatpush.msra.mxu2 %v2729_v40  ;;  %3038 = vmatpush.msra.mxu1 %v2697_v21  ;;  %v2685_v22 = vld [vmem:[#allocation23 + $0x708] sm:$0xff]  ;;  %v2702_v58 = vld [vmem:[#allocation23 + $0x790] sm:$0xff]  ;;  %v2523_v21 = vld [vmem:[#allocation23 + $0x1f8] sm:$0xff] }
 0x70e   :  { %3081 = vmatpush.msra.mxu3 %v2813_v2  ;;  %3028 = vmatpush.msra.mxu0 %v2593_v4  ;;  %v2789_v26 = vld [vmem:[#allocation23 + $0xa48] sm:$0xff]  ;;  %v2510_v59 = vld [vmem:[#allocation23 + $0x190] sm:$0xff] }
 0x70f   :  { %3067 = vmatpush.msra.mxu2 %v2725_v63  ;;  %3039 = vmatpush.msra.mxu1 %v2693_v16  ;;  %v2681_v37 = vld [vmem:[#allocation23 + $0x6e8] sm:$0xff]  ;;  %v2606_v40 = vld [vmem:[#allocation23 + $0x490] sm:$0xff] }
 0x710   :  { %3082 = vmatpush.msra.mxu3 %v2809_v8  ;;  %3029 = vmatpush.msra.mxu0 %v2589_v9  ;;  %v2785_v30 = vld [vmem:[#allocation23 + $0xa28] sm:$0xff]  ;;  %v2506_v61 = vld [vmem:[#allocation23 + $0x170] sm:$0xff]  ;;  %v1946_v9 = vperm.slane %v5660_v46, 5  ;;  %v2519_v46 = vld [vmem:[#allocation23 + $0x1d8] sm:$0xff] }
 0x711   :  { %3068 = vmatpush.msra.mxu2 %v2721_v7  ;;  %3040 = vmatpush.msra.mxu1 %v2689_v32  ;;  %v2677_v44 = vld [vmem:[#allocation23 + $0x6c8] sm:$0xff]  ;;  %v2698_v62 = vld [vmem:[#allocation23 + $0x770] sm:$0xff] }
 0x712   :  { %3083 = vmatpush.msra.mxu3 %v2805_v12  ;;  %v2781_v45 = vld [vmem:[#allocation23 + $0xa08] sm:$0xff]  ;;  %v2602_v41 = vld [vmem:[#allocation23 + $0x470] sm:$0xff] }
 0x713   :  { %3069 = vmatpush.msra.mxu2 %v2717_v11  ;;  %3041 = vmatpush.msra.mxu1 %v2685_v22  ;;  %v2673_v0 = vld [vmem:[#allocation23 + $0x6a8] sm:$0xff]  ;;  %v2502_v2 = vld [vmem:[#allocation23 + $0x150] sm:$0xff] }
 0x714   :  { %3084 = vmatpush.msra.mxu3 %v2801_v23  ;;  %v2669_v50 = vld [vmem:[#allocation23 + $0x688] sm:$0xff]  ;;  %v2694_v3 = vld [vmem:[#allocation23 + $0x750] sm:$0xff] }
 0x715   :  { %3134 = vmatpush.msrb.mxu2 %v2650_v20  ;;  %v2330_v35 = vpop.f32.mrf.mxu2  ;;  %v2350_v43 = vpop.f32.mrf.mxu3  ;;  %3042 = vmatpush.msra.mxu1 %v2681_v37  ;;  %v2665_v55 = vld [vmem:[#allocation23 + $0x668] sm:$0xff]  ;;  %v2598_v4 = vld [vmem:[#allocation23 + $0x450] sm:$0xff] }
 0x716   :  { %v2331_v42 = vadd.f32 %v2330_v35, %v2311_v28  ;;  %3085 = vmatpush.msra.mxu3 %v2797_v25  ;;  %v2661_v60 = vld [vmem:[#allocation23 + $0x648] sm:$0xff]  ;;  %v2498_v6 = vld [vmem:[#allocation23 + $0x130] sm:$0xff] }
 0x717   :  { %3135 = vmatpush.msrb.mxu2 %v2646_v24  ;;  %3043 = vmatpush.msra.mxu1 %v2677_v44  ;;  %v2657_v63 = vld [vmem:[#allocation23 + $0x628] sm:$0xff]  ;;  %v2690_v7 = vld [vmem:[#allocation23 + $0x730] sm:$0xff]  ;;  %v2503_v44 = vld [vmem:[#allocation23 + $0x158] sm:$0xff] }
 0x718   :  { %v2351_v33 = vadd.f32 %v2350_v43, %v2331_v42  ;;  %3086 = vmatpush.msra.mxu3 %v2793_v38  ;;  %v2653_v5 = vld [vmem:[#allocation23 + $0x608] sm:$0xff]  ;;  %v2594_v8 = vld [vmem:[#allocation23 + $0x430] sm:$0xff] }
 0x719   :  { %3136 = vmatpush.msrb.mxu2 %v2642_v29  ;;  %3044 = vmatpush.msra.mxu1 %v2673_v0  ;;  %v2494_v10 = vld [vmem:[#allocation23 + $0x110] sm:$0xff]  ;;  %v2515_v29 = vld [vmem:[#allocation23 + $0x1b8] sm:$0xff] }
 0x71a   :  { %4102 = vtanh.f32 %v2351_v33  ;;  %3087 = vmatpush.msra.mxu3 %v2789_v26  ;;  %v2686_v11 = vld [vmem:[#allocation23 + $0x710] sm:$0xff] }
 0x71b   :  { %3137 = vmatpush.msrb.mxu2 %v2638_v39  ;;  %3045 = vmatpush.msra.mxu1 %v2669_v50  ;;  %v2590_v13 = vld [vmem:[#allocation23 + $0x410] sm:$0xff]  ;;  %v2511_v39 = vld [vmem:[#allocation23 + $0x198] sm:$0xff] }
 0x71c   :  { %3088 = vmatpush.msra.mxu3 %v2785_v30  ;;  %v2490_v20 = vld [vmem:[#allocation23 + $0xf0] sm:$0xff] }
 0x71d   :  { %3138 = vmatpush.msrb.mxu2 %v2634_v36  ;;  %3046 = vmatpush.msra.mxu1 %v2665_v55  ;;  %v2682_v23 = vld [vmem:[#allocation23 + $0x6f0] sm:$0xff]  ;;  %v2507_v36 = vld [vmem:[#allocation23 + $0x178] sm:$0xff] }
 0x71e   :  { %3089 = vmatpush.msra.mxu3 %v2781_v45  ;;  %v2486_v16 = vld [vmem:[#allocation23 + $0xd0] sm:$0xff]  ;;  %v2587_v55 = vld [vmem:[#allocation23 + $0x3f8] sm:$0xff] }
 0x71f   :  { %3139 = vmatpush.msrb.mxu2 %v2630_v34  ;;  %3047 = vmatpush.msra.mxu1 %v2661_v60  ;;  %v2678_v19 = vld [vmem:[#allocation23 + $0x6d0] sm:$0xff]  ;;  %v2483_v60 = vld [vmem:[#allocation23 + $0xb8] sm:$0xff] }
 0x720   :  { %3154 = vmatpush.msrb.mxu3 %v2714_v17  ;;  %v5692_v47 = vpop.eup %4102  ;;  %v2482_v25 = vld [vmem:[#allocation23 + $0xb0] sm:$0xff]  ;;  %v2499_v17 = vld [vmem:[#allocation23 + $0x138] sm:$0xff] }
 0x721   :  { %3140 = vmatpush.msrb.mxu2 %v2626_v18  ;;  %2950 = vmatmul.f32.vlgmr.msrb.gmra.mxu0 %v5692_v47  ;;  %v2674_v32 = vld [vmem:[#allocation23 + $0x6b0] sm:$0xff] }
 0x722   :  { %3070 = vmatmul.f32.vlgmr.msra.gmra.mxu2 %v5692_v47  ;;  %3094 = vmatpush.msrb.mxu0 %v2522_v14  ;;  %v2478_v38 = vld [vmem:[#allocation23 + $0x90] sm:$0xff]  ;;  %v2495_v14 = vld [vmem:[#allocation23 + $0x118] sm:$0xff] }
 0x723   :  { %3141 = vmatpush.msrb.mxu2 %v2622_v1  ;;  %3155 = vmatpush.msrb.mxu3 %v2710_v48  ;;  %v2670_v22 = vld [vmem:[#allocation23 + $0x690] sm:$0xff]  ;;  %v2491_v48 = vld [vmem:[#allocation23 + $0xf8] sm:$0xff] }
 0x724   :  { %3095 = vmatpush.msrb.mxu0 %v2518_v49  ;;  %3048 = vmatpush.msra.mxu1 %v2657_v63  ;;  %v2474_v26 = vld [vmem:[#allocation23 + $0x70] sm:$0xff]  ;;  %v2579_v63 = vld [vmem:[#allocation23 + $0x3b8] sm:$0xff] }
 0x725   :  { %3142 = vmatpush.msrb.mxu2 %v2618_v15  ;;  %3156 = vmatpush.msrb.mxu3 %v2706_v52  ;;  %v2666_v37 = vld [vmem:[#allocation23 + $0x670] sm:$0xff] }
 0x726   :  { %3096 = vmatpush.msrb.mxu0 %v2514_v54  ;;  %3049 = vmatpush.msra.mxu1 %v2653_v5  ;;  %v2470_v34 = vld [vmem:[#allocation23 + $0x50] sm:$0xff]  ;;  %v2487_v54 = vld [vmem:[#allocation23 + $0xd8] sm:$0xff] }
 0x727   :  { %3143 = vmatpush.msrb.mxu2 %v2614_v51  ;;  %3157 = vmatpush.msrb.mxu3 %v2702_v58  ;;  %v2662_v45 = vld [vmem:[#allocation23 + $0x650] sm:$0xff]  ;;  %v2575_v5 = vld [vmem:[#allocation23 + $0x398] sm:$0xff] }
 0x728   :  { %3097 = vmatpush.msrb.mxu0 %v2510_v59  ;;  %v2466_v18 = vld [vmem:[#allocation23 + $0x30] sm:$0xff] }
 0x729   :  { %3144 = vmatpush.msrb.mxu2 %v2610_v56  ;;  %3030 = vmatmul.f32.vlgmr.msra.gmra.mxu0 %v5673_v31  ;;  %v2658_v0 = vld [vmem:[#allocation23 + $0x630] sm:$0xff] }
 0x72a   :  { %3098 = vmatpush.msrb.mxu0 %v2506_v61  ;;  %3158 = vmatpush.msrb.mxu3 %v2698_v62  ;;  %v2370_v12 = vpop.f32.mrf.mxu0  ;;  %v2390_v28 = vpop.f32.mrf.mxu1  ;;  %v2462_v1 = vld [vmem:[#allocation23 + $0x10] sm:$0xff] }
 0x72b   :  { %3145 = vmatpush.msrb.mxu2 %v2606_v40  ;;  %v2371_v24 = vadd.f32 %v2370_v12, %v1946_v9  ;;  %v2654_v15 = vld [vmem:[#allocation23 + $0x610] sm:$0xff]  ;;  %v2583_v40 = vld [vmem:[#allocation23 + $0x3d8] sm:$0xff] }
 0x72c   :  { %3099 = vmatpush.msrb.mxu0 %v2502_v2  ;;  %3159 = vmatpush.msrb.mxu3 %v2694_v3  ;;  %v2586_v50 = vld [vmem:[#allocation23 + $0x3f0] sm:$0xff]  ;;  %v2571_v9 = vld [vmem:[#allocation23 + $0x378] sm:$0xff] }
 0x72d   :  { %3146 = vmatpush.msrb.mxu2 %v2602_v41  ;;  %v2391_v35 = vadd.f32 %v2390_v28, %v2371_v24  ;;  %v2778_v51 = vld [vmem:[#allocation23 + $0x9f0] sm:$0xff]  ;;  %v2479_v41 = vld [vmem:[#allocation23 + $0x98] sm:$0xff] }
 0x72e   :  { %3100 = vmatpush.msrb.mxu0 %v2498_v6  ;;  %3160 = vmatpush.msrb.mxu3 %v2690_v7  ;;  %v2582_v56 = vld [vmem:[#allocation23 + $0x3d0] sm:$0xff]  ;;  %v2471_v6 = vld [vmem:[#allocation23 + $0x58] sm:$0xff] }
 0x72f   :  { %3147 = vmatpush.msrb.mxu2 %v2598_v4  ;;  %v2774_v58 = vld [vmem:[#allocation23 + $0x9d0] sm:$0xff]  ;;  %v2475_v4 = vld [vmem:[#allocation23 + $0x78] sm:$0xff] }
 0x730   :  { %3101 = vmatpush.msrb.mxu0 %v2494_v10  ;;  %3161 = vmatpush.msrb.mxu3 %v2686_v11  ;;  %v2578_v61 = vld [vmem:[#allocation23 + $0x3b0] sm:$0xff]  ;;  %v2467_v10 = vld [vmem:[#allocation23 + $0x38] sm:$0xff] }
 0x731   :  { %3148 = vmatpush.msrb.mxu2 %v2594_v8  ;;  %v2770_v62 = vld [vmem:[#allocation23 + $0x9b0] sm:$0xff]  ;;  %v2563_v24 = vld [vmem:[#allocation23 + $0x338] sm:$0xff] }
 0x732   :  { %3102 = vmatpush.msrb.mxu0 %v2490_v20  ;;  %3162 = vmatpush.msrb.mxu3 %v2682_v23  ;;  %v2574_v2 = vld [vmem:[#allocation23 + $0x390] sm:$0xff]  ;;  %v2463_v20 = vld [vmem:[#allocation23 + $0x18] sm:$0xff] }
 0x733   :  { %3149 = vmatpush.msrb.mxu2 %v2590_v13  ;;  %v2766_v3 = vld [vmem:[#allocation23 + $0x990] sm:$0xff]  ;;  %v2567_v13 = vld [vmem:[#allocation23 + $0x358] sm:$0xff] }
 0x734   :  { %3150 = vmatmul.f32.vlgmr.msrb.gmra.mxu2 %v5673_v31  ;;  %3103 = vmatpush.msrb.mxu0 %v2486_v16  ;;  %v2570_v7 = vld [vmem:[#allocation23 + $0x370] sm:$0xff]  ;;  %v2779_v16 = vld [vmem:[#allocation23 + $0x9f8] sm:$0xff] }
 0x735   :  { %3214 = vmatpush.msra.mxu2 %v2523_v21  ;;  %3163 = vmatpush.msrb.mxu3 %v2678_v19  ;;  %v2762_v8 = vld [vmem:[#allocation23 + $0x970] sm:$0xff]  ;;  %v2775_v28 = vld [vmem:[#allocation23 + $0x9d8] sm:$0xff] }
 0x736   :  { %v2410_v42 = vpop.f32.mrf.mxu2  ;;  %3104 = vmatpush.msrb.mxu0 %v2482_v25  ;;  %v2566_v11 = vld [vmem:[#allocation23 + $0x350] sm:$0xff]  ;;  %v2559_v25 = vld [vmem:[#allocation23 + $0x318] sm:$0xff] }
 0x737   :  { %3215 = vmatpush.msra.mxu2 %v2519_v46  ;;  %v2411_v43 = vadd.f32 %v2410_v42, %v2391_v35  ;;  %3164 = vmatpush.msrb.mxu3 %v2674_v32  ;;  %v2430_v33 = vpop.f32.mrf.mxu3  ;;  %v2758_v12 = vld [vmem:[#allocation23 + $0x950] sm:$0xff]  ;;  %v2555_v35 = vld [vmem:[#allocation23 + $0x2f8] sm:$0xff] }
 0x738   :  { %3105 = vmatpush.msrb.mxu0 %v2478_v38  ;;  %v2562_v21 = vld [vmem:[#allocation23 + $0x330] sm:$0xff]  ;;  %v2771_v38 = vld [vmem:[#allocation23 + $0x9b8] sm:$0xff] }
 0x739   :  { %3216 = vmatpush.msra.mxu2 %v2515_v29  ;;  %v2431_v30 = vadd.f32 %v2430_v33, %v2411_v43  ;;  %3165 = vmatpush.msrb.mxu3 %v2670_v22  ;;  %v2754_v23 = vld [vmem:[#allocation23 + $0x930] sm:$0xff]  ;;  %v2551_v22 = vld [vmem:[#allocation23 + $0x2d8] sm:$0xff] }
 0x73a   :  { %3106 = vmatpush.msrb.mxu0 %v2474_v26  ;;  %v2558_v46 = vld [vmem:[#allocation23 + $0x310] sm:$0xff]  ;;  %v2767_v43 = vld [vmem:[#allocation23 + $0x998] sm:$0xff] }
 0x73b   :  { %3217 = vmatpush.msra.mxu2 %v2511_v39  ;;  %4104 = vtanh.f32 %v2431_v30  ;;  %3166 = vmatpush.msrb.mxu3 %v2666_v37  ;;  %v2750_v19 = vld [vmem:[#allocation23 + $0x910] sm:$0xff]  ;;  %v2547_v33 = vld [vmem:[#allocation23 + $0x2b8] sm:$0xff] }
 0x73c   :  { %3107 = vmatpush.msrb.mxu0 %v2470_v34  ;;  %v2554_v29 = vld [vmem:[#allocation23 + $0x2f0] sm:$0xff]  ;;  %v2543_v34 = vld [vmem:[#allocation23 + $0x298] sm:$0xff] }
 0x73d   :  { %3218 = vmatpush.msra.mxu2 %v2507_v36  ;;  %3167 = vmatpush.msrb.mxu3 %v2662_v45  ;;  %v2746_v32 = vld [vmem:[#allocation23 + $0x8f0] sm:$0xff]  ;;  %v2763_v36 = vld [vmem:[#allocation23 + $0x978] sm:$0xff] }
 0x73e   :  { %3108 = vmatpush.msrb.mxu0 %v2466_v18  ;;  %v2550_v39 = vld [vmem:[#allocation23 + $0x2d0] sm:$0xff] }
 0x73f   :  { %3219 = vmatpush.msra.mxu2 %v2503_v44  ;;  %3168 = vmatpush.msrb.mxu3 %v2658_v0  ;;  %v2742_v42 = vld [vmem:[#allocation23 + $0x8d0] sm:$0xff]  ;;  %v2759_v44 = vld [vmem:[#allocation23 + $0x958] sm:$0xff] }
 0x740   :  { %3109 = vmatpush.msrb.mxu0 %v2462_v1  ;;  %v2738_v26 = vld [vmem:[#allocation23 + $0x8b0] sm:$0xff]  ;;  %v2755_v0 = vld [vmem:[#allocation23 + $0x938] sm:$0xff] }
 0x741   :  { %3220 = vmatpush.msra.mxu2 %v2499_v17  ;;  %v5699_v49 = vpop.eup %4104  ;;  %3169 = vmatpush.msrb.mxu3 %v2654_v15  ;;  %v2542_v37 = vld [vmem:[#allocation23 + $0x290] sm:$0xff]  ;;  %v2539_v17 = vld [vmem:[#allocation23 + $0x278] sm:$0xff] }
 0x742   :  { %v2448_v52 = vrot.slane %v5699_v49, 6  ;;  %2970 = vmatmul.f32.vlgmr.msrb.gmra.mxu1 %v5699_v49  ;;  %3090 = vmatmul.f32.vlgmr.msra.gmra.mxu3 %v5699_v49  ;;  %v2734_v30 = vld [vmem:[#allocation23 + $0x890] sm:$0xff]  ;;  %v2535_v15 = vld [vmem:[#allocation23 + $0x258] sm:$0xff] }
 0x743   :  { %3221 = vmatpush.msra.mxu2 %v2495_v14  ;;  %3110 = vmatmul.f32.vlgmr.msrb.gmra.mxu0 %v5667_v53  ;;  %v2538_v45 = vld [vmem:[#allocation23 + $0x270] sm:$0xff] }
 0x744   :  { %v2455_v59 = vsel %vm2449_vm10, %v5692_v47, %v2448_v52  ;;  %3114 = vmatpush.msrb.mxu1 %v2586_v50  ;;  %3174 = vmatpush.msra.mxu0 %v2778_v51  ;;  %v2730_v18 = vld [vmem:[#allocation23 + $0x870] sm:$0xff]  ;;  %v2531_v52 = vld [vmem:[#allocation23 + $0x238] sm:$0xff] }
 0x745   :  { %3222 = vmatpush.msra.mxu2 %v2491_v48  ;;  %2459 = vst [vmem:[%s6101_s25 + $0x8] sm:$0xf] %v2455_v59  ;;  %3234 = vmatpush.msra.mxu3 %v2587_v55  ;;  %v2534_v1 = vld [vmem:[#allocation23 + $0x250] sm:$0xff]  ;;  %v2751_v48 = vld [vmem:[#allocation23 + $0x918] sm:$0xff] }
 0x746   :  { %3115 = vmatpush.msrb.mxu1 %v2582_v56  ;;  %3175 = vmatpush.msra.mxu0 %v2774_v58  ;;  %v2726_v14 = vld [vmem:[#allocation23 + $0x850] sm:$0xff]  ;;  %v2527_v58 = vld [vmem:[#allocation23 + $0x218] sm:$0xff] }
 0x747   :  { %3223 = vmatpush.msra.mxu2 %v2487_v54  ;;  %3235 = vmatpush.msra.mxu3 %v2583_v40  ;;  %v2530_v50 = vld [vmem:[#allocation23 + $0x230] sm:$0xff]  ;;  %v2747_v54 = vld [vmem:[#allocation23 + $0x8f8] sm:$0xff] }
 0x748   :  { %3116 = vmatpush.msrb.mxu1 %v2578_v61  ;;  %3176 = vmatpush.msra.mxu0 %v2770_v62  ;;  %v2722_v51 = vld [vmem:[#allocation23 + $0x830] sm:$0xff]  ;;  %v2743_v59 = vld [vmem:[#allocation23 + $0x8d8] sm:$0xff] }
 0x749   :  { %3224 = vmatpush.msra.mxu2 %v2483_v60  ;;  %3236 = vmatpush.msra.mxu3 %v2579_v63  ;;  %v2526_v55 = vld [vmem:[#allocation23 + $0x210] sm:$0xff]  ;;  %v2651_v40 = vld [vmem:[#allocation23 + $0x5f8] sm:$0xff] }
 0x74a   :  { %3117 = vmatpush.msrb.mxu1 %v2574_v2  ;;  %3177 = vmatpush.msra.mxu0 %v2766_v3  ;;  %v2718_v56 = vld [vmem:[#allocation23 + $0x810] sm:$0xff]  ;;  %v2843_v61 = vld [vmem:[#allocation23 + $0xbf8] sm:$0xff] }
 0x74b   :  { %3225 = vmatpush.msra.mxu2 %v2479_v41  ;;  %3237 = vmatpush.msra.mxu3 %v2575_v5  ;;  %v2842_v60 = vld [vmem:[#allocation23 + $0xbf0] sm:$0xff]  ;;  %v2739_v62 = vld [vmem:[#allocation23 + $0x8b8] sm:$0xff] }
 0x74c   :  { %3050 = vmatmul.f32.vlgmr.msra.gmra.mxu1 %v5679_v27  ;;  %3170 = vmatmul.f32.vlgmr.msrb.gmra.mxu3 %v5679_v27  ;;  %v2838_v41 = vld [vmem:[#allocation23 + $0xbd0] sm:$0xff]  ;;  %v2647_v63 = vld [vmem:[#allocation23 + $0x5d8] sm:$0xff] }
 0x74d   :  { %3226 = vmatpush.msra.mxu2 %v2475_v4  ;;  %3118 = vmatpush.msrb.mxu1 %v2570_v7  ;;  %v2839_v2 = vld [vmem:[#allocation23 + $0xbd8] sm:$0xff]  ;;  %v2834_v4 = vld [vmem:[#allocation23 + $0xbb0] sm:$0xff] }
 0x74e   :  { %3178 = vmatpush.msra.mxu0 %v2762_v8  ;;  %3238 = vmatpush.msra.mxu3 %v2571_v9  ;;  %v2735_v3 = vld [vmem:[#allocation23 + $0x898] sm:$0xff]  ;;  %v2830_v8 = vld [vmem:[#allocation23 + $0xb90] sm:$0xff] }
 0x74f   :  { %3227 = vmatpush.msra.mxu2 %v2471_v6  ;;  %3119 = vmatpush.msrb.mxu1 %v2566_v11  ;;  %v2643_v5 = vld [vmem:[#allocation23 + $0x5b8] sm:$0xff]  ;;  %v2826_v11 = vld [vmem:[#allocation23 + $0xb70] sm:$0xff] }
 0x750   :  { %3179 = vmatpush.msra.mxu0 %v2758_v12  ;;  %3239 = vmatpush.msra.mxu3 %v2567_v13  ;;  %v2835_v6 = vld [vmem:[#allocation23 + $0xbb8] sm:$0xff] }
 0x751   :  { %3228 = vmatpush.msra.mxu2 %v2467_v10  ;;  %3120 = vmatpush.msrb.mxu1 %v2562_v21  ;;  %v2731_v7 = vld [vmem:[#allocation23 + $0x878] sm:$0xff]  ;;  %v2822_v21 = vld [vmem:[#allocation23 + $0xb50] sm:$0xff] }
 0x752   :  { %3180 = vmatpush.msra.mxu0 %v2754_v23  ;;  %3240 = vmatpush.msra.mxu3 %v2563_v24  ;;  %v2639_v9 = vld [vmem:[#allocation23 + $0x598] sm:$0xff] }
 0x753   :  { %3229 = vmatpush.msra.mxu2 %v2463_v20  ;;  %3121 = vmatpush.msrb.mxu1 %v2558_v46  ;;  %v2831_v10 = vld [vmem:[#allocation23 + $0xb98] sm:$0xff]  ;;  %v2818_v46 = vld [vmem:[#allocation23 + $0xb30] sm:$0xff] }
 0x754   :  { %3230 = vmatmul.f32.vlgmr.msra.gmra.mxu2 %v5667_v53  ;;  %3181 = vmatpush.msra.mxu0 %v2750_v19  ;;  %v2546_v53 = vld [vmem:[#allocation23 + $0x2b0] sm:$0xff]  ;;  %v2635_v12 = vld [vmem:[#allocation23 + $0x578] sm:$0xff] }
 0x755   :  { %3294 = vmatpush.msrb.mxu2 %v2779_v16  ;;  %3241 = vmatpush.msra.mxu3 %v2559_v25  ;;  %v2827_v13 = vld [vmem:[#allocation23 + $0xb78] sm:$0xff] }
 0x756   :  { %3122 = vmatpush.msrb.mxu1 %v2554_v29  ;;  %3182 = vmatpush.msra.mxu0 %v2746_v32  ;;  %v2723_v20 = vld [vmem:[#allocation23 + $0x838] sm:$0xff] }
 0x757   :  { %3295 = vmatpush.msrb.mxu2 %v2775_v28  ;;  %3242 = vmatpush.msra.mxu3 %v2555_v35  ;;  %v2631_v23 = vld [vmem:[#allocation23 + $0x558] sm:$0xff]  ;;  %v2814_v28 = vld [vmem:[#allocation23 + $0xb10] sm:$0xff] }
 0x758   :  { %3123 = vmatpush.msrb.mxu1 %v2550_v39  ;;  %3183 = vmatpush.msra.mxu0 %v2742_v42  ;;  %v2823_v24 = vld [vmem:[#allocation23 + $0xb58] sm:$0xff]  ;;  %v2810_v35 = vld [vmem:[#allocation23 + $0xaf0] sm:$0xff] }
 0x759   :  { %3296 = vmatpush.msrb.mxu2 %v2771_v38  ;;  %3243 = vmatpush.msra.mxu3 %v2551_v22  ;;  %v2719_v16 = vld [vmem:[#allocation23 + $0x818] sm:$0xff]  ;;  %v2806_v42 = vld [vmem:[#allocation23 + $0xad0] sm:$0xff] }
 0x75a   :  { %3124 = vmatpush.msrb.mxu1 %v2546_v53  ;;  %3184 = vmatpush.msra.mxu0 %v2738_v26  ;;  %v2627_v19 = vld [vmem:[#allocation23 + $0x538] sm:$0xff]  ;;  %v2802_v53 = vld [vmem:[#allocation23 + $0xab0] sm:$0xff] }
 0x75b   :  { %3297 = vmatpush.msrb.mxu2 %v2767_v43  ;;  %3244 = vmatpush.msra.mxu3 %v2547_v33  ;;  %v2819_v25 = vld [vmem:[#allocation23 + $0xb38] sm:$0xff] }
 0x75c   :  { %3125 = vmatpush.msrb.mxu1 %v2542_v37  ;;  %3185 = vmatpush.msra.mxu0 %v2734_v30  ;;  %v2623_v29 = vld [vmem:[#allocation23 + $0x518] sm:$0xff]  ;;  %v2794_v30 = vld [vmem:[#allocation23 + $0xa70] sm:$0xff] }
 0x75d   :  { %3298 = vmatpush.msrb.mxu2 %v2763_v36  ;;  %3245 = vmatpush.msra.mxu3 %v2543_v34  ;;  %v2815_v32 = vld [vmem:[#allocation23 + $0xb18] sm:$0xff] }
 0x75e   :  { %3126 = vmatpush.msrb.mxu1 %v2538_v45  ;;  %3186 = vmatpush.msra.mxu0 %v2730_v18  ;;  %v2619_v38 = vld [vmem:[#allocation23 + $0x4f8] sm:$0xff]  ;;  %v2790_v45 = vld [vmem:[#allocation23 + $0xa50] sm:$0xff] }
 0x75f   :  { %3299 = vmatpush.msrb.mxu2 %v2759_v44  ;;  %3246 = vmatpush.msra.mxu3 %v2539_v17  ;;  %v2811_v39 = vld [vmem:[#allocation23 + $0xaf8] sm:$0xff] }
 0x760   :  { %3127 = vmatpush.msrb.mxu1 %v2534_v1  ;;  %3187 = vmatpush.msra.mxu0 %v2726_v14  ;;  %v2615_v22 = vld [vmem:[#allocation23 + $0x4d8] sm:$0xff] }
 0x761   :  { %3300 = vmatpush.msrb.mxu2 %v2755_v0  ;;  %3247 = vmatpush.msra.mxu3 %v2535_v15  ;;  %v2807_v43 = vld [vmem:[#allocation23 + $0xad8] sm:$0xff]  ;;  %v2786_v0 = vld [vmem:[#allocation23 + $0xa30] sm:$0xff] }
 0x762   :  { %3128 = vmatpush.msrb.mxu1 %v2530_v50  ;;  %3188 = vmatpush.msra.mxu0 %v2722_v51  ;;  %v2611_v26 = vld [vmem:[#allocation23 + $0x4b8] sm:$0xff]  ;;  %v2782_v15 = vld [vmem:[#allocation23 + $0xa10] sm:$0xff] }
 0x763   :  { %3301 = vmatpush.msrb.mxu2 %v2751_v48  ;;  %3248 = vmatpush.msra.mxu3 %v2531_v52  ;;  %v2803_v33 = vld [vmem:[#allocation23 + $0xab8] sm:$0xff] }
 0x764   :  { %3129 = vmatpush.msrb.mxu1 %v2526_v55  ;;  %3189 = vmatpush.msra.mxu0 %v2718_v56  ;;  %v2607_v36 = vld [vmem:[#allocation23 + $0x498] sm:$0xff]  ;;  %v3374_v55 = vld [vmem:[#allocation26 + $0xe0] sm:$0xff] }
 0x765   :  { %3302 = vmatpush.msrb.mxu2 %v2747_v54  ;;  %3249 = vmatpush.msra.mxu3 %v2527_v58  ;;  %v2799_v37 = vld [vmem:[#allocation23 + $0xa98] sm:$0xff] }
 0x766   :  { %3130 = vmatmul.f32.vlgmr.msrb.gmra.mxu1 %v5669_v57  ;;  %3190 = vmatmul.f32.vlgmr.msra.gmra.mxu0 %v5692_v47  ;;  %v2603_v34 = vld [vmem:[#allocation23 + $0x478] sm:$0xff] }
 0x767   :  { %3303 = vmatpush.msrb.mxu2 %v2743_v59  ;;  %3194 = vmatpush.msra.mxu1 %v2842_v60  ;;  %v2795_v44 = vld [vmem:[#allocation23 + $0xa78] sm:$0xff]  ;;  %v3370_v60 = vld [vmem:[#allocation26 + $0xc0] sm:$0xff] }
 0x768   :  { %3250 = vmatmul.f32.vlgmr.msra.gmra.mxu3 %v5669_v57  ;;  %3254 = vmatpush.msrb.mxu0 %v2651_v40  ;;  %v2727_v57 = vld [vmem:[#allocation23 + $0x858] sm:$0xff] }
 0x769   :  { %3314 = vmatpush.msrb.mxu3 %v2843_v61  ;;  %3304 = vmatpush.msrb.mxu2 %v2739_v62  ;;  %v2599_v18 = vld [vmem:[#allocation23 + $0x458] sm:$0xff] }
 0x76a   :  { %3195 = vmatpush.msra.mxu1 %v2838_v41  ;;  %3255 = vmatpush.msrb.mxu0 %v2647_v63  ;;  %v2791_v17 = vld [vmem:[#allocation23 + $0xa58] sm:$0xff] }
 0x76b   :  { %3315 = vmatpush.msrb.mxu3 %v2839_v2  ;;  %3305 = vmatpush.msrb.mxu2 %v2735_v3  ;;  %v2595_v1 = vld [vmem:[#allocation23 + $0x438] sm:$0xff]  ;;  %v3362_v2 = vld [vmem:[#allocation26 + $0x80] sm:$0xff] }
 0x76c   :  { %3196 = vmatpush.msra.mxu1 %v2834_v4  ;;  %3256 = vmatpush.msrb.mxu0 %v2643_v5  ;;  %v2787_v14 = vld [vmem:[#allocation23 + $0xa38] sm:$0xff] }
 0x76d   :  { %3316 = vmatpush.msrb.mxu3 %v2835_v6  ;;  %3306 = vmatpush.msrb.mxu2 %v2731_v7  ;;  %v2591_v48 = vld [vmem:[#allocation23 + $0x418] sm:$0xff]  ;;  %v3358_v6 = vld [vmem:[#allocation26 + $0x60] sm:$0xff] }
 0x76e   :  { %3197 = vmatpush.msra.mxu1 %v2830_v8  ;;  %3257 = vmatpush.msrb.mxu0 %v2639_v9  ;;  %v2783_v50 = vld [vmem:[#allocation23 + $0xa18] sm:$0xff] }
 0x76f   :  { %3317 = vmatpush.msrb.mxu3 %v2831_v10  ;;  %3307 = vmatpush.msrb.mxu2 %v2727_v57  ;;  %v2715_v51 = vld [vmem:[#allocation23 + $0x7f8] sm:$0xff]  ;;  %v3354_v10 = vld [vmem:[#allocation26 + $0x40] sm:$0xff] }
 0x770   :  { %3198 = vmatpush.msra.mxu1 %v2826_v11  ;;  %3258 = vmatpush.msrb.mxu0 %v2635_v12  ;;  %v3376_v52 = vld [vmem:[#allocation26 + $0xf0] sm:$0xff] }
 0x771   :  { %3318 = vmatpush.msrb.mxu3 %v2827_v13  ;;  %3308 = vmatpush.msrb.mxu2 %v2723_v20  ;;  %v2711_v54 = vld [vmem:[#allocation23 + $0x7d8] sm:$0xff]  ;;  %v3350_v13 = vld [vmem:[#allocation26 + $0x20] sm:$0xff] }
 0x772   :  { %3199 = vmatpush.msra.mxu1 %v2822_v21  ;;  %3259 = vmatpush.msrb.mxu0 %v2631_v23  ;;  %v2707_v56 = vld [vmem:[#allocation23 + $0x7b8] sm:$0xff] }
 0x773   :  { %3319 = vmatpush.msrb.mxu3 %v2823_v24  ;;  %3309 = vmatpush.msrb.mxu2 %v2719_v16  ;;  %v3372_v58 = vld [vmem:[#allocation26 + $0xd0] sm:$0xff]  ;;  %v3346_v24 = vld [vmem:[#allocation26] sm:$0xff] }
 0x774   :  { %3200 = vmatpush.msra.mxu1 %v2818_v46  ;;  %3260 = vmatpush.msrb.mxu0 %v2627_v19  ;;  %v2703_v59 = vld [vmem:[#allocation23 + $0x798] sm:$0xff]  ;;  %v3406_v19 = vld [vmem:[#allocation26 + $0x1e0] sm:$0xff] }
 0x775   :  { %3310 = vmatmul.f32.vlgmr.msrb.gmra.mxu2 %v5692_v47  ;;  %3320 = vmatpush.msrb.mxu3 %v2819_v25  ;;  %v2798_v47 = vld [vmem:[#allocation23 + $0xa90] sm:$0xff]  ;;  %v2699_v40 = vld [vmem:[#allocation23 + $0x778] sm:$0xff] }
 0x776   :  { %3201 = vmatpush.msra.mxu1 %v2814_v28  ;;  %3261 = vmatpush.msrb.mxu0 %v2623_v29  ;;  %v3368_v61 = vld [vmem:[#allocation26 + $0xb0] sm:$0xff]  ;;  %v3377_v46 = vld [vmem:[#allocation26 + $0xf8] sm:$0xff]  ;;  %v3375_v25 = vld [vmem:[#allocation26 + $0xe8] sm:$0xff] }
 0x777   :  { %3321 = vmatpush.msrb.mxu3 %v2815_v32  ;;  %v2695_v62 = vld [vmem:[#allocation23 + $0x758] sm:$0xff]  ;;  %v3402_v32 = vld [vmem:[#allocation26 + $0x1c0] sm:$0xff] }
 0x778   :  { %3202 = vmatpush.msra.mxu1 %v2810_v35  ;;  %3262 = vmatpush.msrb.mxu0 %v2619_v38  ;;  %v2691_v41 = vld [vmem:[#allocation23 + $0x738] sm:$0xff]  ;;  %v3371_v35 = vld [vmem:[#allocation26 + $0xc8] sm:$0xff]  ;;  %v5721_v38 = vld [vmem:[#allocation25] sm:$0xf] }
 0x779   :  { %3322 = vmatpush.msrb.mxu3 %v2811_v39  ;;  %v2687_v63 = vld [vmem:[#allocation23 + $0x718] sm:$0xff] }
 0x77a   :  { %3203 = vmatpush.msra.mxu1 %v2806_v42  ;;  %3263 = vmatpush.msrb.mxu0 %v2615_v22  ;;  %v2683_v3 = vld [vmem:[#allocation23 + $0x6f8] sm:$0xff]  ;;  %v3367_v22 = vld [vmem:[#allocation26 + $0xa8] sm:$0xff] }
 0x77b   :  { %3323 = vmatpush.msrb.mxu3 %v2807_v43  ;;  %v3360_v4 = vld [vmem:[#allocation26 + $0x70] sm:$0xff]  ;;  %v3373_v29 = vld [vmem:[#allocation26 + $0xd8] sm:$0xff]  ;;  %v2846_v43 = vperm.slane %v5721_v38, 0 }
 0x77c   :  { %3204 = vmatpush.msra.mxu1 %v2802_v53  ;;  %3264 = vmatpush.msrb.mxu0 %v2611_v26  ;;  %v2679_v5 = vld [vmem:[#allocation23 + $0x6d8] sm:$0xff]  ;;  %v2871_v53 = vpop.f32.mrf.mxu0 }
 0x77d   :  { %3324 = vmatpush.msrb.mxu3 %v2803_v33  ;;  %v2675_v7 = vld [vmem:[#allocation23 + $0x6b8] sm:$0xff] }
 0x77e   :  { %3205 = vmatpush.msra.mxu1 %v2798_v47  ;;  %3265 = vmatpush.msrb.mxu0 %v2607_v36  ;;  %v3356_v8 = vld [vmem:[#allocation26 + $0x50] sm:$0xff]  ;;  %v3369_v42 = vld [vmem:[#allocation26 + $0xb8] sm:$0xff]  ;;  %v3394_v47 = vld [vmem:[#allocation26 + $0x180] sm:$0xff] }
 0x77f   :  { %3325 = vmatpush.msrb.mxu3 %v2799_v37  ;;  %v2671_v9 = vld [vmem:[#allocation23 + $0x698] sm:$0xff]  ;;  %v3363_v36 = vld [vmem:[#allocation26 + $0x88] sm:$0xff]  ;;  %v2872_v37 = vadd.f32 %v2871_v53, %v2846_v43 }
 0x780   :  { %3206 = vmatpush.msra.mxu1 %v2794_v30  ;;  %3266 = vmatpush.msrb.mxu0 %v2603_v34  ;;  %v2667_v57 = vld [vmem:[#allocation23 + $0x678] sm:$0xff]  ;;  %v2891_v30 = vpop.f32.mrf.mxu1 }
 0x781   :  { %3326 = vmatpush.msrb.mxu3 %v2795_v44  ;;  %v3352_v11 = vld [vmem:[#allocation26 + $0x30] sm:$0xff]  ;;  %v3365_v33 = vld [vmem:[#allocation26 + $0x98] sm:$0xff] }
 0x782   :  { %3207 = vmatpush.msra.mxu1 %v2790_v45  ;;  %3267 = vmatpush.msrb.mxu0 %v2599_v18  ;;  %v2663_v12 = vld [vmem:[#allocation23 + $0x658] sm:$0xff]  ;;  %v2911_v18 = vpop.f32.mrf.mxu2 }
 0x783   :  { %3327 = vmatpush.msrb.mxu3 %v2791_v17  ;;  %v2659_v20 = vld [vmem:[#allocation23 + $0x638] sm:$0xff]  ;;  %v3390_v17 = vld [vmem:[#allocation26 + $0x160] sm:$0xff] }
 0x784   :  { %3208 = vmatpush.msra.mxu1 %v2786_v0  ;;  %3268 = vmatpush.msrb.mxu0 %v2595_v1  ;;  %v3348_v21 = vld [vmem:[#allocation26 + $0x10] sm:$0xff]  ;;  %v3361_v44 = vld [vmem:[#allocation26 + $0x78] sm:$0xff]  ;;  %v3359_v0 = vld [vmem:[#allocation26 + $0x68] sm:$0xff] }
 0x785   :  { %3328 = vmatpush.msrb.mxu3 %v2787_v14  ;;  %v2655_v23 = vld [vmem:[#allocation23 + $0x618] sm:$0xff]  ;;  %v3438_v1 = vld [vmem:[#allocation26 + $0x2e0] sm:$0xff]  ;;  %v2892_v14 = vadd.f32 %v2891_v30, %v2872_v37 }
 0x786   :  { %3209 = vmatpush.msra.mxu1 %v2782_v15  ;;  %3269 = vmatpush.msrb.mxu0 %v2591_v48  ;;  %v3408_v16 = vld [vmem:[#allocation26 + $0x1f0] sm:$0xff]  ;;  %v2931_v15 = vpop.f32.mrf.mxu3  ;;  %v3397_v37 = vld [vmem:[#allocation26 + $0x198] sm:$0xff] }
 0x787   :  { %3210 = vmatmul.f32.vlgmr.msra.gmra.mxu1 %v5699_v49  ;;  %3329 = vmatpush.msrb.mxu3 %v2783_v50  ;;  %v3404_v28 = vld [vmem:[#allocation26 + $0x1d0] sm:$0xff]  ;;  %v3357_v50 = vld [vmem:[#allocation26 + $0x58] sm:$0xff] }
 0x788   :  { %3270 = vmatmul.f32.vlgmr.msrb.gmra.mxu0 %v5673_v31  ;;  %3274 = vmatpush.msrb.mxu1 %v2715_v51  ;;  %v3366_v31 = vld [vmem:[#allocation26 + $0xa0] sm:$0xff]  ;;  %v3400_v39 = vld [vmem:[#allocation26 + $0x1b0] sm:$0xff] }
 0x789   :  { %3330 = vmatmul.f32.vlgmr.msrb.gmra.mxu3 %v5699_v49  ;;  %3480 = vmatpush.msra.mxu0 %v3376_v52  ;;  %v3364_v49 = vld [vmem:[#allocation26 + $0x90] sm:$0xff]  ;;  %v2912_v52 = vadd.f32 %v2911_v18, %v2892_v14  ;;  %v3393_v18 = vld [vmem:[#allocation26 + $0x178] sm:$0xff] }
 0x78a   :  { %3275 = vmatpush.msrb.mxu1 %v2711_v54  ;;  %v3396_v26 = vld [vmem:[#allocation26 + $0x190] sm:$0xff] }
 0x78b   :  { %3481 = vmatpush.msra.mxu0 %v3374_v55  ;;  %v3392_v34 = vld [vmem:[#allocation26 + $0x170] sm:$0xff]  ;;  %v3386_v55 = vld [vmem:[#allocation26 + $0x140] sm:$0xff] }
 0x78c   :  { %3276 = vmatpush.msrb.mxu1 %v2707_v56  ;;  %v3440_v45 = vld [vmem:[#allocation26 + $0x2f0] sm:$0xff]  ;;  %v3355_v56 = vld [vmem:[#allocation26 + $0x48] sm:$0xff] }
 0x78d   :  { %3482 = vmatpush.msra.mxu0 %v3372_v58  ;;  %3520 = vmatpush.msra.mxu2 %v3440_v45  ;;  %v3388_v48 = vld [vmem:[#allocation26 + $0x150] sm:$0xff]  ;;  %v3434_v58 = vld [vmem:[#allocation26 + $0x2c0] sm:$0xff] }
 0x78e   :  { %3277 = vmatpush.msrb.mxu1 %v2703_v59  ;;  %v3436_v51 = vld [vmem:[#allocation26 + $0x2d0] sm:$0xff]  ;;  %v2932_v59 = vadd.f32 %v2931_v15, %v2912_v52  ;;  %v3410_v45 = vld [vmem:[#allocation26 + $0x200] sm:$0xff]  ;;  %v3387_v52 = vld [vmem:[#allocation26 + $0x148] sm:$0xff] }
 0x78f   :  { %3483 = vmatpush.msra.mxu0 %v3370_v60  ;;  %3521 = vmatpush.msra.mxu2 %v3438_v1  ;;  %v3384_v60 = vld [vmem:[#allocation26 + $0x130] sm:$0xff]  ;;  %v3439_v1 = vld [vmem:[#allocation26 + $0x2e8] sm:$0xff]  ;;  %v3470_v15 = vld [vmem:[#allocation26 + $0x3e0] sm:$0xff] }
 0x790   :  { %3278 = vmatpush.msrb.mxu1 %v2699_v40  ;;  %v3353_v40 = vld [vmem:[#allocation26 + $0x38] sm:$0xff]  ;;  %v3416_v53 = vld [vmem:[#allocation26 + $0x230] sm:$0xff] }
 0x791   :  { %3484 = vmatpush.msra.mxu0 %v3368_v61  ;;  %3522 = vmatpush.msra.mxu2 %v3436_v51  ;;  %v3432_v61 = vld [vmem:[#allocation26 + $0x2b0] sm:$0xff] }
 0x792   :  { %3279 = vmatpush.msrb.mxu1 %v2695_v62  ;;  %v3412_v30 = vld [vmem:[#allocation26 + $0x210] sm:$0xff] }
 0x793   :  { %3485 = vmatpush.msra.mxu0 %v3366_v31  ;;  %3523 = vmatpush.msra.mxu2 %v3434_v58  ;;  %v3382_v31 = vld [vmem:[#allocation26 + $0x120] sm:$0xff]  ;;  %v3472_v14 = vld [vmem:[#allocation26 + $0x3f0] sm:$0xff]  ;;  %v3433_v58 = vld [vmem:[#allocation26 + $0x2b8] sm:$0xff] }
 0x794   :  { %3280 = vmatpush.msrb.mxu1 %v2691_v41  ;;  %3540 = vmatpush.msra.mxu3 %v3472_v14  ;;  %v3468_v51 = vld [vmem:[#allocation26 + $0x3d0] sm:$0xff]  ;;  %v3449_v14 = vld [vmem:[#allocation26 + $0x338] sm:$0xff] }
 0x795   :  { %3486 = vmatpush.msra.mxu0 %v3364_v49  ;;  %v3351_v49 = vld [vmem:[#allocation26 + $0x28] sm:$0xff]  ;;  %3524 = vmatpush.msra.mxu2 %v3432_v61  ;;  %v3462_v61 = vld [vmem:[#allocation26 + $0x3a0] sm:$0xff] }
 0x796   :  { %3281 = vmatpush.msrb.mxu1 %v2687_v63  ;;  %v3430_v63 = vld [vmem:[#allocation26 + $0x2a0] sm:$0xff]  ;;  %3541 = vmatpush.msra.mxu3 %v3470_v15  ;;  %v3447_v15 = vld [vmem:[#allocation26 + $0x328] sm:$0xff] }
 0x797   :  { %3487 = vmatpush.msra.mxu0 %v3362_v2  ;;  %v2847_v2 = vperm.slane %v5721_v38, 1  ;;  %3525 = vmatpush.msra.mxu2 %v3430_v63  ;;  %v3427_v63 = vld [vmem:[#allocation26 + $0x288] sm:$0xff] }
 0x798   :  { %3282 = vmatpush.msrb.mxu1 %v2683_v3  ;;  %3542 = vmatpush.msra.mxu3 %v3468_v51  ;;  %v2849_v51 = vperm.slane %v5721_v38, 3 }
 0x799   :  { %3488 = vmatpush.msra.mxu0 %v3360_v4  ;;  %v2991_v4 = vpop.f32.mrf.mxu2 }
 0x79a   :  { %3283 = vmatpush.msrb.mxu1 %v2679_v5  ;;  %v3380_v5 = vld [vmem:[#allocation26 + $0x110] sm:$0xff] }
 0x79b   :  { %3489 = vmatpush.msra.mxu0 %v3358_v6  ;;  %v3349_v6 = vld [vmem:[#allocation26 + $0x18] sm:$0xff] }
 0x79c   :  { %3284 = vmatpush.msrb.mxu1 %v2675_v7  ;;  %v3428_v7 = vld [vmem:[#allocation26 + $0x290] sm:$0xff] }
 0x79d   :  { %3490 = vmatpush.msra.mxu0 %v3356_v8  ;;  %3526 = vmatpush.msra.mxu2 %v3428_v7  ;;  %v3454_v7 = vld [vmem:[#allocation26 + $0x360] sm:$0xff] }
 0x79e   :  { %3285 = vmatpush.msrb.mxu1 %v2671_v9  ;;  %v2951_v54 = vpop.f32.mrf.mxu0  ;;  %v3011_v9 = vpop.f32.mrf.mxu3 }
 0x79f   :  { %3491 = vmatpush.msra.mxu0 %v3354_v10  ;;  %v2952_v62 = vadd.f32 %v2951_v54, %v2932_v59  ;;  %v3378_v10 = vld [vmem:[#allocation26 + $0x100] sm:$0xff]  ;;  %v3435_v54 = vld [vmem:[#allocation26 + $0x2c8] sm:$0xff]  ;;  %v3464_v59 = vld [vmem:[#allocation26 + $0x3b0] sm:$0xff] }
 0x7a0   :  { %3286 = vmatpush.msrb.mxu1 %v2667_v57  ;;  %v3347_v57 = vld [vmem:[#allocation26 + $0x8] sm:$0xff] }
 0x7a1   :  { %3492 = vmatpush.msra.mxu0 %v3352_v11  ;;  %v3426_v11 = vld [vmem:[#allocation26 + $0x280] sm:$0xff] }
 0x7a2   :  { %3287 = vmatpush.msrb.mxu1 %v2663_v12  ;;  %v2992_v12 = vadd.f32 %v2991_v4, %v2847_v2  ;;  %3527 = vmatpush.msra.mxu2 %v3426_v11  ;;  %v3425_v2 = vld [vmem:[#allocation26 + $0x278] sm:$0xff]  ;;  %v3423_v4 = vld [vmem:[#allocation26 + $0x268] sm:$0xff] }
 0x7a3   :  { %3493 = vmatpush.msra.mxu0 %v3350_v13  ;;  %v3409_v13 = vld [vmem:[#allocation26 + $0x1f8] sm:$0xff]  ;;  %v3415_v11 = vld [vmem:[#allocation26 + $0x228] sm:$0xff] }
 0x7a4   :  { %3288 = vmatpush.msrb.mxu1 %v2659_v20 }
 0x7a5   :  { %3494 = vmatpush.msra.mxu0 %v3348_v21 }
 0x7a6   :  { %3289 = vmatpush.msrb.mxu1 %v2655_v23  ;;  %v3031_v21 = vpop.f32.mrf.mxu0  ;;  %v3424_v23 = vld [vmem:[#allocation26 + $0x270] sm:$0xff] }
 0x7a7   :  { %3290 = vmatmul.f32.vlgmr.msrb.gmra.mxu1 %v5679_v27  ;;  %3495 = vmatpush.msra.mxu0 %v3346_v24  ;;  %v3398_v27 = vld [vmem:[#allocation26 + $0x1a0] sm:$0xff]  ;;  %v3012_v24 = vadd.f32 %v3011_v9, %v2992_v12  ;;  %v3452_v9 = vld [vmem:[#allocation26 + $0x350] sm:$0xff] }
 0x7a8   :  { %3500 = vmatpush.msra.mxu1 %v3408_v16  ;;  %v3407_v16 = vld [vmem:[#allocation26 + $0x1e8] sm:$0xff]  ;;  %3528 = vmatpush.msra.mxu2 %v3424_v23  ;;  %v3448_v12 = vld [vmem:[#allocation26 + $0x330] sm:$0xff] }
 0x7a9   :  { %3560 = vmatpush.msrb.mxu0 %v3377_v46  ;;  %v3422_v46 = vld [vmem:[#allocation26 + $0x260] sm:$0xff] }
 0x7aa   :  { %3501 = vmatpush.msra.mxu1 %v3406_v19  ;;  %v3032_v19 = vadd.f32 %v3031_v21, %v3012_v24  ;;  %3529 = vmatpush.msra.mxu2 %v3422_v46  ;;  %v3446_v21 = vld [vmem:[#allocation26 + $0x320] sm:$0xff]  ;;  %v3411_v24 = vld [vmem:[#allocation26 + $0x208] sm:$0xff] }
 0x7ab   :  { %3561 = vmatpush.msrb.mxu0 %v3375_v25  ;;  %v3405_v25 = vld [vmem:[#allocation26 + $0x1d8] sm:$0xff] }
 0x7ac   :  { %3502 = vmatpush.msra.mxu1 %v3404_v28 }
 0x7ad   :  { %3562 = vmatpush.msrb.mxu0 %v3373_v29  ;;  %v3420_v29 = vld [vmem:[#allocation26 + $0x250] sm:$0xff] }
 0x7ae   :  { %3503 = vmatpush.msra.mxu1 %v3402_v32  ;;  %v3403_v32 = vld [vmem:[#allocation26 + $0x1c8] sm:$0xff]  ;;  %3530 = vmatpush.msra.mxu2 %v3420_v29 }
 0x7af   :  { %3563 = vmatpush.msrb.mxu0 %v3371_v35 }
 0x7b0   :  { %3504 = vmatpush.msra.mxu1 %v3400_v39  ;;  %v3071_v39 = vpop.f32.mrf.mxu2 }
 0x7b1   :  { %3564 = vmatpush.msrb.mxu0 %v3369_v42  ;;  %v3418_v42 = vld [vmem:[#allocation26 + $0x240] sm:$0xff] }
 0x7b2   :  { %3505 = vmatpush.msra.mxu1 %v3398_v27  ;;  %v3401_v27 = vld [vmem:[#allocation26 + $0x1b8] sm:$0xff]  ;;  %3531 = vmatpush.msra.mxu2 %v3418_v42 }
 0x7b3   :  { %3565 = vmatpush.msrb.mxu0 %v3367_v22 }
 0x7b4   :  { %3506 = vmatpush.msra.mxu1 %v3396_v26  ;;  %3532 = vmatpush.msra.mxu2 %v3416_v53 }
 0x7b5   :  { %3566 = vmatpush.msrb.mxu0 %v3365_v33  ;;  %v3399_v33 = vld [vmem:[#allocation26 + $0x1a8] sm:$0xff] }
 0x7b6   :  { %3507 = vmatpush.msra.mxu1 %v3394_v47  ;;  %v3414_v47 = vld [vmem:[#allocation26 + $0x220] sm:$0xff] }
 0x7b7   :  { %3567 = vmatpush.msrb.mxu0 %v3363_v36  ;;  %3533 = vmatpush.msra.mxu2 %v3414_v47  ;;  %v3461_v47 = vld [vmem:[#allocation26 + $0x398] sm:$0xff] }
 0x7b8   :  { %3508 = vmatpush.msra.mxu1 %v3392_v34  ;;  %v3395_v34 = vld [vmem:[#allocation26 + $0x188] sm:$0xff] }
 0x7b9   :  { %3568 = vmatpush.msrb.mxu0 %v3361_v44  ;;  %3534 = vmatpush.msra.mxu2 %v3412_v30 }
 0x7ba   :  { %3509 = vmatpush.msra.mxu1 %v3390_v17  ;;  %v3441_v17 = vld [vmem:[#allocation26 + $0x2f8] sm:$0xff] }
 0x7bb   :  { %3569 = vmatpush.msrb.mxu0 %v3359_v0  ;;  %v3391_v0 = vld [vmem:[#allocation26 + $0x168] sm:$0xff]  ;;  %3535 = vmatpush.msra.mxu2 %v3410_v45  ;;  %v3457_v45 = vld [vmem:[#allocation26 + $0x378] sm:$0xff] }
 0x7bc   :  { %3510 = vmatpush.msra.mxu1 %v3388_v48  ;;  %v3389_v48 = vld [vmem:[#allocation26 + $0x158] sm:$0xff] }
 0x7bd   :  { %3570 = vmatpush.msrb.mxu0 %v3357_v50  ;;  %3600 = vmatpush.msrb.mxu2 %v3441_v17  ;;  %v3437_v50 = vld [vmem:[#allocation26 + $0x2d8] sm:$0xff]  ;;  %v3455_v17 = vld [vmem:[#allocation26 + $0x368] sm:$0xff] }
 0x7be   :  { %3511 = vmatpush.msra.mxu1 %v3386_v55  ;;  %v3466_v55 = vld [vmem:[#allocation26 + $0x3c0] sm:$0xff] }
 0x7bf   :  { %3571 = vmatpush.msrb.mxu0 %v3355_v56  ;;  %v2971_v41 = vpop.f32.mrf.mxu1  ;;  %3601 = vmatpush.msrb.mxu2 %v3439_v1  ;;  %v3385_v56 = vld [vmem:[#allocation26 + $0x138] sm:$0xff]  ;;  %v3451_v1 = vld [vmem:[#allocation26 + $0x348] sm:$0xff] }
 0x7c0   :  { %3512 = vmatpush.msra.mxu1 %v3384_v60  ;;  %v2972_v3 = vadd.f32 %v2971_v41, %v2952_v62  ;;  %v3383_v60 = vld [vmem:[#allocation26 + $0x128] sm:$0xff]  ;;  %3543 = vmatpush.msra.mxu3 %v3466_v55  ;;  %v3381_v62 = vld [vmem:[#allocation26 + $0x118] sm:$0xff]  ;;  %v3460_v41 = vld [vmem:[#allocation26 + $0x390] sm:$0xff]  ;;  %v3111_v23 = vpop.f32.mrf.mxu0 }
 0x7c1   :  { %3572 = vmatpush.msrb.mxu0 %v3353_v40  ;;  %3602 = vmatpush.msrb.mxu2 %v3437_v50  ;;  %v3431_v40 = vld [vmem:[#allocation26 + $0x2a8] sm:$0xff] }
 0x7c2   :  { %3513 = vmatpush.msra.mxu1 %v3382_v31  ;;  %vm3334_vm13 = vcmp.ge.f32.partialorder %v2972_v3, 0.0  ;;  %v3338_v8 = vmul.f32 0.2, %v2972_v3  ;;  %3544 = vmatpush.msra.mxu3 %v3464_v59  ;;  %v3429_v31 = vld [vmem:[#allocation26 + $0x298] sm:$0xff]  ;;  %v3443_v50 = vld [vmem:[#allocation26 + $0x308] sm:$0xff] }
 0x7c3   :  { %3573 = vmatpush.msrb.mxu0 %v3351_v49  ;;  %3603 = vmatpush.msrb.mxu2 %v3435_v54  ;;  %v3379_v49 = vld [vmem:[#allocation26 + $0x108] sm:$0xff] }
 0x7c4   :  { %3514 = vmatpush.msra.mxu1 %v3380_v5  ;;  %v3342_v20 = vsel %vm3334_vm13, %v2972_v3, %v3338_v8  ;;  %3545 = vmatpush.msra.mxu3 %v3462_v61  ;;  %v3458_v3 = vld [vmem:[#allocation26 + $0x380] sm:$0xff]  ;;  %v3456_v5 = vld [vmem:[#allocation26 + $0x370] sm:$0xff]  ;;  %v3419_v8 = vld [vmem:[#allocation26 + $0x248] sm:$0xff] }
 0x7c5   :  { %3574 = vmatpush.msrb.mxu0 %v3349_v6  ;;  %v3091_v43 = vpop.f32.mrf.mxu3  ;;  %3604 = vmatpush.msrb.mxu2 %v3433_v58  ;;  %v3421_v6 = vld [vmem:[#allocation26 + $0x258] sm:$0xff] }
 0x7c6   :  { %3496 = vmatmul.f32.vlgmr.msra.gmra.mxu0 %v3342_v20  ;;  %3515 = vmatpush.msra.mxu1 %v3378_v10  ;;  %v3417_v10 = vld [vmem:[#allocation26 + $0x238] sm:$0xff] }
 0x7c7   :  { %3575 = vmatpush.msrb.mxu0 %v3347_v57  ;;  %3605 = vmatpush.msrb.mxu2 %v3431_v40  ;;  %v3450_v57 = vld [vmem:[#allocation26 + $0x340] sm:$0xff] }
 0x7c8   :  { %3580 = vmatpush.msrb.mxu1 %v3409_v13  ;;  %3546 = vmatpush.msra.mxu3 %v3460_v41  ;;  %v2848_v13 = vperm.slane %v5721_v38, 2  ;;  %v5730_v38 = vld [vmem:[%s6095_s19 + $0x78] sm:$0xff] }
 0x7c9   :  { %v3051_v28 = vpop.f32.mrf.mxu1  ;;  %3606 = vmatpush.msrb.mxu2 %v3429_v31  ;;  %3676 = vmatpush.msra.mxu0 %v5730_v38 }
 0x7ca   :  { %3581 = vmatpush.msrb.mxu1 %v3407_v16  ;;  %v3052_v35 = vadd.f32 %v3051_v28, %v3032_v19  ;;  %3547 = vmatpush.msra.mxu3 %v3458_v3  ;;  %v3444_v16 = vld [vmem:[#allocation26 + $0x310] sm:$0xff]  ;;  %v3112_v19 = vadd.f32 %v3111_v23, %v2848_v13  ;;  %v3473_v28 = vld [vmem:[#allocation26 + $0x3f8] sm:$0xff]  ;;  %v5805_v13 = vld [vmem:[%s6095_s19 + $0x40] sm:$0xff] }
 0x7cb   :  { %3607 = vmatpush.msrb.mxu2 %v3427_v63  ;;  %v5741_v3 = vld [vmem:[%s6095_s19 + $0x68] sm:$0xff]  ;;  %v5824_v23 = vld [vmem:[%s6095_s19 + $0xc0] sm:$0xff] }
 0x7cc   :  { %3582 = vmatpush.msrb.mxu1 %v3405_v25  ;;  %v3072_v22 = vadd.f32 %v3071_v39, %v3052_v35  ;;  %3548 = vmatpush.msra.mxu3 %v3456_v5  ;;  %v3442_v25 = vld [vmem:[#allocation26 + $0x300] sm:$0xff]  ;;  %v3151_v35 = vpop.f32.mrf.mxu2  ;;  %v3469_v39 = vld [vmem:[#allocation26 + $0x3d8] sm:$0xff] }
 0x7cd   :  { %3608 = vmatpush.msrb.mxu2 %v3425_v2  ;;  %v5736_v2 = vld [vmem:[%s6095_s19 + $0x70] sm:$0xff]  ;;  %v5752_v5 = vld [vmem:[%s6095_s19 + $0x60] sm:$0xff] }
 0x7ce   :  { %3583 = vmatpush.msrb.mxu1 %v3403_v32  ;;  %3576 = vmatmul.f32.vlgmr.msrb.gmra.mxu0 %v3342_v20  ;;  %v3092_v26 = vadd.f32 %v3091_v43, %v3072_v22  ;;  %v3413_v20 = vld [vmem:[#allocation26 + $0x218] sm:$0xff]  ;;  %v3471_v32 = vld [vmem:[#allocation26 + $0x3e8] sm:$0xff] }
 0x7cf   :  { %3609 = vmatpush.msrb.mxu2 %v3423_v4  ;;  %3549 = vmatpush.msra.mxu3 %v3454_v7  ;;  %v3171_v22 = vpop.f32.mrf.mxu3  ;;  %v3465_v43 = vld [vmem:[#allocation26 + $0x3b8] sm:$0xff]  ;;  %v5764_v7 = vld [vmem:[%s6095_s19 + $0xe8] sm:$0xff] }
 0x7d0   :  { %3584 = vmatpush.msrb.mxu1 %v3401_v27  ;;  %v3339_v36 = vmul.f32 0.2, %v3092_v26  ;;  %vm3335_vm14 = vcmp.ge.f32.partialorder %v3092_v26, 0.0  ;;  %v3467_v27 = vld [vmem:[#allocation26 + $0x3c8] sm:$0xff]  ;;  %3677 = vmatpush.msra.mxu0 %v5736_v2  ;;  %v5747_v4 = vld [vmem:[%s6095_s19 + $0xf8] sm:$0xff] }
 0x7d1   :  { %3610 = vmatpush.msrb.mxu2 %v3421_v6  ;;  %3550 = vmatpush.msra.mxu3 %v3452_v9  ;;  %v5758_v6 = vld [vmem:[%s6095_s19 + $0xf0] sm:$0xff]  ;;  %v5776_v9 = vld [vmem:[%s6095_s19 + $0xe0] sm:$0xff] }
 0x7d2   :  { %3585 = vmatpush.msrb.mxu1 %v3399_v33  ;;  %v3343_v44 = vsel %vm3335_vm14, %v3092_v26, %v3339_v36  ;;  %v3463_v26 = vld [vmem:[#allocation26 + $0x3a8] sm:$0xff]  ;;  %3678 = vmatpush.msra.mxu0 %v5741_v3 }
 0x7d3   :  { %3516 = vmatmul.f32.vlgmr.msra.gmra.mxu1 %v3343_v44  ;;  %3611 = vmatpush.msrb.mxu2 %v3419_v8  ;;  %v5769_v8 = vld [vmem:[%s6095_s19 + $0x58] sm:$0xff] }
 0x7d4   :  { %3586 = vmatpush.msrb.mxu1 %v3397_v37  ;;  %3551 = vmatpush.msra.mxu3 %v3450_v57  ;;  %v5788_v57 = vld [vmem:[%s6095_s19 + $0xd8] sm:$0xff] }
 0x7d5   :  { %3612 = vmatpush.msrb.mxu2 %v3417_v10  ;;  %3679 = vmatpush.msra.mxu0 %v5752_v5  ;;  %v5781_v10 = vld [vmem:[%s6095_s19 + $0x50] sm:$0xff] }
 0x7d6   :  { %3587 = vmatpush.msrb.mxu1 %v3395_v34  ;;  %3552 = vmatpush.msra.mxu3 %v3448_v12  ;;  %v3459_v34 = vld [vmem:[#allocation26 + $0x388] sm:$0xff]  ;;  %v5800_v12 = vld [vmem:[%s6095_s19 + $0xd0] sm:$0xff] }
 0x7d7   :  { %3613 = vmatpush.msrb.mxu2 %v3415_v11  ;;  %3680 = vmatpush.msra.mxu0 %v5769_v8  ;;  %v5793_v11 = vld [vmem:[%s6095_s19 + $0x48] sm:$0xff] }
 0x7d8   :  { %3588 = vmatpush.msrb.mxu1 %v3393_v18  ;;  %3553 = vmatpush.msra.mxu3 %v3446_v21  ;;  %v5817_v21 = vld [vmem:[%s6095_s19 + $0x38] sm:$0xff] }
 0x7d9   :  { %3614 = vmatpush.msrb.mxu2 %v3413_v20  ;;  %3681 = vmatpush.msra.mxu0 %v5781_v10  ;;  %v5812_v20 = vld [vmem:[%s6095_s19 + $0xc8] sm:$0xff] }
 0x7da   :  { %3589 = vmatpush.msrb.mxu1 %v3391_v0  ;;  %3554 = vmatpush.msra.mxu3 %v3444_v16  ;;  %v3453_v0 = vld [vmem:[#allocation26 + $0x358] sm:$0xff] }
 0x7db   :  { %3615 = vmatpush.msrb.mxu2 %v3411_v24  ;;  %3682 = vmatpush.msra.mxu0 %v5793_v11  ;;  %v5829_v24 = vld [vmem:[%s6095_s19 + $0x30] sm:$0xff]  ;;  %v5836_v16 = vld [vmem:[%s6095_s19 + $0xb8] sm:$0xff] }
 0x7dc   :  { %3590 = vmatpush.msrb.mxu1 %v3389_v48  ;;  %3555 = vmatpush.msra.mxu3 %v3442_v25  ;;  %v3445_v48 = vld [vmem:[#allocation26 + $0x318] sm:$0xff]  ;;  %v5853_v25 = vld [vmem:[%s6095_s19 + $0x20] sm:$0xff] }
 0x7dd   :  { %3683 = vmatpush.msra.mxu0 %v5805_v13 }
 0x7de   :  { %3591 = vmatpush.msrb.mxu1 %v3387_v52  ;;  %3620 = vmatpush.msrb.mxu3 %v3473_v28  ;;  %v3231_v52 = vpop.f32.mrf.mxu2  ;;  %v5860_v28 = vld [vmem:[%s6095_s19 + $0x18] sm:$0xff] }
 0x7df   :  { %v3232_v55 = vadd.f32 %v3231_v52, %v2849_v51  ;;  %3684 = vmatpush.msra.mxu0 %v5817_v21 }
 0x7e0   :  { %3592 = vmatpush.msrb.mxu1 %v3385_v56  ;;  %3621 = vmatpush.msrb.mxu3 %v3471_v32  ;;  %v5874_v32 = vld [vmem:[%s6095_s19 + $0x8] sm:$0xff] }
 0x7e1   :  { %3685 = vmatpush.msra.mxu0 %v5829_v24 }
 0x7e2   :  { %3593 = vmatpush.msrb.mxu1 %v3383_v60  ;;  %3622 = vmatpush.msrb.mxu3 %v3469_v39  ;;  %v5886_v39 = vld [vmem:[%s6095_s19] sm:$0xff] }
 0x7e3   :  { %v3131_v46 = vpop.f32.mrf.mxu1  ;;  %v3191_v33 = vpop.f32.mrf.mxu0 }
 0x7e4   :  { %3594 = vmatpush.msrb.mxu1 %v3381_v62  ;;  %v3132_v29 = vadd.f32 %v3131_v46, %v3112_v19  ;;  %3623 = vmatpush.msrb.mxu3 %v3467_v27  ;;  %v5841_v46 = vld [vmem:[%s6095_s19 + $0x28] sm:$0xff]  ;;  %v5848_v19 = vld [vmem:[%s6095_s19 + $0xb0] sm:$0xff]  ;;  %v5898_v27 = vld [vmem:[%s6095_s19 + $0x98] sm:$0xff] }
 0x7e5   :  { %3686 = vmatpush.msra.mxu0 %v5841_v46 }
 0x7e6   :  { %3595 = vmatpush.msrb.mxu1 %v3379_v49  ;;  %v3152_v42 = vadd.f32 %v3151_v35, %v3132_v29  ;;  %3624 = vmatpush.msrb.mxu3 %v3465_v43  ;;  %v5867_v29 = vld [vmem:[%s6095_s19 + $0x10] sm:$0xff]  ;;  %v5879_v35 = vld [vmem:[%s6095_s19 + $0xa8] sm:$0xff] }
 0x7e7   :  { %3596 = vmatmul.f32.vlgmr.msrb.gmra.mxu1 %v3343_v44  ;;  %3687 = vmatpush.msra.mxu0 %v5853_v25  ;;  %v5910_v43 = vld [vmem:[%s6095_s19 + $0x88] sm:$0xff] }
 0x7e8   :  { %v3172_v53 = vadd.f32 %v3171_v22, %v3152_v42  ;;  %3625 = vmatpush.msrb.mxu3 %v3463_v26  ;;  %3696 = vmatpush.msra.mxu1 %v5747_v4  ;;  %v5891_v42 = vld [vmem:[%s6095_s19 + $0xa0] sm:$0xff]  ;;  %v5903_v22 = vld [vmem:[%s6095_s19 + $0x90] sm:$0xff]  ;;  %v3474_v26 = vld [vmem:[#allocation28] sm:$0x3] }
 0x7e9   :  { %3688 = vmatpush.msra.mxu0 %v5860_v28 }
 0x7ea   :  { %v3192_v36 = vadd.f32 %v3191_v33, %v3172_v53  ;;  %3626 = vmatpush.msrb.mxu3 %v3461_v47  ;;  %3697 = vmatpush.msra.mxu1 %v5758_v6  ;;  %v5916_v53 = vld [vmem:[%s6095_s19 + $0x80] sm:$0xff]  ;;  %v3476_v47 = vperm.slane %v3474_v26, 0 }
 0x7eb   :  { %v3251_v54 = vpop.f32.mrf.mxu3  ;;  %3689 = vmatpush.msra.mxu0 %v5867_v29 }
 0x7ec   :  { %3627 = vmatpush.msrb.mxu3 %v3459_v34  ;;  %v3252_v58 = vadd.f32 %v3251_v54, %v3232_v55  ;;  %3698 = vmatpush.msra.mxu1 %v5764_v7  ;;  %v3674_v54 = vld [vmem:[#allocation29 + $0x10] sm:$0xff]  ;;  %v3675_v55 = vld [vmem:[#allocation29 + $0x18] sm:$0xff] }
 0x7ed   :  { %3690 = vmatpush.msra.mxu0 %v5874_v32 }
 0x7ee   :  { %3628 = vmatpush.msrb.mxu3 %v3457_v45  ;;  %3699 = vmatpush.msra.mxu1 %v5776_v9 }
 0x7ef   :  { %3691 = vmatpush.msra.mxu0 %v5886_v39 }
 0x7f0   :  { %3629 = vmatpush.msrb.mxu3 %v3455_v17  ;;  %3700 = vmatpush.msra.mxu1 %v5788_v57 }
 0x7f1   :  { %3851 = vmatpush.msrb.mxu0 %v3674_v54 }
 0x7f2   :  { %3630 = vmatpush.msrb.mxu3 %v3453_v0  ;;  %3701 = vmatpush.msra.mxu1 %v5800_v12 }
 0x7f4   :  { %3631 = vmatpush.msrb.mxu3 %v3451_v1  ;;  %3702 = vmatpush.msra.mxu1 %v5812_v20 }
 0x7f6   :  { %3632 = vmatpush.msrb.mxu3 %v3449_v14  ;;  %3703 = vmatpush.msra.mxu1 %v5824_v23 }
 0x7f8   :  { %3633 = vmatpush.msrb.mxu3 %v3447_v15  ;;  %v3311_v61 = vpop.f32.mrf.mxu2  ;;  %3704 = vmatpush.msra.mxu1 %v5836_v16 }
 0x7fa   :  { %3634 = vmatpush.msrb.mxu3 %v3445_v48  ;;  %3705 = vmatpush.msra.mxu1 %v5848_v19 }
 0x7fc   :  { %3635 = vmatpush.msrb.mxu3 %v3443_v50  ;;  %3706 = vmatpush.msra.mxu1 %v5879_v35 }
 0x7fe   :  { %3707 = vmatpush.msra.mxu1 %v5891_v42 }
 0x800   :  { %3708 = vmatpush.msra.mxu1 %v5898_v27 }
 0x802   :  { %3709 = vmatpush.msra.mxu1 %v5903_v22 }
 0x804   :  { %v3211_v37 = vpop.f32.mrf.mxu1  ;;  %3710 = vmatpush.msra.mxu1 %v5910_v43 }
 0x805   :  { %v3212_v30 = vadd.f32 %v3211_v37, %v3192_v36  ;;  %v3271_v56 = vpop.f32.mrf.mxu0 }
 0x806   :  { %v3272_v59 = vadd.f32 %v3271_v56, %v3252_v58  ;;  %3711 = vmatpush.msra.mxu1 %v5916_v53  ;;  %v3672_v56 = vld [vmem:[#allocation29] sm:$0xff]  ;;  %v3673_v58 = vld [vmem:[#allocation29 + $0x8] sm:$0xff] }
 0x807   :  { %vm3336_vm15 = vcmp.ge.f32.partialorder %v3212_v30, 0.0  ;;  %v3340_v44 = vmul.f32 0.2, %v3212_v30  ;;  %3852 = vmatpush.msrb.mxu0 %v3672_v56 }
 0x808   :  { %3871 = vmatpush.msrb.mxu1 %v3675_v55 }
 0x809   :  { %v3344_v18 = vsel %vm3336_vm15, %v3212_v30, %v3340_v44  ;;  %v3477_v44 = vperm.slane %v3474_v26, 1  ;;  %v3945_v26 = vld [vmem:[%s6099_s23 + $0x50] sm:$0xff] }
 0x80a   :  { %3536 = vmatmul.f32.vlgmr.msra.gmra.mxu2 %v3344_v18  ;;  %3872 = vmatpush.msrb.mxu1 %v3673_v58 }
 0x80b   :  { %3741 = vmatpush.msra.mxu2 %v3674_v54 }
 0x80c   :  { %v3331_v31 = vpop.f32.mrf.mxu3 }
 0x80d   :  { %3742 = vmatpush.msra.mxu2 %v3672_v56 }
 0x812   :  { %3616 = vmatmul.f32.vlgmr.msrb.gmra.mxu2 %v3344_v18 }
 0x813   :  { %3773 = vmatpush.msrb.mxu2 %v5730_v38 }
 0x815   :  { %3774 = vmatpush.msrb.mxu2 %v5736_v2 }
 0x817   :  { %3775 = vmatpush.msrb.mxu2 %v5741_v3 }
 0x819   :  { %3776 = vmatpush.msrb.mxu2 %v5752_v5 }
 0x81b   :  { %3777 = vmatpush.msrb.mxu2 %v5769_v8 }
 0x81d   :  { %3778 = vmatpush.msrb.mxu2 %v5781_v10 }
 0x81f   :  { %3779 = vmatpush.msrb.mxu2 %v5793_v11 }
 0x821   :  { %3780 = vmatpush.msrb.mxu2 %v5805_v13 }
 0x823   :  { %3781 = vmatpush.msrb.mxu2 %v5817_v21 }
 0x824   :  { %v3291_v60 = vpop.f32.mrf.mxu1 }
 0x825   :  { %v3292_v40 = vadd.f32 %v3291_v60, %v3272_v59  ;;  %3782 = vmatpush.msrb.mxu2 %v5829_v24 }
 0x827   :  { %v3312_v62 = vadd.f32 %v3311_v61, %v3292_v40  ;;  %3783 = vmatpush.msrb.mxu2 %v5841_v46 }
 0x829   :  { %v3332_v41 = vadd.f32 %v3331_v31, %v3312_v62  ;;  %3784 = vmatpush.msrb.mxu2 %v5853_v25  ;;  %v3950_v25 = vld [vmem:[%s6099_s23 + $0x78] sm:$0xff] }
 0x82b   :  { %vm3337_vm2 = vcmp.ge.f32.partialorder %v3332_v41, 0.0  ;;  %v3341_v49 = vmul.f32 0.2, %v3332_v41  ;;  %3785 = vmatpush.msrb.mxu2 %v5860_v28  ;;  %v3966_v28 = vld [vmem:[%s6099_s23 + $0xf8] sm:$0xff] }
 0x82d   :  { %v3345_v63 = vsel %vm3337_vm2, %v3332_v41, %v3341_v49  ;;  %3786 = vmatpush.msrb.mxu2 %v5867_v29  ;;  %v3949_v29 = vld [vmem:[%s6099_s23 + $0x70] sm:$0xff] }
 0x82e   :  { %3556 = vmatmul.f32.vlgmr.msra.gmra.mxu3 %v3345_v63 }
 0x82f   :  { %3761 = vmatpush.msra.mxu3 %v3675_v55  ;;  %3787 = vmatpush.msrb.mxu2 %v5874_v32  ;;  %v3965_v32 = vld [vmem:[%s6099_s23 + $0xf0] sm:$0xff] }
 0x831   :  { %3762 = vmatpush.msra.mxu3 %v3673_v58  ;;  %3788 = vmatpush.msrb.mxu2 %v5886_v39  ;;  %v3948_v39 = vld [vmem:[%s6099_s23 + $0x68] sm:$0xff] }
 0x836   :  { %3636 = vmatmul.f32.vlgmr.msrb.gmra.mxu3 %v3345_v63 }
 0x837   :  { %3793 = vmatpush.msrb.mxu3 %v5747_v4 }
 0x839   :  { %3794 = vmatpush.msrb.mxu3 %v5758_v6 }
 0x83b   :  { %3795 = vmatpush.msrb.mxu3 %v5764_v7 }
 0x83d   :  { %3796 = vmatpush.msrb.mxu3 %v5776_v9 }
 0x83f   :  { %3797 = vmatpush.msrb.mxu3 %v5788_v57 }
 0x841   :  { %3798 = vmatpush.msrb.mxu3 %v5800_v12 }
 0x843   :  { %v3497_v33 = vpop.f32.mrf.mxu0  ;;  %3799 = vmatpush.msrb.mxu3 %v5812_v20 }
 0x844   :  { %v3498_v30 = vadd.f32 %v3497_v33, %v3476_v47  ;;  %v3961_v33 = vld [vmem:[%s6099_s23 + $0xd0] sm:$0xff] }
 0x845   :  { %3800 = vmatpush.msrb.mxu3 %v5824_v23 }
 0x847   :  { %3801 = vmatpush.msrb.mxu3 %v5836_v16 }
 0x849   :  { %3802 = vmatpush.msrb.mxu3 %v5848_v19 }
 0x84b   :  { %v3577_v18 = vpop.f32.mrf.mxu0  ;;  %3803 = vmatpush.msrb.mxu3 %v5879_v35 }
 0x84c   :  { %v3578_v14 = vadd.f32 %v3577_v18, %v3477_v44  ;;  %v3959_v44 = vld [vmem:[%s6099_s23 + $0xc0] sm:$0xff] }
 0x84d   :  { %3804 = vmatpush.msrb.mxu3 %v5891_v42  ;;  %v3964_v42 = vld [vmem:[%s6099_s23 + $0xe8] sm:$0xff] }
 0x84f   :  { %3805 = vmatpush.msrb.mxu3 %v5898_v27  ;;  %v3947_v27 = vld [vmem:[%s6099_s23 + $0x60] sm:$0xff] }
 0x850   :  { %v3517_v36 = vpop.f32.mrf.mxu1 }
 0x851   :  { %v3518_v34 = vadd.f32 %v3517_v36, %v3498_v30  ;;  %3806 = vmatpush.msrb.mxu3 %v5903_v22  ;;  %v3963_v22 = vld [vmem:[%s6099_s23 + $0xe0] sm:$0xff]  ;;  %v3944_v36 = vld [vmem:[%s6099_s23 + $0x48] sm:$0xff] }
 0x853   :  { %3807 = vmatpush.msrb.mxu3 %v5910_v43  ;;  %v3946_v43 = vld [vmem:[%s6099_s23 + $0x58] sm:$0xff] }
 0x855   :  { %3808 = vmatpush.msrb.mxu3 %v5916_v53  ;;  %v3962_v53 = vld [vmem:[%s6099_s23 + $0xd8] sm:$0xff] }
 0x864   :  { %v3597_v1 = vpop.f32.mrf.mxu1 }
 0x865   :  { %v3598_v48 = vadd.f32 %v3597_v1, %v3578_v14 }
 0x88d   :  { %v3537_v37 = vpop.f32.mrf.mxu2 }
 0x88e   :  { %v3538_v45 = vadd.f32 %v3537_v37, %v3518_v34  ;;  %v3960_v37 = vld [vmem:[%s6099_s23 + $0xc8] sm:$0xff]  ;;  %v3943_v34 = vld [vmem:[%s6099_s23 + $0x40] sm:$0xff] }
 0x895   :  { %v3617_v15 = vpop.f32.mrf.mxu2 }
 0x896   :  { %v3618_v50 = vadd.f32 %v3617_v15, %v3598_v48  ;;  %v3877_v48 = vld [vmem:[#allocation32] sm:$0x1] }
 0x8b1   :  { %v3557_v17 = vpop.f32.mrf.mxu3 }
 0x8b2   :  { %v5919_v0 = vadd.f32 %v3557_v17, %v3538_v45 }
 0x8b4   :  { %3692 = vmatmul.f32.vlgmr.msra.gmra.mxu0 %v5919_v0 }
 0x8b5   :  { %3895 = vmatpush.msra.mxu0 %v3674_v54  ;;  %v3957_v54 = vld [vmem:[%s6099_s23 + $0xb0] sm:$0xff] }
 0x8b7   :  { %3896 = vmatpush.msra.mxu0 %v3672_v56  ;;  %v3956_v56 = vld [vmem:[%s6099_s23 + $0xa8] sm:$0xff] }
 0x8b9   :  { %v3637_v51 = vpop.f32.mrf.mxu3 }
 0x8ba   :  { %v5922_v52 = vadd.f32 %v3637_v51, %v3618_v50  ;;  %v3942_v50 = vld [vmem:[%s6099_s23 + $0x38] sm:$0xff] }
 0x8bb   :  { %v3958_v51 = vld [vmem:[%s6099_s23 + $0xb8] sm:$0xff] }
 0x8bc   :  { %3712 = vmatmul.f32.vlgmr.msra.gmra.mxu1 %v5922_v52 }
 0x8bd   :  { %3915 = vmatpush.msra.mxu1 %v3675_v55  ;;  %v3940_v55 = vld [vmem:[%s6099_s23 + $0x28] sm:$0xff] }
 0x8bf   :  { %3916 = vmatpush.msra.mxu1 %v3673_v58  ;;  %v3939_v58 = vld [vmem:[%s6099_s23 + $0x20] sm:$0xff] }
 0x931   :  { %v3693_v59 = vpop.f32.mrf.mxu0 }
 0x939   :  { %v3713_v60 = vpop.f32.mrf.mxu1 }
 0x93a   :  { %v3714_v40 = vadd.f32 %v3713_v60, %v3693_v59  ;;  %v3955_v59 = vld [vmem:[%s6099_s23 + $0xa0] sm:$0xff]  ;;  %v3938_v60 = vld [vmem:[%s6099_s23 + $0x18] sm:$0xff] }
 0x93c   :  { %v3716_v61 = vsel %vm500_vm1, %v3714_v40, 0.0  ;;  %v3954_v40 = vld [vmem:[%s6099_s23 + $0x98] sm:$0xff] }
 0x93d   :  { %v3717_v62 = vrot.slane %v3716_v61, 4 }
 0x93f   :  { %v3718_v31 = vadd.f32 %v3717_v62, %v3716_v61  ;;  %v3937_v61 = vld [vmem:[%s6099_s23 + $0x10] sm:$0xff] }
 0x940   :  { %v3953_v62 = vld [vmem:[%s6099_s23 + $0x90] sm:$0xff] }
 0x941   :  { %v3719_v41 = vrot.slane %v3718_v31, 2 }
 0x943   :  { %v3720_v49 = vadd.f32 %v3719_v41, %v3718_v31  ;;  %v3936_v31 = vld [vmem:[%s6099_s23 + $0x8] sm:$0xff] }
 0x944   :  { %v3952_v41 = vld [vmem:[%s6099_s23 + $0x88] sm:$0xff] }
 0x945   :  { %v3721_v63 = vrot.slane %v3720_v49, 1 }
 0x947   :  { %v3722_v38 = vadd.f32 %v3721_v63, %v3720_v49  ;;  %v3935_v49 = vld [vmem:[%s6099_s23] sm:$0xff] }
 0x948   :  { %v3951_v63 = vld [vmem:[%s6099_s23 + $0x80] sm:$0xff] }
 0x949   :  { %v3723_v2 = vmul.f32 0.03125, %v3722_v38 }
 0x94b   :  { %4057 = vmatmul.msk.f32.vlgmr.msra.gmra.mxu2 %vm380_vm0, %v3723_v2  ;;  %4058 = vmatmul.msk.f32.vlgmr.msra.gmra.mxu3 %vm380_vm0, %v3723_v2 }
 0x94c   :  { %3971 = vmatpush.msra.mxu2 %v3950_v25  ;;  %3991 = vmatpush.msra.mxu3 %v3966_v28 }
 0x94e   :  { %3972 = vmatpush.msra.mxu2 %v3949_v29  ;;  %3992 = vmatpush.msra.mxu3 %v3965_v32 }
 0x950   :  { %3973 = vmatpush.msra.mxu2 %v3948_v39  ;;  %3993 = vmatpush.msra.mxu3 %v3964_v42 }
 0x952   :  { %3974 = vmatpush.msra.mxu2 %v3947_v27  ;;  %3994 = vmatpush.msra.mxu3 %v3963_v22 }
 0x954   :  { %3975 = vmatpush.msra.mxu2 %v3946_v43  ;;  %3995 = vmatpush.msra.mxu3 %v3962_v53 }
 0x956   :  { %3976 = vmatpush.msra.mxu2 %v3945_v26  ;;  %3996 = vmatpush.msra.mxu3 %v3961_v33 }
 0x958   :  { %3977 = vmatpush.msra.mxu2 %v3944_v36  ;;  %3997 = vmatpush.msra.mxu3 %v3960_v37 }
 0x95a   :  { %3978 = vmatpush.msra.mxu2 %v3943_v34  ;;  %3998 = vmatpush.msra.mxu3 %v3959_v44 }
 0x95c   :  { %3979 = vmatpush.msra.mxu2 %v3942_v50  ;;  %3999 = vmatpush.msra.mxu3 %v3958_v51 }
 0x95e   :  { %4000 = vmatpush.msra.mxu3 %v3957_v54 }
 0x960   :  { %4001 = vmatpush.msra.mxu3 %v3956_v56 }
 0x962   :  { %4002 = vmatpush.msra.mxu3 %v3955_v59 }
 0x964   :  { %4003 = vmatpush.msra.mxu3 %v3954_v40 }
 0x966   :  { %4004 = vmatpush.msra.mxu3 %v3953_v62 }
 0x968   :  { %4005 = vmatpush.msra.mxu3 %v3952_v41 }
 0x96a   :  { %4006 = vmatpush.msra.mxu3 %v3951_v63 }
 0x9ce   :  { %v3744_v3 = vpop.f32.mrf.mxu2  ;;  %v3764_v4 = vpop.f32.mrf.mxu3 }
 0x9cf   :  { %v3767_v5 = vperm.slane %v3744_v3, 0  ;;  %v3768_v6 = vperm.slane %v3764_v4, 0 }
 0x9d1   :  { %v5961_v7 = vsub.f32 %v5919_v0, %v3767_v5  ;;  %v5964_v8 = vsub.f32 %v5922_v52, %v3768_v6  ;;  %v3821_v0 = vld [vmem:[#allocation31] sm:$0x1]  ;;  %v3941_v52 = vld [vmem:[%s6099_s23 + $0x30] sm:$0xff] }
 0x9d2   :  { %3980 = vmatpush.msra.mxu2 %v3941_v52 }
 0x9d3   :  { %v3771_v9 = vmul.f32 %v5961_v7, %v5961_v7  ;;  %v3772_v10 = vmul.f32 %v5964_v8, %v5964_v8 }
 0x9d4   :  { %3981 = vmatpush.msra.mxu2 %v3940_v55 }
 0x9d5   :  { %3789 = vmatmul.f32.vlgmr.msrb.gmra.mxu2 %v3771_v9  ;;  %3809 = vmatmul.f32.vlgmr.msrb.gmra.mxu3 %v3772_v10 }
 0x9d6   :  { %3982 = vmatpush.msra.mxu2 %v3939_v58 }
 0x9d8   :  { %3983 = vmatpush.msra.mxu2 %v3938_v60 }
 0x9da   :  { %3984 = vmatpush.msra.mxu2 %v3937_v61 }
 0x9dc   :  { %3985 = vmatpush.msra.mxu2 %v3936_v31 }
 0x9de   :  { %3986 = vmatpush.msra.mxu2 %v3935_v49 }
 0xa58   :  { %v3790_v57 = vpop.f32.mrf.mxu2  ;;  %v3810_v11 = vpop.f32.mrf.mxu3 }
 0xa59   :  { %v3811_v12 = vadd.f32 %v3810_v11, %v3790_v57 }
 0xa5b   :  { %v3813_v13 = vsel %vm500_vm1, %v3811_v12, 0.0 }
 0xa5c   :  { %v3814_v20 = vrot.slane %v3813_v13, 4 }
 0xa5e   :  { %v3815_v21 = vadd.f32 %v3814_v20, %v3813_v13 }
 0xa60   :  { %v3816_v23 = vrot.slane %v3815_v21, 2 }
 0xa62   :  { %v3817_v24 = vadd.f32 %v3816_v23, %v3815_v21 }
 0xa64   :  { %v3818_v16 = vrot.slane %v3817_v24, 1 }
 0xa66   :  { %v3819_v46 = vadd.f32 %v3818_v16, %v3817_v24  ;;  %v4089_v16 = vld [vmem:[#allocation2] ss:$0 sm:$0xff] }
 0xa68   :  { %v3820_v19 = vmul.f32 0.03125, %v3819_v46 }
 0xa6a   :  { %v3822_v35 = vadd.f32 1e-05, %v3820_v19 }
 0xa6c   :  { %4106 = vrsqrt.f32 %v3822_v35  ;;  %vm3829_vm3 = vweird.f32 %v3822_v35 }
 0xa72   :  { %v4107_v47 = vpop.eup %4106 }
 0xa73   :  { %v3824_v30 = vmul.f32 %v4107_v47, %v3822_v35  ;;  %vm3830_vm1 = vweird.f32 %v4107_v47 }
 0xa74   :  { %vm3831_vm4 = vmor %vm3829_vm3, %vm3830_vm1 }
 0xa75   :  { %v3825_v45 = vmul.f32 %v4107_v47, %v3824_v30 }
 0xa77   :  { %v3826_v18 = vmul.f32 0.5, %v3825_v45 }
 0xa79   :  { %v3827_v17 = vsub.f32 1.5, %v3826_v18 }
 0xa7b   :  { %v3828_v1 = vmul.f32 %v4107_v47, %v3827_v17 }
 0xa7d   :  { %v3832_v14 = vsel %vm3831_vm4, %v4107_v47, %v3828_v1 }
 0xa7e   :  { %v3833_v15 = vmul.f32 %v3832_v14, %v3821_v0 }
 0xa80   :  { %4059 = vmatmul.msk.f32.vlgmr.msrb.gmra.mxu0 %vm380_vm0, %v3833_v15  ;;  %4060 = vmatmul.msk.f32.vlgmr.msrb.gmra.mxu1 %vm380_vm0, %v3833_v15 }
 0xa88   :  { %4061 = vmatmul.msk.f32.vlgmr.msra.gmra.mxu0 %vm380_vm0, %v3877_v48  ;;  %4062 = vmatmul.msk.f32.vlgmr.msra.gmra.mxu1 %vm380_vm0, %v3877_v48 }
 0xafd   :  { %v3854_v38 = vpop.f32.mrf.mxu0  ;;  %v3874_v2 = vpop.f32.mrf.mxu1 }
 0xafe   :  { %v3921_v3 = vperm.slane %v3854_v38, 0  ;;  %v3922_v4 = vperm.slane %v3874_v2, 0 }
 0xb00   :  { %v3923_v9 = vmul.f32 %v3921_v3, %v5961_v7  ;;  %v3924_v10 = vmul.f32 %v3922_v4, %v5964_v8 }
 0xb05   :  { %v3898_v5 = vpop.f32.mrf.mxu0  ;;  %v3918_v6 = vpop.f32.mrf.mxu1 }
 0xb06   :  { %v3925_v57 = vperm.slane %v3898_v5, 0  ;;  %v3926_v11 = vperm.slane %v3918_v6, 0 }
 0xb08   :  { %v3927_v12 = vadd.f32 %v3925_v57, %v3923_v9  ;;  %v3928_v13 = vadd.f32 %v3926_v11, %v3924_v10 }
 0xb0a   :  { %vm3929_vm0 = vcmp.ge.f32.partialorder %v3927_v12, 0.0  ;;  %v3931_v20 = vmul.f32 0.2, %v3927_v12  ;;  %vm3930_vm5 = vcmp.ge.f32.partialorder %v3928_v13, 0.0  ;;  %v3932_v21 = vmul.f32 0.2, %v3928_v13 }
 0xb0c   :  { %v3933_v23 = vsel %vm3929_vm0, %v3927_v12, %v3931_v20  ;;  %v3934_v24 = vsel %vm3930_vm5, %v3928_v13, %v3932_v21 }
 0xb0d   :  { %3987 = vmatmul.f32.vlgmr.msra.gmra.mxu2 %v3933_v23  ;;  %4007 = vmatmul.f32.vlgmr.msra.gmra.mxu3 %v3934_v24 }
 0xb90   :  { %v3988_v46 = vpop.f32.mrf.mxu2  ;;  %v4008_v25 = vpop.f32.mrf.mxu3 }
 0xb91   :  { %v3989_v19 = vadd.f32 %v4089_v16, %v3988_v46 }
 0xb93   :  { %v4009_v28 = vadd.f32 %v4008_v25, %v3989_v19 }
 0xb95   :  { %v4011_v7 = vsub.f32 0.0, %v4009_v28 }
 0xb97   :  { %v4012_v29 = vmul.f32 1.442695, %v4011_v7 }
 0xb99   :  { %4108 = vpow2.f32 %v4012_v29 }
 0xb9f   :  { %v4109_v8 = vpop.eup %4108 }
 0xba0   :  { %v4014_v32 = vadd.f32 1.0, %v4109_v8 }
 0xba2   :  { %4110 = vrcp.f32 %v4014_v32 }
 0xba8   :  { %v4111_v35 = vpop.eup %4110 }
 0xba9   :  { %4017 = vst.msk [vmem:[%s6179_s6] sm:$0x3] %vm4016_vm6, %v4111_v35 }
 0xbaa   :  { %4026 = vsyncpa [#allocation4], 1 }
 0xbab   :  { %4027 = vsyncpa [#allocation6], 1 }
 0xbac   :  { %4028 = vsyncpa [#allocation9], 1 }
 0xbad   :  { %4029 = vsyncpa [#allocation12], 1 }
 0xbae   :  { %4030 = vsyncpa [#allocation15], 1 }
 0xbaf   :  { %4031 = vsyncpa [#allocation18], 1 }
 0xbb0   :  { %4032 = vsyncpa [#allocation21], 1 }
 0xbb1   :  { %4033 = vsyncpa [#allocation24], 1 }
 0xbb2   :  { %4034 = vsyncpa [#allocation27], 1 }
 0xbb3   :  { %4035 = vsyncpa [#allocation30], 1 }
 0xbb4   :  { %4036 = vsyncpa [#allocation33], 1 }

</bundles_post_ra>
